<compile_context>
chip_gen: v7x
topology: tpu7x:2x2x1
jax: 0.10.0
libtpu: 0.0.40
codegen_flags: <defaults>
</compile_context>

<pallas_src>
import functools

import jax
import jax.numpy as jnp
from jax.experimental import pallas as pl
from jax.experimental.pallas import tpu as pltpu


OUTPUT_SIZE = 64 * 7 * 7          # 3136 = ConvBase._get_conv_output((4, 84, 84))
FC_HIDDEN = 512
FC_K_PAD = 3200                   # OUTPUT_SIZE rounded up to a 128-lane multiple
NP = 128                          # n_actions padded to a full lane width


def _round_up(x, m):
    return (x + m - 1) // m * m


def _choose_m_tile(m, max_tile=1024, align=128):
    """Pick a lane-axis tile for the conv matmuls.

    Keeps pad waste (beyond the mandatory 128-lane alignment) to at most one
    block, and prefers >= 2 grid steps so the "parallel" axis can occupy both
    TensorCores on v7x even at small batch.
    """
    nblk = _round_up(m, align) // align
    nt = -(-nblk // (max_tile // align))       # ceil-div: steps needed for max_tile
    if nt == 1 and nblk >= 2:
        nt = 2                                 # give v7x's second core a tile
    tm = (-(-nblk // nt)) * align
    return tm, nt * tm


# ---------------------------------------------------------------------------
# Pallas kernel 1: transposed conv matmul   O = relu(W^T @ P^T + b)
#   w_ref : (cout, K)   bf16  (whole weight, VMEM-resident across the grid)
#   p_ref : (K, TM)     bf16  (im2col patches tile; M = B*oh*ow is lane-dense)
#   b_ref : (cout, 1)   f32
#   o_ref : (cout, TM)  bf16
# ---------------------------------------------------------------------------
def _convT_kernel(w_ref, p_ref, b_ref, o_ref):
    acc = jnp.dot(w_ref[...], p_ref[...], preferred_element_type=jnp.float32)
    acc = acc + b_ref[...]                       # (cout,1) broadcasts over lanes
    o_ref[...] = jnp.maximum(acc, 0.0).astype(o_ref.dtype)


def _im2col_cf(x_cf, kh, kw, stride, oh, ow):
    """x_cf: (C, B, H, W) -> patches^T (kh*kw*C, B*oh*ow), rows in (i, j, c) order."""
    C, B, H, W = x_cf.shape
    cols = []
    for i in range(kh):
        for j in range(kw):
            cols.append(
                x_cf[:, :, i:i + stride * oh:stride, j:j + stride * ow:stride])
    patches = jnp.stack(cols, axis=0)            # (kh*kw, C, B, oh, ow)
    return patches.reshape(kh * kw * C, B * oh * ow)


def conv2d_relu(x_cf, w_t, b_col, *, kh, kw, stride):
    """Channel-first conv + ReLU.  x_cf:(Cin,B,H,W), w_t:(Cout, kh*kw*Cin) bf16."""
    cin, B, H, W = x_cf.shape
    cout, K = w_t.shape
    assert K == kh * kw * cin, (K, kh, kw, cin)
    oh = (H - kh) // stride + 1
    ow = (W - kw) // stride + 1
    M = B * oh * ow

    p_t = _im2col_cf(x_cf, kh, kw, stride, oh, ow).astype(jnp.bfloat16)
    tm, m_pad = _choose_m_tile(M)
    if m_pad != M:
        p_t = jnp.pad(p_t, ((0, 0), (0, m_pad - M)))

    out = pl.pallas_call(
        _convT_kernel,
        out_shape=jax.ShapeDtypeStruct((cout, m_pad), jnp.bfloat16),
        grid=(m_pad // tm,),
        in_specs=[
            pl.BlockSpec((cout, K), lambda i: (0, 0)),
            pl.BlockSpec((K, tm), lambda i: (0, i)),
            pl.BlockSpec((cout, 1), lambda i: (0, 0)),
        ],
        out_specs=pl.BlockSpec((cout, tm), lambda i: (0, i)),
        compiler_params=pltpu.CompilerParams(
            dimension_semantics=("parallel",)),
    )(w_t, p_t, b_col)
    # Padded M columns hold relu(bias) != 0 -- the slice below removes them.
    return out[:, :M].reshape(cout, B, oh, ow)


# ---------------------------------------------------------------------------
# Pallas kernel 2: fused fc1 + ReLU + fc2 + softmax (wfc1 fully VMEM-resident)
#   grid = (M tiles,)  ["parallel"]
#   x_ref  : (TMB, FC_K_PAD)       bf16
#   w1_ref : (FC_K_PAD, 512)       bf16  (whole fc1 weight, resident)
#   b1_ref : (1, 512)              f32
#   w2_ref : (512, 128)            bf16  (action columns zero-padded to 128)
#   b2_ref : (1, 128)              f32   (pad columns = -1e30 -> softmax == 0)
#   o_ref  : (TMB, 128)            f32
# ---------------------------------------------------------------------------
def _fc_head_kernel(x_ref, w1_ref, b1_ref, w2_ref, b2_ref, o_ref):
    h = jnp.dot(x_ref[...], w1_ref[...], preferred_element_type=jnp.float32)
    h = jnp.maximum(h + b1_ref[...], 0.0)                         # f32
    # Logits must stay f32: the -1e30 pad bias would overflow bf16 to -inf and
    # can NaN after the max-subtract.
    logits = jnp.dot(h.astype(jnp.bfloat16), w2_ref[...],
                     preferred_element_type=jnp.float32) + b2_ref[...]
    m = jnp.max(logits, axis=-1, keepdims=True)
    e = jnp.exp(logits - m)                                       # pad cols -> 0
    denom = jnp.sum(e, axis=-1, keepdims=True)
    inv = pl.reciprocal(denom, approx=True)                       # EUP slot (free)
    o_ref[...] = (e * inv).astype(o_ref.dtype)


def fc_head(x, w1p, b1_row, w2p, b2p_row, n_actions):
    """x: (B, OUTPUT_SIZE) bf16 -> (B, n_actions) f32 action probabilities."""
    assert n_actions <= NP, n_actions
    B, K = x.shape
    k_pad = w1p.shape[0]
    if k_pad != K:
        x = jnp.pad(x, ((0, 0), (0, k_pad - K)))
    # tmb: multiple of 16 (bf16 sublane packing); cap 256 keeps the footprint
    # (x 2x1.6 MiB + resident w1 2x3.3 MiB + w2/bias/out) inside v5e's 16 MiB
    # default scoped VMEM; v6e/v7x (32 MiB) are ample.
    tmb = 256 if B >= 256 else _round_up(B, 16)
    b_pad = _round_up(B, tmb)
    if b_pad != B:
        x = jnp.pad(x, ((0, b_pad - B), (0, 0)))

    out = pl.pallas_call(
        _fc_head_kernel,
        out_shape=jax.ShapeDtypeStruct((b_pad, NP), jnp.float32),
        grid=(b_pad // tmb,),
        in_specs=[
            pl.BlockSpec((tmb, k_pad), lambda i: (i, 0)),
            pl.BlockSpec((k_pad, FC_HIDDEN), lambda i: (0, 0)),   # resident fc1 weight
            pl.BlockSpec((1, FC_HIDDEN), lambda i: (0, 0)),
            pl.BlockSpec((FC_HIDDEN, NP), lambda i: (0, 0)),
            pl.BlockSpec((1, NP), lambda i: (0, 0)),
        ],
        out_specs=pl.BlockSpec((tmb, NP), lambda i: (i, 0)),
        compiler_params=pltpu.CompilerParams(
            dimension_semantics=("parallel",)),
    )(x, w1p, b1_row, w2p, b2p_row)
    return out[:B, :n_actions]


# ---------------------------------------------------------------------------
# Actor forward (alpha == 1 -> softmax over actions)
# ---------------------------------------------------------------------------
def actor_forward(params, x_nchw, *, n_actions):
    # NCHW -> channel-first (C, B, H, W); bf16 activations, f32 accumulation.
    x = jnp.transpose(x_nchw, (1, 0, 2, 3)).astype(jnp.bfloat16)
    x = conv2d_relu(x, params["w1T"], params["b1"], kh=8, kw=8, stride=4)  # (32,B,20,20)
    x = conv2d_relu(x, params["w2T"], params["b2"], kh=4, kw=4, stride=2)  # (64,B, 9, 9)
    x = conv2d_relu(x, params["w3T"], params["b3"], kh=3, kw=3, stride=1)  # (64,B, 7, 7)
    B = x_nchw.shape[0]
    # (C,B,7,7) -> (B,C,7,7) -> (B,3136): PyTorch's NCHW .view(-1, output_size) order.
    feat = jnp.transpose(x, (1, 0, 2, 3)).reshape(B, OUTPUT_SIZE)
    return fc_head(feat, params["wfc1p"], params["bfc1"],
                   params["wfc2p"], params["bfc2p"], n_actions)


# ---------------------------------------------------------------------------
# Parameters
# ---------------------------------------------------------------------------
def init_params(key, n_actions):
    """fp32 parameters in PyTorch-equivalent layout (HWIO convs, (in,out) fcs)."""
    ks = jax.random.split(key, 10)
    s = 0.05
    return {
        "w1": jax.random.normal(ks[0], (8, 8, 4, 32), jnp.float32) * s,
        "b1": jax.random.normal(ks[1], (32,), jnp.float32) * s,
        "w2": jax.random.normal(ks[2], (4, 4, 32, 64), jnp.float32) * s,
        "b2": jax.random.normal(ks[3], (64,), jnp.float32) * s,
        "w3": jax.random.normal(ks[4], (3, 3, 64, 64), jnp.float32) * s,
        "b3": jax.random.normal(ks[5], (64,), jnp.float32) * s,
        "wfc1": jax.random.normal(ks[6], (OUTPUT_SIZE, FC_HIDDEN), jnp.float32) * s,
        "bfc1": jax.random.normal(ks[7], (FC_HIDDEN,), jnp.float32) * s,
        "wfc2": jax.random.normal(ks[8], (FC_HIDDEN, n_actions), jnp.float32) * s,
        "bfc2": jax.random.normal(ks[9], (n_actions,), jnp.float32) * s,
    }


def prepare_params(p):
    """One-time host-side repack: bf16 weights, transposed conv mats, padded fc."""
    def conv_t(w):  # HWIO -> (cout, kh*kw*cin), matching im2col (i, j, c) rows
        kh, kw, cin, cout = w.shape
        return jnp.asarray(w.reshape(kh * kw * cin, cout).T, jnp.bfloat16)

    n_actions = p["wfc2"].shape[1]
    assert n_actions <= NP, n_actions
    wfc1p = jnp.pad(p["wfc1"],
                    ((0, FC_K_PAD - OUTPUT_SIZE), (0, 0))).astype(jnp.bfloat16)
    wfc2p = jnp.pad(p["wfc2"], ((0, 0), (0, NP - n_actions))).astype(jnp.bfloat16)
    # Padded action columns get bias -1e30 so softmax drives them to exactly 0.
    bfc2p = jnp.full((1, NP), -1e30, jnp.float32)
    bfc2p = bfc2p.at[0, :n_actions].set(p["bfc2"].astype(jnp.float32))
    return {
        "w1T": conv_t(p["w1"]), "b1": p["b1"].reshape(-1, 1).astype(jnp.float32),
        "w2T": conv_t(p["w2"]), "b2": p["b2"].reshape(-1, 1).astype(jnp.float32),
        "w3T": conv_t(p["w3"]), "b3": p["b3"].reshape(-1, 1).astype(jnp.float32),
        "wfc1p": wfc1p, "bfc1": p["bfc1"].reshape(1, -1).astype(jnp.float32),
        "wfc2p": wfc2p, "bfc2p": bfc2p,
    }


# ---------------------------------------------------------------------------
# Pure-JAX fp32 reference (mirrors the PyTorch module, alpha == 1)
# ---------------------------------------------------------------------------
def actor_forward_reference(p, x_nchw):
    def conv(x, w, b, stride):
        y = jax.lax.conv_general_dilated(
            x, w, window_strides=(stride, stride), padding="VALID",
            dimension_numbers=("NCHW", "HWIO", "NCHW"))
        return jax.nn.relu(y + b.reshape(1, -1, 1, 1))
    x = x_nchw.astype(jnp.float32)
    x = conv(x, p["w1"], p["b1"], 4)
    x = conv(x, p["w2"], p["b2"], 2)
    x = conv(x, p["w3"], p["b3"], 1)
    x = x.reshape(x.shape[0], -1)
    x = jax.nn.relu(x @ p["wfc1"] + p["bfc1"])
    return jax.nn.softmax(x @ p["wfc2"] + p["bfc2"], axis=1)


if __name__ == "__main__":
    key = jax.random.PRNGKey(0)
    k_par, k_x = jax.random.split(key)

    n_actions = 6
    batch = 2
    torch_params = init_params(k_par, n_actions)
    params = prepare_params(torch_params)
    # Actor expects stacks of 4 grayscale 84x84 frames (NCHW); 84x84 is baked
    # into output_size = 3136, so the spatial size cannot be shrunk.
    x = jax.random.normal(k_x, (batch, 4, 84, 84), jnp.float32)

    fwd = jax.jit(functools.partial(actor_forward, n_actions=n_actions))
    out = jax.block_until_ready(fwd(params, x))

    assert out.shape == (batch, n_actions), out.shape
    # approx reciprocal in the softmax: row sums are 1 to ~1e-3-level error.
    row_sums = jnp.sum(out, axis=1)
    assert jnp.allclose(row_sums, jnp.ones((batch,)), atol=5e-3), row_sums
    assert bool(jnp.all(out >= 0.0))

    # bf16-tolerance check against the fp32 reference.
    ref = jax.jit(actor_forward_reference)(torch_params, x)
    assert jnp.allclose(out, ref, atol=2e-2), (out, ref)

    print("KERNEL_OK")
</pallas_src>

<mosaic_0001>
module attributes {stable_mosaic.version = 11 : i64} {
  func.func @_convT_kernel(%arg0: i32, %arg1: memref<32x256xbf16, #tpu.memory_space<vmem>>, %arg2: memref<256x512xbf16, #tpu.memory_space<vmem>>, %arg3: memref<32x1xf32, #tpu.memory_space<vmem>>, %arg4: memref<32x512xbf16, #tpu.memory_space<vmem>>) attributes {dimension_semantics = [#tpu.dimension_semantics<parallel>], iteration_bounds = array<i64: 2>, scalar_prefetch = 0 : i64, scratch_operands = 0 : i64, tpu.core_type = #tpu.core_type<tc>, window_params = [{pipeline_mode = #tpu.pipeline_mode<synchronous>, transform_indices = @transform_0, window_bounds = array<i64: 32, 256>}, {transform_indices = @transform_1, window_bounds = array<i64: 256, 512>}, {pipeline_mode = #tpu.pipeline_mode<synchronous>, transform_indices = @transform_2, window_bounds = array<i64: 32, 1>}, {transform_indices = @transform_3, window_bounds = array<i64: 32, 512>}]} {
    %c0 = arith.constant 0 : index
    %c0_0 = arith.constant 0 : index
    %0 = vector.load %arg1[%c0, %c0_0] : memref<32x256xbf16, #tpu.memory_space<vmem>>, vector<32x256xbf16>
    %c0_1 = arith.constant 0 : index
    %c0_2 = arith.constant 0 : index
    %1 = vector.load %arg2[%c0_1, %c0_2] : memref<256x512xbf16, #tpu.memory_space<vmem>>, vector<256x512xbf16>
    %cst = arith.constant dense<0.000000e+00> : vector<32x512xf32>
    %2 = tpu.matmul %0, %1, %cst {dimension_numbers = #tpu.dot_dimension_numbers<[1], [0], [0], [1], [0, 0, 1, 1], [], []>} : vector<32x256xbf16>, vector<256x512xbf16>, vector<32x512xf32> -> vector<32x512xf32>
    %c0_3 = arith.constant 0 : index
    %c0_4 = arith.constant 0 : index
    %3 = vector.load %arg3[%c0_3, %c0_4] : memref<32x1xf32, #tpu.memory_space<vmem>>, vector<32x1xf32>
    %4 = vector.broadcast %3 : vector<32x1xf32> to vector<32x512xf32>
    %5 = arith.addf %2, %4 : vector<32x512xf32>
    %cst_5 = arith.constant 0.000000e+00 : f32
    %6 = vector.broadcast %cst_5 : f32 to vector<32x512xf32>
    %7 = arith.maximumf %5, %6 : vector<32x512xf32>
    %8 = arith.truncf %7 : vector<32x512xf32> to vector<32x512xbf16>
    %c0_6 = arith.constant 0 : index
    %c0_7 = arith.constant 0 : index
    %9 = vector.load %arg4[%c0_6, %c0_7] : memref<32x512xbf16, #tpu.memory_space<vmem>>, vector<32x512xbf16>
    tpu.vector_store %arg4[%c0_6, %c0_7], %8 {strides = array<i32>} : memref<32x512xbf16, #tpu.memory_space<vmem>>, vector<32x512xbf16>,
    return
  }
  func.func @transform_0(%arg0: i32) -> (i32, i32) {
    %c0_i32 = arith.constant 0 : i32
    %c0_i32_0 = arith.constant 0 : i32
    %c0_i32_1 = arith.constant 0 : i32
    return %c0_i32, %c0_i32_0 : i32, i32
  }
  func.func @transform_1(%arg0: i32) -> (i32, i32) {
    %c0_i32 = arith.constant 0 : i32
    %c0_i32_0 = arith.constant 0 : i32
    return %c0_i32, %arg0 : i32, i32
  }
  func.func @transform_2(%arg0: i32) -> (i32, i32) {
    %c0_i32 = arith.constant 0 : i32
    %c0_i32_0 = arith.constant 0 : i32
    %c0_i32_1 = arith.constant 0 : i32
    return %c0_i32, %c0_i32_0 : i32, i32
  }
  func.func @transform_3(%arg0: i32) -> (i32, i32) {
    %c0_i32 = arith.constant 0 : i32
    %c0_i32_0 = arith.constant 0 : i32
    return %c0_i32, %arg0 : i32, i32
  }
}

module attributes {stable_mosaic.version = 11 : i64} {
  func.func @_convT_kernel(%arg0: i32, %arg1: memref<64x512xbf16, #tpu.memory_space<vmem>>, %arg2: memref<512x128xbf16, #tpu.memory_space<vmem>>, %arg3: memref<64x1xf32, #tpu.memory_space<vmem>>, %arg4: memref<64x128xbf16, #tpu.memory_space<vmem>>) attributes {dimension_semantics = [#tpu.dimension_semantics<parallel>], iteration_bounds = array<i64: 2>, scalar_prefetch = 0 : i64, scratch_operands = 0 : i64, tpu.core_type = #tpu.core_type<tc>, window_params = [{pipeline_mode = #tpu.pipeline_mode<synchronous>, transform_indices = @transform_0, window_bounds = array<i64: 64, 512>}, {transform_indices = @transform_1, window_bounds = array<i64: 512, 128>}, {pipeline_mode = #tpu.pipeline_mode<synchronous>, transform_indices = @transform_2, window_bounds = array<i64: 64, 1>}, {transform_indices = @transform_3, window_bounds = array<i64: 64, 128>}]} {
    %c0 = arith.constant 0 : index
    %c0_0 = arith.constant 0 : index
    %0 = vector.load %arg1[%c0, %c0_0] : memref<64x512xbf16, #tpu.memory_space<vmem>>, vector<64x512xbf16>
    %c0_1 = arith.constant 0 : index
    %c0_2 = arith.constant 0 : index
    %1 = vector.load %arg2[%c0_1, %c0_2] : memref<512x128xbf16, #tpu.memory_space<vmem>>, vector<512x128xbf16>
    %cst = arith.constant dense<0.000000e+00> : vector<64x128xf32>
    %2 = tpu.matmul %0, %1, %cst {dimension_numbers = #tpu.dot_dimension_numbers<[1], [0], [0], [1], [0, 0, 1, 1], [], []>} : vector<64x512xbf16>, vector<512x128xbf16>, vector<64x128xf32> -> vector<64x128xf32>
    %c0_3 = arith.constant 0 : index
    %c0_4 = arith.constant 0 : index
    %3 = vector.load %arg3[%c0_3, %c0_4] : memref<64x1xf32, #tpu.memory_space<vmem>>, vector<64x1xf32>
    %4 = vector.broadcast %3 : vector<64x1xf32> to vector<64x128xf32>
    %5 = arith.addf %2, %4 : vector<64x128xf32>
    %cst_5 = arith.constant 0.000000e+00 : f32
    %6 = vector.broadcast %cst_5 : f32 to vector<64x128xf32>
    %7 = arith.maximumf %5, %6 : vector<64x128xf32>
    %8 = arith.truncf %7 : vector<64x128xf32> to vector<64x128xbf16>
    %c0_6 = arith.constant 0 : index
    %c0_7 = arith.constant 0 : index
    %9 = vector.load %arg4[%c0_6, %c0_7] : memref<64x128xbf16, #tpu.memory_space<vmem>>, vector<64x128xbf16>
    tpu.vector_store %arg4[%c0_6, %c0_7], %8 {strides = array<i32>} : memref<64x128xbf16, #tpu.memory_space<vmem>>, vector<64x128xbf16>,
    return
  }
  func.func @transform_0(%arg0: i32) -> (i32, i32) {
    %c0_i32 = arith.constant 0 : i32
    %c0_i32_0 = arith.constant 0 : i32
    %c0_i32_1 = arith.constant 0 : i32
    return %c0_i32, %c0_i32_0 : i32, i32
  }
  func.func @transform_1(%arg0: i32) -> (i32, i32) {
    %c0_i32 = arith.constant 0 : i32
    %c0_i32_0 = arith.constant 0 : i32
    return %c0_i32, %arg0 : i32, i32
  }
  func.func @transform_2(%arg0: i32) -> (i32, i32) {
    %c0_i32 = arith.constant 0 : i32
    %c0_i32_0 = arith.constant 0 : i32
    %c0_i32_1 = arith.constant 0 : i32
    return %c0_i32, %c0_i32_0 : i32, i32
  }
  func.func @transform_3(%arg0: i32) -> (i32, i32) {
    %c0_i32 = arith.constant 0 : i32
    %c0_i32_0 = arith.constant 0 : i32
    return %c0_i32, %arg0 : i32, i32
  }
}

module attributes {stable_mosaic.version = 11 : i64} {
  func.func @_convT_kernel(%arg0: i32, %arg1: memref<64x576xbf16, #tpu.memory_space<vmem>>, %arg2: memref<576x128xbf16, #tpu.memory_space<vmem>>, %arg3: memref<64x1xf32, #tpu.memory_space<vmem>>, %arg4: memref<64x128xbf16, #tpu.memory_space<vmem>>) attributes {dimension_semantics = [#tpu.dimension_semantics<parallel>], iteration_bounds = array<i64: 1>, scalar_prefetch = 0 : i64, scratch_operands = 0 : i64, tpu.core_type = #tpu.core_type<tc>, window_params = [{pipeline_mode = #tpu.pipeline_mode<synchronous>, transform_indices = @transform_0, window_bounds = array<i64: 64, 576>}, {transform_indices = @transform_1, window_bounds = array<i64: 576, 128>}, {pipeline_mode = #tpu.pipeline_mode<synchronous>, transform_indices = @transform_2, window_bounds = array<i64: 64, 1>}, {transform_indices = @transform_3, window_bounds = array<i64: 64, 128>}]} {
    %c0 = arith.constant 0 : index
    %c0_0 = arith.constant 0 : index
    %0 = vector.load %arg1[%c0, %c0_0] : memref<64x576xbf16, #tpu.memory_space<vmem>>, vector<64x576xbf16>
    %c0_1 = arith.constant 0 : index
    %c0_2 = arith.constant 0 : index
    %1 = vector.load %arg2[%c0_1, %c0_2] : memref<576x128xbf16, #tpu.memory_space<vmem>>, vector<576x128xbf16>
    %cst = arith.constant dense<0.000000e+00> : vector<64x128xf32>
    %2 = tpu.matmul %0, %1, %cst {dimension_numbers = #tpu.dot_dimension_numbers<[1], [0], [0], [1], [0, 0, 1, 1], [], []>} : vector<64x576xbf16>, vector<576x128xbf16>, vector<64x128xf32> -> vector<64x128xf32>
    %c0_3 = arith.constant 0 : index
    %c0_4 = arith.constant 0 : index
    %3 = vector.load %arg3[%c0_3, %c0_4] : memref<64x1xf32, #tpu.memory_space<vmem>>, vector<64x1xf32>
    %4 = vector.broadcast %3 : vector<64x1xf32> to vector<64x128xf32>
    %5 = arith.addf %2, %4 : vector<64x128xf32>
    %cst_5 = arith.constant 0.000000e+00 : f32
    %6 = vector.broadcast %cst_5 : f32 to vector<64x128xf32>
    %7 = arith.maximumf %5, %6 : vector<64x128xf32>
    %8 = arith.truncf %7 : vector<64x128xf32> to vector<64x128xbf16>
    %c0_6 = arith.constant 0 : index
    %c0_7 = arith.constant 0 : index
    %9 = vector.load %arg4[%c0_6, %c0_7] : memref<64x128xbf16, #tpu.memory_space<vmem>>, vector<64x128xbf16>
    tpu.vector_store %arg4[%c0_6, %c0_7], %8 {strides = array<i32>} : memref<64x128xbf16, #tpu.memory_space<vmem>>, vector<64x128xbf16>,
    return
  }
  func.func @transform_0(%arg0: i32) -> (i32, i32) {
    %c0_i32 = arith.constant 0 : i32
    %c0_i32_0 = arith.constant 0 : i32
    %c0_i32_1 = arith.constant 0 : i32
    return %c0_i32, %c0_i32_0 : i32, i32
  }
  func.func @transform_1(%arg0: i32) -> (i32, i32) {
    %c0_i32 = arith.constant 0 : i32
    %c0_i32_0 = arith.constant 0 : i32
    return %c0_i32, %arg0 : i32, i32
  }
  func.func @transform_2(%arg0: i32) -> (i32, i32) {
    %c0_i32 = arith.constant 0 : i32
    %c0_i32_0 = arith.constant 0 : i32
    %c0_i32_1 = arith.constant 0 : i32
    return %c0_i32, %c0_i32_0 : i32, i32
  }
  func.func @transform_3(%arg0: i32) -> (i32, i32) {
    %c0_i32 = arith.constant 0 : i32
    %c0_i32_0 = arith.constant 0 : i32
    return %c0_i32, %arg0 : i32, i32
  }
}

module attributes {stable_mosaic.version = 11 : i64} {
  func.func @_fc_head_kernel(%arg0: i32, %arg1: memref<16x3200xbf16, #tpu.memory_space<vmem>>, %arg2: memref<3200x512xbf16, #tpu.memory_space<vmem>>, %arg3: memref<1x512xf32, #tpu.memory_space<vmem>>, %arg4: memref<512x128xbf16, #tpu.memory_space<vmem>>, %arg5: memref<1x128xf32, #tpu.memory_space<vmem>>, %arg6: memref<16x128xf32, #tpu.memory_space<vmem>>) attributes {dimension_semantics = [#tpu.dimension_semantics<parallel>], iteration_bounds = array<i64: 1>, scalar_prefetch = 0 : i64, scratch_operands = 0 : i64, tpu.core_type = #tpu.core_type<tc>, window_params = [{transform_indices = @transform_0, window_bounds = array<i64: 16, 3200>}, {pipeline_mode = #tpu.pipeline_mode<synchronous>, transform_indices = @transform_1, window_bounds = array<i64: 3200, 512>}, {pipeline_mode = #tpu.pipeline_mode<synchronous>, transform_indices = @transform_2, window_bounds = array<i64: 1, 512>}, {pipeline_mode = #tpu.pipeline_mode<synchronous>, transform_indices = @transform_3, window_bounds = array<i64: 512, 128>}, {pipeline_mode = #tpu.pipeline_mode<synchronous>, transform_indices = @transform_4, window_bounds = array<i64: 1, 128>}, {transform_indices = @transform_5, window_bounds = array<i64: 16, 128>}]} {
    %c0 = arith.constant 0 : index
    %c0_0 = arith.constant 0 : index
    %0 = vector.load %arg1[%c0, %c0_0] : memref<16x3200xbf16, #tpu.memory_space<vmem>>, vector<16x3200xbf16>
    %c0_1 = arith.constant 0 : index
    %c0_2 = arith.constant 0 : index
    %1 = vector.load %arg2[%c0_1, %c0_2] : memref<3200x512xbf16, #tpu.memory_space<vmem>>, vector<3200x512xbf16>
    %cst = arith.constant dense<0.000000e+00> : vector<16x512xf32>
    %2 = tpu.matmul %0, %1, %cst {dimension_numbers = #tpu.dot_dimension_numbers<[1], [0], [0], [1], [0, 0, 1, 1], [], []>} : vector<16x3200xbf16>, vector<3200x512xbf16>, vector<16x512xf32> -> vector<16x512xf32>
    %c0_3 = arith.constant 0 : index
    %c0_4 = arith.constant 0 : index
    %3 = vector.load %arg3[%c0_3, %c0_4] : memref<1x512xf32, #tpu.memory_space<vmem>>, vector<1x512xf32>
    %4 = vector.broadcast %3 : vector<1x512xf32> to vector<16x512xf32>
    %5 = arith.addf %2, %4 : vector<16x512xf32>
    %cst_5 = arith.constant 0.000000e+00 : f32
    %6 = vector.broadcast %cst_5 : f32 to vector<16x512xf32>
    %7 = arith.maximumf %5, %6 : vector<16x512xf32>
    %8 = arith.truncf %7 : vector<16x512xf32> to vector<16x512xbf16>
    %c0_6 = arith.constant 0 : index
    %c0_7 = arith.constant 0 : index
    %9 = vector.load %arg4[%c0_6, %c0_7] : memref<512x128xbf16, #tpu.memory_space<vmem>>, vector<512x128xbf16>
    %cst_8 = arith.constant dense<0.000000e+00> : vector<16x128xf32>
    %10 = tpu.matmul %8, %9, %cst_8 {dimension_numbers = #tpu.dot_dimension_numbers<[1], [0], [0], [1], [0, 0, 1, 1], [], []>} : vector<16x512xbf16>, vector<512x128xbf16>, vector<16x128xf32> -> vector<16x128xf32>
    %c0_9 = arith.constant 0 : index
    %c0_10 = arith.constant 0 : index
    %11 = vector.load %arg5[%c0_9, %c0_10] : memref<1x128xf32, #tpu.memory_space<vmem>>, vector<1x128xf32>
    %12 = vector.broadcast %11 : vector<1x128xf32> to vector<16x128xf32>
    %13 = arith.addf %10, %12 : vector<16x128xf32>
    %cst_11 = arith.constant dense<0xFF800000> : vector<16xf32>
    %14 = vector.multi_reduction <maximumf>, %13, %cst_11 [1] : vector<16x128xf32> to vector<16xf32>
    %15 = vector.shape_cast %14 : vector<16xf32> to vector<16x1xf32>
    %16 = vector.broadcast %15 : vector<16x1xf32> to vector<16x128xf32>
    %17 = arith.subf %13, %16 : vector<16x128xf32>
    %18 = math.exp %17 : vector<16x128xf32>
    %cst_12 = arith.constant dense<0.000000e+00> : vector<16xf32>
    %19 = vector.multi_reduction <add>, %18, %cst_12 [1] : vector<16x128xf32> to vector<16xf32>
    %20 = vector.shape_cast %19 : vector<16xf32> to vector<16x1xf32>
    %21 = tpu.reciprocal %20 {approx = true} : vector<16x1xf32> -> vector<16x1xf32>
    %22 = vector.broadcast %21 : vector<16x1xf32> to vector<16x128xf32>
    %23 = arith.mulf %18, %22 : vector<16x128xf32>
    %c0_13 = arith.constant 0 : index
    %c0_14 = arith.constant 0 : index
    %24 = vector.load %arg6[%c0_13, %c0_14] : memref<16x128xf32, #tpu.memory_space<vmem>>, vector<16x128xf32>
    tpu.vector_store %arg6[%c0_13, %c0_14], %23 {strides = array<i32>} : memref<16x128xf32, #tpu.memory_space<vmem>>, vector<16x128xf32>,
    return
  }
  func.func @transform_0(%arg0: i32) -> (i32, i32) {
    %c0_i32 = arith.constant 0 : i32
    %c0_i32_0 = arith.constant 0 : i32
    return %arg0, %c0_i32 : i32, i32
  }
  func.func @transform_1(%arg0: i32) -> (i32, i32) {
    %c0_i32 = arith.constant 0 : i32
    %c0_i32_0 = arith.constant 0 : i32
    %c0_i32_1 = arith.constant 0 : i32
    return %c0_i32, %c0_i32_0 : i32, i32
  }
  func.func @transform_2(%arg0: i32) -> (i32, i32) {
    %c0_i32 = arith.constant 0 : i32
    %c0_i32_0 = arith.constant 0 : i32
    %c0_i32_1 = arith.constant 0 : i32
    return %c0_i32, %c0_i32_0 : i32, i32
  }
  func.func @transform_3(%arg0: i32) -> (i32, i32) {
    %c0_i32 = arith.constant 0 : i32
    %c0_i32_0 = arith.constant 0 : i32
    %c0_i32_1 = arith.constant 0 : i32
    return %c0_i32, %c0_i32_0 : i32, i32
  }
  func.func @transform_4(%arg0: i32) -> (i32, i32) {
    %c0_i32 = arith.constant 0 : i32
    %c0_i32_0 = arith.constant 0 : i32
    %c0_i32_1 = arith.constant 0 : i32
    return %c0_i32, %c0_i32_0 : i32, i32
  }
  func.func @transform_5(%arg0: i32) -> (i32, i32) {
    %c0_i32 = arith.constant 0 : i32
    %c0_i32_0 = arith.constant 0 : i32
    return %arg0, %c0_i32 : i32, i32
  }
}

</mosaic_0001>

<bundles_post_ra>
// kernel: actor_forward.4
= control target key start
LH: loop header
LB: loop body
LE: loop exit
PB: predicated region body
PF: predicated region fallthrough
CT: control target
= control target key end

     0   :  { %s1295_s12 = smov 0   ;;  %s1297_s13 = smov 0   ;;  %s1599_s0 = inlined_call_operand.vmem [shape: bf16[32,256], index: 0, kind: input, shape index: {}]   ;;  %s1600_s1 = inlined_call_operand.vmem [shape: bf16[256,1024], index: 1, kind: input, shape index: {}]   ;;  %s1601_s2 = inlined_call_operand.vmem [shape: f32[32,1], index: 2, kind: input, shape index: {}]   ;;  %s1602_s3 = inlined_call_operand.vmem [shape: bf16[32,1024], index: 3, kind: output, shape index: {}]  }
   0x1   :  { %s1299_s14 = smov 0  }
   0x2 LB: > { %s1020_s15 = sadd.s32 4294967295, %s1272_s14   ;;  %s1312_s16 = sadd.s32 1, %s1272_s14   ;;  %s1272_s14 = sphi %s1299_s14, %s1606_s14   ;;  %s1268_s13 = sphi %s1297_s13, %s1605_s13   ;;  %s1264_s12 = sphi %s1295_s12, %s1604_s12  }
   0x3   : > { %s38_s17 = ssub.s32 %s1272_s14, %s1312_s16  ;;  %s41_s18 = sadd.s32 1, %s1268_s13 }
   0x4   : > { %p39_p0 = scmp.eq.s32.totalorder %s38_s17, 0  ;;  %p48_p1 = scmp.ne.s32.totalorder %s1268_s13, %s1264_s12 }
   0x5   : > { %p49_p2 = scmp.eq.s32.totalorder %s1272_s14, 0  ;;  %p99_p3 = scmp.eq.s32.totalorder %s1020_s15, 1 }
   0x6   : > { %s1323_s19 = scalar_select %p39_p0, %s1268_s13, %s41_s18  }
   0x7   : > { %p50_p4 = por %p49_p2, %p48_p1  ;;  %p1325_p5 = por %p99_p3, %p48_p1 }
   0x8   : > { %p1023_p6 = scmp.ge.s32.totalorder %s1272_s14, 2 }
   0xa   : > { %127 = sbr.rel (%p1023_p6) target bundleno = 53 (0x35), region = 24 }
  0x11   : > { %130 = sbr.rel (!%p50_p4) target bundleno = 53 (0x35), region = 28  ;;  %s132_s21 = sand.u32 (%p50_p4), 1, %s1268_s13  }
  0x12   : > { %s1111_s22 = sshll.u32 (%p50_p4), %s1272_s14, 4  ;;  %s1024_s23 = sshll.u32 (%p50_p4), %s132_s21, 9 }
  0x13   : > { %s1335_s26 = scalar_lea.vmem (%p50_p4), %s1600_s1, %s1111_s22  ;;  %s1340_s27 = scalar_lea.vmem (%p50_p4), [#allocation2], %s1024_s23 }
  0x14   : > { %v150_v0 = vld [vmem:[%s1335_s26] sm:$0xff] (%p50_p4)  ;;  %v152_v1 = vld [vmem:[%s1335_s26 + $0x8] sm:$0xff] (%p50_p4) }
  0x15   : > { %v154_v2 = vld [vmem:[%s1335_s26 + $0x20] sm:$0xff] (%p50_p4)  ;;  %151 = vst [vmem:[%s1340_s27] sm:$0xff] (%p50_p4), %v150_v0  ;;  %153 = vst [vmem:[%s1340_s27 + $0x8] sm:$0xff] (%p50_p4), %v152_v1  ;;  %v156_v3 = vld [vmem:[%s1335_s26 + $0x28] sm:$0xff] (%p50_p4) }
  0x16   : > { %155 = vst [vmem:[%s1340_s27 + $0x10] sm:$0xff] (%p50_p4), %v154_v2  ;;  %v158_v4 = vld [vmem:[%s1335_s26 + $0x40] sm:$0xff] (%p50_p4)  ;;  %v160_v5 = vld [vmem:[%s1335_s26 + $0x48] sm:$0xff] (%p50_p4)  ;;  %157 = vst [vmem:[%s1340_s27 + $0x18] sm:$0xff] (%p50_p4), %v156_v3 }
  0x17   : > { %159 = vst [vmem:[%s1340_s27 + $0x20] sm:$0xff] (%p50_p4), %v158_v4  ;;  %161 = vst [vmem:[%s1340_s27 + $0x28] sm:$0xff] (%p50_p4), %v160_v5  ;;  %v162_v6 = vld [vmem:[%s1335_s26 + $0x60] sm:$0xff] (%p50_p4)  ;;  %v164_v7 = vld [vmem:[%s1335_s26 + $0x68] sm:$0xff] (%p50_p4) }
  0x18   : > { %v166_v8 = vld [vmem:[%s1335_s26 + $0x80] sm:$0xff]  ;;  %163 = vst [vmem:[%s1340_s27 + $0x30] sm:$0xff] %v162_v6  ;;  %165 = vst [vmem:[%s1340_s27 + $0x38] sm:$0xff] %v164_v7  ;;  %v168_v9 = vld [vmem:[%s1335_s26 + $0x88] sm:$0xff] }
  0x19   : > { %167 = vst [vmem:[%s1340_s27 + $0x40] sm:$0xff] %v166_v8  ;;  %v170_v10 = vld [vmem:[%s1335_s26 + $0xa0] sm:$0xff]  ;;  %v172_v11 = vld [vmem:[%s1335_s26 + $0xa8] sm:$0xff]  ;;  %169 = vst [vmem:[%s1340_s27 + $0x48] sm:$0xff] %v168_v9 }
  0x1a   : > { %171 = vst [vmem:[%s1340_s27 + $0x50] sm:$0xff] %v170_v10  ;;  %173 = vst [vmem:[%s1340_s27 + $0x58] sm:$0xff] %v172_v11  ;;  %v174_v12 = vld [vmem:[%s1335_s26 + $0xc0] sm:$0xff]  ;;  %v176_v13 = vld [vmem:[%s1335_s26 + $0xc8] sm:$0xff] }
  0x1b   : > { %v178_v14 = vld [vmem:[%s1335_s26 + $0xe0] sm:$0xff]  ;;  %175 = vst [vmem:[%s1340_s27 + $0x60] sm:$0xff] %v174_v12  ;;  %177 = vst [vmem:[%s1340_s27 + $0x68] sm:$0xff] %v176_v13  ;;  %v180_v15 = vld [vmem:[%s1335_s26 + $0xe8] sm:$0xff] }
  0x1c   : > { %179 = vst [vmem:[%s1340_s27 + $0x70] sm:$0xff] %v178_v14  ;;  %v182_v16 = vld [vmem:[%s1335_s26 + $0x100] sm:$0xff]  ;;  %v184_v17 = vld [vmem:[%s1335_s26 + $0x108] sm:$0xff]  ;;  %181 = vst [vmem:[%s1340_s27 + $0x78] sm:$0xff] %v180_v15 }
  0x1d   : > { %183 = vst [vmem:[%s1340_s27 + $0x80] sm:$0xff] %v182_v16  ;;  %185 = vst [vmem:[%s1340_s27 + $0x88] sm:$0xff] %v184_v17  ;;  %v186_v18 = vld [vmem:[%s1335_s26 + $0x120] sm:$0xff]  ;;  %v188_v19 = vld [vmem:[%s1335_s26 + $0x128] sm:$0xff] }
  0x1e   : > { %v190_v20 = vld [vmem:[%s1335_s26 + $0x140] sm:$0xff]  ;;  %187 = vst [vmem:[%s1340_s27 + $0x90] sm:$0xff] %v186_v18  ;;  %189 = vst [vmem:[%s1340_s27 + $0x98] sm:$0xff] %v188_v19  ;;  %v192_v21 = vld [vmem:[%s1335_s26 + $0x148] sm:$0xff] }
  0x1f   : > { %191 = vst [vmem:[%s1340_s27 + $0xa0] sm:$0xff] %v190_v20  ;;  %v194_v22 = vld [vmem:[%s1335_s26 + $0x160] sm:$0xff]  ;;  %v196_v23 = vld [vmem:[%s1335_s26 + $0x168] sm:$0xff]  ;;  %193 = vst [vmem:[%s1340_s27 + $0xa8] sm:$0xff] %v192_v21 }
  0x20   : > { %195 = vst [vmem:[%s1340_s27 + $0xb0] sm:$0xff] %v194_v22  ;;  %197 = vst [vmem:[%s1340_s27 + $0xb8] sm:$0xff] %v196_v23  ;;  %v198_v24 = vld [vmem:[%s1335_s26 + $0x180] sm:$0xff]  ;;  %v200_v25 = vld [vmem:[%s1335_s26 + $0x188] sm:$0xff] }
  0x21   : > { %v202_v26 = vld [vmem:[%s1335_s26 + $0x1a0] sm:$0xff]  ;;  %199 = vst [vmem:[%s1340_s27 + $0xc0] sm:$0xff] %v198_v24  ;;  %201 = vst [vmem:[%s1340_s27 + $0xc8] sm:$0xff] %v200_v25  ;;  %v204_v27 = vld [vmem:[%s1335_s26 + $0x1a8] sm:$0xff] }
  0x22   : > { %203 = vst [vmem:[%s1340_s27 + $0xd0] sm:$0xff] %v202_v26  ;;  %v206_v28 = vld [vmem:[%s1335_s26 + $0x1c0] sm:$0xff]  ;;  %v208_v29 = vld [vmem:[%s1335_s26 + $0x1c8] sm:$0xff]  ;;  %205 = vst [vmem:[%s1340_s27 + $0xd8] sm:$0xff] %v204_v27 }
  0x23   : > { %207 = vst [vmem:[%s1340_s27 + $0xe0] sm:$0xff] %v206_v28  ;;  %209 = vst [vmem:[%s1340_s27 + $0xe8] sm:$0xff] %v208_v29  ;;  %v210_v30 = vld [vmem:[%s1335_s26 + $0x1e0] sm:$0xff]  ;;  %v212_v31 = vld [vmem:[%s1335_s26 + $0x1e8] sm:$0xff] }
  0x24   : > { %v214_v32 = vld [vmem:[%s1335_s26 + $0x200] sm:$0xff]  ;;  %211 = vst [vmem:[%s1340_s27 + $0xf0] sm:$0xff] %v210_v30  ;;  %213 = vst [vmem:[%s1340_s27 + $0xf8] sm:$0xff] %v212_v31  ;;  %v216_v33 = vld [vmem:[%s1335_s26 + $0x208] sm:$0xff] }
  0x25   : > { %215 = vst [vmem:[%s1340_s27 + $0x100] sm:$0xff] %v214_v32  ;;  %v218_v34 = vld [vmem:[%s1335_s26 + $0x220] sm:$0xff]  ;;  %v220_v35 = vld [vmem:[%s1335_s26 + $0x228] sm:$0xff]  ;;  %217 = vst [vmem:[%s1340_s27 + $0x108] sm:$0xff] %v216_v33 }
  0x26   : > { %219 = vst [vmem:[%s1340_s27 + $0x110] sm:$0xff] %v218_v34  ;;  %221 = vst [vmem:[%s1340_s27 + $0x118] sm:$0xff] %v220_v35  ;;  %v222_v36 = vld [vmem:[%s1335_s26 + $0x240] sm:$0xff]  ;;  %v224_v37 = vld [vmem:[%s1335_s26 + $0x248] sm:$0xff] }
  0x27   : > { %v226_v38 = vld [vmem:[%s1335_s26 + $0x260] sm:$0xff]  ;;  %223 = vst [vmem:[%s1340_s27 + $0x120] sm:$0xff] %v222_v36  ;;  %225 = vst [vmem:[%s1340_s27 + $0x128] sm:$0xff] %v224_v37  ;;  %v228_v39 = vld [vmem:[%s1335_s26 + $0x268] sm:$0xff] }
  0x28   : > { %227 = vst [vmem:[%s1340_s27 + $0x130] sm:$0xff] %v226_v38  ;;  %v230_v40 = vld [vmem:[%s1335_s26 + $0x280] sm:$0xff]  ;;  %v232_v41 = vld [vmem:[%s1335_s26 + $0x288] sm:$0xff]  ;;  %229 = vst [vmem:[%s1340_s27 + $0x138] sm:$0xff] %v228_v39 }
  0x29   : > { %231 = vst [vmem:[%s1340_s27 + $0x140] sm:$0xff] %v230_v40  ;;  %233 = vst [vmem:[%s1340_s27 + $0x148] sm:$0xff] %v232_v41  ;;  %v234_v42 = vld [vmem:[%s1335_s26 + $0x2a0] sm:$0xff]  ;;  %v236_v43 = vld [vmem:[%s1335_s26 + $0x2a8] sm:$0xff] }
  0x2a   : > { %v238_v44 = vld [vmem:[%s1335_s26 + $0x2c0] sm:$0xff]  ;;  %235 = vst [vmem:[%s1340_s27 + $0x150] sm:$0xff] %v234_v42  ;;  %237 = vst [vmem:[%s1340_s27 + $0x158] sm:$0xff] %v236_v43  ;;  %v240_v45 = vld [vmem:[%s1335_s26 + $0x2c8] sm:$0xff] }
  0x2b   : > { %239 = vst [vmem:[%s1340_s27 + $0x160] sm:$0xff] %v238_v44  ;;  %v242_v46 = vld [vmem:[%s1335_s26 + $0x2e0] sm:$0xff]  ;;  %v244_v47 = vld [vmem:[%s1335_s26 + $0x2e8] sm:$0xff]  ;;  %241 = vst [vmem:[%s1340_s27 + $0x168] sm:$0xff] %v240_v45 }
  0x2c   : > { %243 = vst [vmem:[%s1340_s27 + $0x170] sm:$0xff] %v242_v46  ;;  %245 = vst [vmem:[%s1340_s27 + $0x178] sm:$0xff] %v244_v47  ;;  %v246_v48 = vld [vmem:[%s1335_s26 + $0x300] sm:$0xff]  ;;  %v248_v49 = vld [vmem:[%s1335_s26 + $0x308] sm:$0xff] }
  0x2d   : > { %v250_v50 = vld [vmem:[%s1335_s26 + $0x320] sm:$0xff]  ;;  %247 = vst [vmem:[%s1340_s27 + $0x180] sm:$0xff] %v246_v48  ;;  %249 = vst [vmem:[%s1340_s27 + $0x188] sm:$0xff] %v248_v49  ;;  %v252_v51 = vld [vmem:[%s1335_s26 + $0x328] sm:$0xff] }
  0x2e   : > { %251 = vst [vmem:[%s1340_s27 + $0x190] sm:$0xff] %v250_v50  ;;  %v254_v52 = vld [vmem:[%s1335_s26 + $0x340] sm:$0xff]  ;;  %v256_v53 = vld [vmem:[%s1335_s26 + $0x348] sm:$0xff]  ;;  %253 = vst [vmem:[%s1340_s27 + $0x198] sm:$0xff] %v252_v51 }
  0x2f   : > { %255 = vst [vmem:[%s1340_s27 + $0x1a0] sm:$0xff] %v254_v52  ;;  %257 = vst [vmem:[%s1340_s27 + $0x1a8] sm:$0xff] %v256_v53  ;;  %v258_v54 = vld [vmem:[%s1335_s26 + $0x360] sm:$0xff]  ;;  %v260_v55 = vld [vmem:[%s1335_s26 + $0x368] sm:$0xff] }
  0x30   : > { %v262_v56 = vld [vmem:[%s1335_s26 + $0x380] sm:$0xff]  ;;  %259 = vst [vmem:[%s1340_s27 + $0x1b0] sm:$0xff] %v258_v54  ;;  %261 = vst [vmem:[%s1340_s27 + $0x1b8] sm:$0xff] %v260_v55  ;;  %v264_v57 = vld [vmem:[%s1335_s26 + $0x388] sm:$0xff] }
  0x31   : > { %263 = vst [vmem:[%s1340_s27 + $0x1c0] sm:$0xff] %v262_v56  ;;  %v266_v58 = vld [vmem:[%s1335_s26 + $0x3a0] sm:$0xff]  ;;  %v268_v59 = vld [vmem:[%s1335_s26 + $0x3a8] sm:$0xff]  ;;  %265 = vst [vmem:[%s1340_s27 + $0x1c8] sm:$0xff] %v264_v57 }
  0x32   : > { %267 = vst [vmem:[%s1340_s27 + $0x1d0] sm:$0xff] %v266_v58  ;;  %269 = vst [vmem:[%s1340_s27 + $0x1d8] sm:$0xff] %v268_v59  ;;  %v270_v60 = vld [vmem:[%s1335_s26 + $0x3c0] sm:$0xff]  ;;  %v272_v61 = vld [vmem:[%s1335_s26 + $0x3c8] sm:$0xff] }
  0x33   : > { %v274_v62 = vld [vmem:[%s1335_s26 + $0x3e0] sm:$0xff]  ;;  %271 = vst [vmem:[%s1340_s27 + $0x1e0] sm:$0xff] %v270_v60  ;;  %273 = vst [vmem:[%s1340_s27 + $0x1e8] sm:$0xff] %v272_v61  ;;  %v276_v63 = vld [vmem:[%s1335_s26 + $0x3e8] sm:$0xff] }
  0x34   : > { %275 = vst [vmem:[%s1340_s27 + $0x1f0] sm:$0xff] %v274_v62  ;;  %277 = vst [vmem:[%s1340_s27 + $0x1f8] sm:$0xff] %v276_v63 }
  0x35 PF: > { %p1027_p7 = scmp.ge.s32.totalorder %s1272_s14, 1  ;;  %p282_p8 = scmp.lt.s32.totalorder %s1272_s14, 3 }
  0x37   : > { %p283_p9 = pnand %p1027_p7, %p282_p8 }
  0x38   : > { %s289_s28 = sand.u32 (!%p283_p9), 1, %s1264_s12   ;;  %v1246_v0 = vld [vmem:[%s1599_s0 + $0x4] ss:$8 sps:$4 sm:$0xff] (!%p283_p9)   ;;  %v1274_v1 = vmov (!%p283_p9), 0   ;;  %v383_v50 = vld [vmem:[%s1601_s2 + $0x10] sm:$0xff] (!%p283_p9)  ;;  %v384_v55 = vld [vmem:[%s1601_s2 + $0x18] sm:$0xff] (!%p283_p9) }
  0x39   : > { %286 = sbr.rel (%p283_p9) target bundleno = 362 (0x16a), region = 51  ;;  %s1028_s29 = sshll.u32 (!%p283_p9), %s289_s28, 9  ;;  %1146 = vset.pattern.permute.xlu0 (!%p283_p9), %v1274_v1  ;;  %1147 = vset.pattern.permute.xlu1 (!%p283_p9), %v1274_v1  ;;  %v381_v2 = vld [vmem:[%s1601_s2] sm:$0xff] (!%p283_p9)  ;;  %v382_v49 = vld [vmem:[%s1601_s2 + $0x8] sm:$0xff] (!%p283_p9) }
  0x3a   : > { %s1478_s7 = scalar_lea.vmem (!%p283_p9), [#allocation2], %s1028_s29  ;;  %777 = vmatprep.mubr.bf16.mxu0 (!%p283_p9), %v1246_v0  ;;  %830 = vmatprep.mubr.bf16.mxu1 (!%p283_p9), %v1246_v0  ;;  %s1029_s27 = sshll.u32 (!%p283_p9), %s289_s28, 6 }
  0x3b   : > { %v1148_v3 = vld [vmem:[%s1478_s7 + $0x4] ss:$16 sps:$4 sm:$0xff] (!%p283_p9)   ;;  %v1150_v4 = vld [vmem:[%s1478_s7 + $0xc] ss:$16 sps:$4 sm:$0xff] (!%p283_p9)   ;;  %387 = vperm.xlu0 (!%p283_p9), %1146, %v381_v2   ;;  %v1152_v5 = vld [vmem:[%s1478_s7] ss:$16 sps:$4 sm:$0xff] (!%p283_p9)   ;;  %397 = vperm.xlu1 (!%p283_p9), %1147, %v383_v50  }
  0x3c   : > { %745 = vmatprep.subr.bf16.mxu0 (!%p283_p9), %v1148_v3  ;;  %v1153_v6 = vld [vmem:[%s1478_s7 + $0x8] ss:$16 sps:$4 sm:$0xff] (!%p283_p9)   ;;  %798 = vmatprep.subr.bf16.mxu1 (!%p283_p9), %v1150_v4  ;;  %v1154_v7 = vld [vmem:[%s1478_s7 + $0x24] ss:$16 sps:$4 sm:$0xff] (!%p283_p9)   ;;  %v1156_v8 = vld [vmem:[%s1478_s7 + $0x2c] ss:$16 sps:$4 sm:$0xff] (!%p283_p9)  }
  0x3d   : > { %746 = vmatpush1.bf16.msra.mxu0 (!%p283_p9), %v1152_v5  ;;  %799 = vmatpush1.bf16.msra.mxu1 (!%p283_p9), %v1153_v6  ;;  %v1158_v9 = vld [vmem:[%s1478_s7 + $0x20] ss:$16 sps:$4 sm:$0xff] (!%p283_p9)   ;;  %v1159_v10 = vld [vmem:[%s1478_s7 + $0x28] ss:$16 sps:$4 sm:$0xff] (!%p283_p9)   ;;  %v1160_v11 = vld [vmem:[%s1478_s7 + $0x44] ss:$16 sps:$4 sm:$0xff] (!%p283_p9)  }
  0x3e   : > { %747 = vmatprep.subr.bf16.mxu0 (!%p283_p9), %v1154_v7  ;;  %800 = vmatprep.subr.bf16.mxu1 (!%p283_p9), %v1156_v8  ;;  %v1162_v12 = vld [vmem:[%s1478_s7 + $0x4c] ss:$16 sps:$4 sm:$0xff] (!%p283_p9)   ;;  %v1164_v13 = vld [vmem:[%s1478_s7 + $0x40] ss:$16 sps:$4 sm:$0xff] (!%p283_p9)   ;;  %v1165_v14 = vld [vmem:[%s1478_s7 + $0x48] ss:$16 sps:$4 sm:$0xff] (!%p283_p9)  }
  0x3f   : > { %v1166_v15 = vld [vmem:[%s1478_s7 + $0x64] ss:$16 sps:$4 sm:$0xff] (!%p283_p9)   ;;  %v1168_v16 = vld [vmem:[%s1478_s7 + $0x6c] ss:$16 sps:$4 sm:$0xff] (!%p283_p9)   ;;  %v1170_v17 = vld [vmem:[%s1478_s7 + $0x60] ss:$16 sps:$4 sm:$0xff] (!%p283_p9)   ;;  %392 = vperm.xlu0 (!%p283_p9), %1146, %v382_v49   ;;  %402 = vperm.xlu1 (!%p283_p9), %1147, %v384_v55  }
  0x40   : > { %v1171_v18 = vld [vmem:[%s1478_s7 + $0x68] ss:$16 sps:$4 sm:$0xff]   ;;  %v1172_v19 = vld [vmem:[%s1478_s7 + $0x84] ss:$16 sps:$4 sm:$0xff]   ;;  %v1174_v20 = vld [vmem:[%s1478_s7 + $0x8c] ss:$16 sps:$4 sm:$0xff]  }
  0x41   : > { %748 = vmatpush1.bf16.msra.mxu0 %v1158_v9  ;;  %801 = vmatpush1.bf16.msra.mxu1 %v1159_v10  ;;  %v1176_v21 = vld [vmem:[%s1478_s7 + $0x80] ss:$16 sps:$4 sm:$0xff]   ;;  %v1177_v22 = vld [vmem:[%s1478_s7 + $0x88] ss:$16 sps:$4 sm:$0xff]   ;;  %v1178_v23 = vld [vmem:[%s1478_s7 + $0xa4] ss:$16 sps:$4 sm:$0xff]  }
  0x42   : > { %749 = vmatprep.subr.bf16.mxu0 %v1160_v11  ;;  %802 = vmatprep.subr.bf16.mxu1 %v1162_v12  ;;  %v1180_v24 = vld [vmem:[%s1478_s7 + $0xac] ss:$16 sps:$4 sm:$0xff]   ;;  %v1182_v25 = vld [vmem:[%s1478_s7 + $0xa0] ss:$16 sps:$4 sm:$0xff]   ;;  %v1183_v26 = vld [vmem:[%s1478_s7 + $0xa8] ss:$16 sps:$4 sm:$0xff]  }
  0x43   : > { %v1184_v27 = vld [vmem:[%s1478_s7 + $0xc4] ss:$16 sps:$4 sm:$0xff]   ;;  %v1186_v28 = vld [vmem:[%s1478_s7 + $0xcc] ss:$16 sps:$4 sm:$0xff]   ;;  %v1188_v29 = vld [vmem:[%s1478_s7 + $0xc0] ss:$16 sps:$4 sm:$0xff]  }
  0x44   : > { %v1189_v30 = vld [vmem:[%s1478_s7 + $0xc8] ss:$16 sps:$4 sm:$0xff]   ;;  %v1190_v31 = vld [vmem:[%s1478_s7 + $0xe4] ss:$16 sps:$4 sm:$0xff]   ;;  %v1192_v32 = vld [vmem:[%s1478_s7 + $0xec] ss:$16 sps:$4 sm:$0xff]  }
  0x45   : > { %750 = vmatpush1.bf16.msra.mxu0 %v1164_v13  ;;  %803 = vmatpush1.bf16.msra.mxu1 %v1165_v14  ;;  %v1194_v33 = vld [vmem:[%s1478_s7 + $0xe0] ss:$16 sps:$4 sm:$0xff]   ;;  %v1195_v34 = vld [vmem:[%s1478_s7 + $0xe8] ss:$16 sps:$4 sm:$0xff]   ;;  %v1196_v35 = vld [vmem:[%s1478_s7 + $0x104] ss:$16 sps:$4 sm:$0xff]  }
  0x46   : > { %751 = vmatprep.subr.bf16.mxu0 %v1166_v15  ;;  %804 = vmatprep.subr.bf16.mxu1 %v1168_v16  ;;  %v1198_v36 = vld [vmem:[%s1478_s7 + $0x10c] ss:$16 sps:$4 sm:$0xff]   ;;  %v1200_v37 = vld [vmem:[%s1478_s7 + $0x100] ss:$16 sps:$4 sm:$0xff]   ;;  %v1201_v38 = vld [vmem:[%s1478_s7 + $0x108] ss:$16 sps:$4 sm:$0xff]  }
  0x47   : > { %v1202_v39 = vld [vmem:[%s1478_s7 + $0x124] ss:$16 sps:$4 sm:$0xff]   ;;  %v1204_v40 = vld [vmem:[%s1478_s7 + $0x12c] ss:$16 sps:$4 sm:$0xff]   ;;  %v1206_v41 = vld [vmem:[%s1478_s7 + $0x120] ss:$16 sps:$4 sm:$0xff]  }
  0x48   : > { %v1207_v42 = vld [vmem:[%s1478_s7 + $0x128] ss:$16 sps:$4 sm:$0xff]   ;;  %v1208_v43 = vld [vmem:[%s1478_s7 + $0x144] ss:$16 sps:$4 sm:$0xff]   ;;  %v1210_v44 = vld [vmem:[%s1478_s7 + $0x14c] ss:$16 sps:$4 sm:$0xff]  }
  0x49   : > { %752 = vmatpush1.bf16.msra.mxu0 %v1170_v17  ;;  %805 = vmatpush1.bf16.msra.mxu1 %v1171_v18  ;;  %v1212_v45 = vld [vmem:[%s1478_s7 + $0x140] ss:$16 sps:$4 sm:$0xff]   ;;  %v1213_v46 = vld [vmem:[%s1478_s7 + $0x148] ss:$16 sps:$4 sm:$0xff]   ;;  %v1214_v47 = vld [vmem:[%s1478_s7 + $0x164] ss:$16 sps:$4 sm:$0xff]  }
  0x4a   : > { %753 = vmatprep.subr.bf16.mxu0 %v1172_v19  ;;  %806 = vmatprep.subr.bf16.mxu1 %v1174_v20  ;;  %v1216_v48 = vld [vmem:[%s1478_s7 + $0x16c] ss:$16 sps:$4 sm:$0xff]   ;;  %v1218_v51 = vld [vmem:[%s1478_s7 + $0x160] ss:$16 sps:$4 sm:$0xff]   ;;  %v1219_v52 = vld [vmem:[%s1478_s7 + $0x168] ss:$16 sps:$4 sm:$0xff]  }
  0x4b   : > { %v1220_v53 = vld [vmem:[%s1478_s7 + $0x184] ss:$16 sps:$4 sm:$0xff]   ;;  %v1222_v54 = vld [vmem:[%s1478_s7 + $0x18c] ss:$16 sps:$4 sm:$0xff]   ;;  %v1224_v56 = vld [vmem:[%s1478_s7 + $0x180] ss:$16 sps:$4 sm:$0xff]  }
  0x4c   : > { %v1225_v57 = vld [vmem:[%s1478_s7 + $0x188] ss:$16 sps:$4 sm:$0xff]   ;;  %v1226_v58 = vld [vmem:[%s1478_s7 + $0x1a4] ss:$16 sps:$4 sm:$0xff]   ;;  %v1228_v59 = vld [vmem:[%s1478_s7 + $0x1ac] ss:$16 sps:$4 sm:$0xff]  }
  0x4d   : > { %754 = vmatpush1.bf16.msra.mxu0 %v1176_v21  ;;  %807 = vmatpush1.bf16.msra.mxu1 %v1177_v22  ;;  %v1230_v60 = vld [vmem:[%s1478_s7 + $0x1a0] ss:$16 sps:$4 sm:$0xff]   ;;  %v1231_v61 = vld [vmem:[%s1478_s7 + $0x1a8] ss:$16 sps:$4 sm:$0xff]   ;;  %v1232_v62 = vld [vmem:[%s1478_s7 + $0x1c4] ss:$16 sps:$4 sm:$0xff]  }
  0x4e   : > { %755 = vmatprep.subr.bf16.mxu0 %v1178_v23  ;;  %808 = vmatprep.subr.bf16.mxu1 %v1180_v24  ;;  %v1234_v63 = vld [vmem:[%s1478_s7 + $0x1cc] ss:$16 sps:$4 sm:$0xff]   ;;  %v1236_v0 = vld [vmem:[%s1478_s7 + $0x1c0] ss:$16 sps:$4 sm:$0xff]   ;;  %v1237_v1 = vld [vmem:[%s1478_s7 + $0x1c8] ss:$16 sps:$4 sm:$0xff]  }
  0x4f   : > { %v1238_v2 = vld [vmem:[%s1478_s7 + $0x1e4] ss:$16 sps:$4 sm:$0xff]   ;;  %v1240_v3 = vld [vmem:[%s1478_s7 + $0x1ec] ss:$16 sps:$4 sm:$0xff]   ;;  %v1242_v4 = vld [vmem:[%s1478_s7 + $0x1e0] ss:$16 sps:$4 sm:$0xff]  }
  0x50   : > { %v1243_v5 = vld [vmem:[%s1478_s7 + $0x1e8] ss:$16 sps:$4 sm:$0xff]   ;;  %v1247_v7 = vld [vmem:[%s1599_s0 + $0x14] ss:$8 sps:$4 sm:$0xff]   ;;  %s1564_s12 = scalar_lea.vmem [#allocation3], %s1029_s27  ;;  %s1120_s28 = sshll.u32 (%p1325_p5), %s1020_s15, 4 }
  0x51   : > { %756 = vmatpush1.bf16.msra.mxu0 %v1182_v25  ;;  %809 = vmatpush1.bf16.msra.mxu1 %v1183_v26  ;;  %v1244_v6 = vld [vmem:[%s1599_s0] ss:$8 sps:$4 sm:$0xff]   ;;  %v1249_v8 = vld [vmem:[%s1599_s0 + $0x10] ss:$8 sps:$4 sm:$0xff]   ;;  %s932_s4 = scalar_lea.vmem (%p1325_p5), %s1602_s3, %s1120_s28 }
  0x52   : > { %757 = vmatprep.subr.bf16.mxu0 %v1184_v27  ;;  %810 = vmatprep.subr.bf16.mxu1 %v1186_v28 }
  0x55   : > { %758 = vmatpush1.bf16.msra.mxu0 %v1188_v29  ;;  %811 = vmatpush1.bf16.msra.mxu1 %v1189_v30 }
  0x56   : > { %759 = vmatprep.subr.bf16.mxu0 %v1190_v31  ;;  %812 = vmatprep.subr.bf16.mxu1 %v1192_v32 }
  0x59   : > { %760 = vmatpush1.bf16.msra.mxu0 %v1194_v33  ;;  %813 = vmatpush1.bf16.msra.mxu1 %v1195_v34 }
  0x5a   : > { %761 = vmatprep.subr.bf16.mxu0 %v1196_v35  ;;  %814 = vmatprep.subr.bf16.mxu1 %v1198_v36 }
  0x5d   : > { %762 = vmatpush1.bf16.msra.mxu0 %v1200_v37  ;;  %815 = vmatpush1.bf16.msra.mxu1 %v1201_v38 }
  0x5e   : > { %763 = vmatprep.subr.bf16.mxu0 %v1202_v39  ;;  %816 = vmatprep.subr.bf16.mxu1 %v1204_v40 }
  0x61   : > { %764 = vmatpush1.bf16.msra.mxu0 %v1206_v41  ;;  %817 = vmatpush1.bf16.msra.mxu1 %v1207_v42 }
  0x62   : > { %765 = vmatprep.subr.bf16.mxu0 %v1208_v43  ;;  %818 = vmatprep.subr.bf16.mxu1 %v1210_v44 }
  0x65   : > { %766 = vmatpush1.bf16.msra.mxu0 %v1212_v45  ;;  %819 = vmatpush1.bf16.msra.mxu1 %v1213_v46 }
  0x66   : > { %767 = vmatprep.subr.bf16.mxu0 %v1214_v47  ;;  %820 = vmatprep.subr.bf16.mxu1 %v1216_v48 }
  0x69   : > { %768 = vmatpush1.bf16.msra.mxu0 %v1218_v51  ;;  %821 = vmatpush1.bf16.msra.mxu1 %v1219_v52 }
  0x6a   : > { %769 = vmatprep.subr.bf16.mxu0 %v1220_v53  ;;  %822 = vmatprep.subr.bf16.mxu1 %v1222_v54 }
  0x6d   : > { %770 = vmatpush1.bf16.msra.mxu0 %v1224_v56  ;;  %823 = vmatpush1.bf16.msra.mxu1 %v1225_v57 }
  0x6e   : > { %771 = vmatprep.subr.bf16.mxu0 %v1226_v58  ;;  %824 = vmatprep.subr.bf16.mxu1 %v1228_v59 }
  0x71   : > { %772 = vmatpush1.bf16.msra.mxu0 %v1230_v60  ;;  %825 = vmatpush1.bf16.msra.mxu1 %v1231_v61 }
  0x72   : > { %773 = vmatprep.subr.bf16.mxu0 %v1232_v62  ;;  %826 = vmatprep.subr.bf16.mxu1 %v1234_v63 }
  0x75   : > { %774 = vmatpush1.bf16.msra.mxu0 %v1236_v0  ;;  %827 = vmatpush1.bf16.msra.mxu1 %v1237_v1 }
  0x76   : > { %775 = vmatprep.subr.bf16.mxu0 %v1238_v2  ;;  %828 = vmatprep.subr.bf16.mxu1 %v1240_v3 }
  0x79   : > { %776 = vmatpush1.bf16.msra.mxu0 %v1242_v4  ;;  %829 = vmatpush1.bf16.msra.mxu1 %v1243_v5 }
  0x7c   : > { %778 = vmatmul.mubr.bf16.vlgmr.msra.gmra.mrb[0].mxu0 %v1244_v6  ;;  %831 = vmatmul.mubr.bf16.vlgmr.msra.gmra.mrb[0].mxu1 %v1244_v6 }
  0x7d   : > { %787 = vmatprep.mubr.bf16.mxu0 %v1247_v7  ;;  %840 = vmatprep.mubr.bf16.mxu1 %v1247_v7 }
  0x84   : > { %788 = vmatmul.mubr.bf16.gmra.mrb[4].mxu0 %v1249_v8  ;;  %841 = vmatmul.mubr.bf16.gmra.mrb[4].mxu1 %v1249_v8 }
  0xba   : > { %v388_v9 = vpop.permute.xlu0 %387  ;;  %v398_v11 = vpop.permute.xlu1 %397 }
  0xbe   : > { %v393_v10 = vpop.permute.xlu0 %392  ;;  %v403_v38 = vpop.permute.xlu1 %402 }
 0x14f   : > { %v779_v12 = vpop.f32.mrb[0].mxu0  ;;  %v832_v13 = vpop.f32.mrb[0].mxu1 }
 0x150   : > { %v780_v14 = vadd.f32 %v779_v12, %v388_v9  ;;  %v833_v15 = vadd.f32 %v832_v13, %v388_v9  ;;  %v781_v16 = vpop.f32.mrb[1].mxu0  ;;  %v834_v17 = vpop.f32.mrb[1].mxu1 }
 0x151   : > { %v782_v18 = vadd.f32 %v781_v16, %v388_v9  ;;  %v835_v19 = vadd.f32 %v834_v17, %v388_v9  ;;  %v783_v20 = vpop.f32.mrb[2].mxu0  ;;  %v836_v21 = vpop.f32.mrb[2].mxu1 }
 0x152   : > { %v851_v22 = vmax.f32 %v780_v14, 0.0  ;;  %v853_v23 = vmax.f32 %v833_v15, 0.0  ;;  %v784_v24 = vadd.f32 %v783_v20, %v393_v10  ;;  %v837_v25 = vadd.f32 %v836_v21, %v393_v10  ;;  %v785_v26 = vpop.f32.mrb[3].mxu0  ;;  %v838_v27 = vpop.f32.mrb[3].mxu1 }
 0x153   : > { %v852_v28 = vmax.f32 %v782_v18, 0.0  ;;  %v854_v29 = vmax.f32 %v835_v19, 0.0  ;;  %v786_v30 = vadd.f32 %v785_v26, %v393_v10  ;;  %v839_v31 = vadd.f32 %v838_v27, %v393_v10 }
 0x154   : > { %v855_v32 = vmax.f32 %v784_v24, 0.0  ;;  %v857_v33 = vmax.f32 %v837_v25, 0.0 }
 0x155   : > { %v1112_v34 = vpack.c.bf16 %v852_v28, %v851_v22  ;;  %v1113_v35 = vpack.c.bf16 %v854_v29, %v853_v23  ;;  %v856_v36 = vmax.f32 %v786_v30, 0.0  ;;  %v858_v37 = vmax.f32 %v839_v31, 0.0 }
 0x157   : > { %915 = vst [vmem:[%s1564_s12] sm:$0xff] %v1112_v34  ;;  %916 = vst [vmem:[%s1564_s12 + $0x8] sm:$0xff] %v1113_v35  ;;  %v1114_v39 = vpack.c.bf16 %v856_v36, %v855_v32  ;;  %v1115_v40 = vpack.c.bf16 %v858_v37, %v857_v33  ;;  %v789_v41 = vpop.f32.mrb[4].mxu0  ;;  %v842_v42 = vpop.f32.mrb[4].mxu1 }
 0x158   : > { %v790_v43 = vadd.f32 %v789_v41, %v398_v11  ;;  %v843_v44 = vadd.f32 %v842_v42, %v398_v11  ;;  %v791_v45 = vpop.f32.mrb[5].mxu0  ;;  %v844_v46 = vpop.f32.mrb[5].mxu1 }
 0x159   : > { %917 = vst [vmem:[%s1564_s12 + $0x10] sm:$0xff] %v1114_v39  ;;  %918 = vst [vmem:[%s1564_s12 + $0x18] sm:$0xff] %v1115_v40  ;;  %v792_v47 = vadd.f32 %v791_v45, %v398_v11  ;;  %v845_v48 = vadd.f32 %v844_v46, %v398_v11  ;;  %v793_v49 = vpop.f32.mrb[6].mxu0  ;;  %v846_v50 = vpop.f32.mrb[6].mxu1 }
 0x15a   : > { %v859_v51 = vmax.f32 %v790_v43, 0.0  ;;  %v861_v52 = vmax.f32 %v843_v44, 0.0  ;;  %v794_v53 = vadd.f32 %v793_v49, %v403_v38  ;;  %v847_v54 = vadd.f32 %v846_v50, %v403_v38  ;;  %v795_v55 = vpop.f32.mrb[7].mxu0  ;;  %v848_v56 = vpop.f32.mrb[7].mxu1 }
 0x15b   : > { %v860_v57 = vmax.f32 %v792_v47, 0.0  ;;  %v862_v58 = vmax.f32 %v845_v48, 0.0  ;;  %v796_v59 = vadd.f32 %v795_v55, %v403_v38  ;;  %v849_v60 = vadd.f32 %v848_v56, %v403_v38  ;;  %929 = sbr.rel (!%p1325_p5) target bundleno = 362 (0x16a), region = 59 }
 0x15c   : > { %v863_v61 = vmax.f32 %v794_v53, 0.0  ;;  %v865_v62 = vmax.f32 %v847_v54, 0.0 }
 0x15d   : > { %v1116_v63 = vpack.c.bf16 %v860_v57, %v859_v51  ;;  %v1117_v0 = vpack.c.bf16 %v862_v58, %v861_v52  ;;  %v864_v1 = vmax.f32 %v796_v59, 0.0  ;;  %v866_v2 = vmax.f32 %v849_v60, 0.0 }
 0x15e   : > { %v945_v5 = vld [vmem:[%s1564_s12] sm:$0xff] (%p1325_p5)  ;;  %v947_v6 = vld [vmem:[%s1564_s12 + $0x8] sm:$0xff] (%p1325_p5) }
 0x15f   : > { %919 = vst [vmem:[%s1564_s12 + $0x20] sm:$0xff] %v1116_v63  ;;  %920 = vst [vmem:[%s1564_s12 + $0x28] sm:$0xff] %v1117_v0  ;;  %v1118_v3 = vpack.c.bf16 %v864_v1, %v863_v61  ;;  %v1119_v4 = vpack.c.bf16 %v866_v2, %v865_v62 }
 0x160   : > { %v949_v7 = vld [vmem:[%s1564_s12 + $0x10] sm:$0xff] (%p1325_p5)  ;;  %v951_v8 = vld [vmem:[%s1564_s12 + $0x18] sm:$0xff] (%p1325_p5)  ;;  %946 = vst [vmem:[%s932_s4] sm:$0xff] (%p1325_p5), %v945_v5  ;;  %948 = vst [vmem:[%s932_s4 + $0x8] sm:$0xff] (%p1325_p5), %v947_v6 }
 0x161   : > { %921 = vst [vmem:[%s1564_s12 + $0x30] sm:$0xff] %v1118_v3  ;;  %922 = vst [vmem:[%s1564_s12 + $0x38] sm:$0xff] %v1119_v4 }
 0x162   : > { %950 = vst [vmem:[%s932_s4 + $0x20] sm:$0xff] %v949_v7  ;;  %952 = vst [vmem:[%s932_s4 + $0x28] sm:$0xff] %v951_v8 }
 0x166   : > { %v953_v9 = vld [vmem:[%s1564_s12 + $0x20] sm:$0xff]  ;;  %v955_v10 = vld [vmem:[%s1564_s12 + $0x28] sm:$0xff] }
 0x167   : > { %954 = vst [vmem:[%s932_s4 + $0x40] sm:$0xff] %v953_v9  ;;  %956 = vst [vmem:[%s932_s4 + $0x48] sm:$0xff] %v955_v10 }
 0x168   : > { %v957_v11 = vld [vmem:[%s1564_s12 + $0x30] sm:$0xff]  ;;  %v959_v12 = vld [vmem:[%s1564_s12 + $0x38] sm:$0xff] }
 0x169   : > { %958 = vst [vmem:[%s932_s4 + $0x60] sm:$0xff] %v957_v11  ;;  %960 = vst [vmem:[%s932_s4 + $0x68] sm:$0xff] %v959_v12 }
 0x16a PF: > { %p10_p10 = scmp.ge.s32.totalorder %s1312_s16, 4   ;;  %s1604_s12 = smov %s1268_s13 }
 0x16b   : > { %s1605_s13 = smov %s1323_s19  ;;  %s1606_s14 = smov %s1312_s16 }
 0x16c   :  { %12 = sbr.rel (!%p10_p10) target bundleno = 2 (0x2), region = 113 }

// kernel: actor_forward.5
= control target key start
LH: loop header
LB: loop body
LE: loop exit
PB: predicated region body
PF: predicated region fallthrough
CT: control target
= control target key end

     0   :  { %s1477_s12 = smov 0   ;;  %s1479_s13 = smov 0   ;;  %s1793_s0 = inlined_call_operand.vmem [shape: bf16[64,512], index: 0, kind: input, shape index: {}]   ;;  %s1794_s1 = inlined_call_operand.vmem [shape: bf16[512,256], index: 1, kind: input, shape index: {}]   ;;  %s1795_s2 = inlined_call_operand.vmem [shape: f32[64,1], index: 2, kind: input, shape index: {}]   ;;  %s1796_s3 = inlined_call_operand.vmem [shape: bf16[64,256], index: 3, kind: output, shape index: {}]  }
   0x1   :  { %s1481_s14 = smov 0  }
   0x2 LB: > { %s1169_s15 = sadd.s32 4294967295, %s1454_s14   ;;  %s1494_s16 = sadd.s32 1, %s1454_s14   ;;  %s1454_s14 = sphi %s1481_s14, %s1800_s14   ;;  %s1450_s13 = sphi %s1479_s13, %s1799_s13   ;;  %s1446_s12 = sphi %s1477_s12, %s1798_s12  }
   0x3   : > { %s38_s17 = ssub.s32 %s1454_s14, %s1494_s16  ;;  %s41_s18 = sadd.s32 1, %s1450_s13 }
   0x4   : > { %p39_p0 = scmp.eq.s32.totalorder %s38_s17, 0  ;;  %p48_p1 = scmp.ne.s32.totalorder %s1450_s13, %s1446_s12 }
   0x5   : > { %p49_p2 = scmp.eq.s32.totalorder %s1454_s14, 0  ;;  %p99_p3 = scmp.eq.s32.totalorder %s1169_s15, 1 }
   0x6   : > { %s1505_s19 = scalar_select %p39_p0, %s1450_s13, %s41_s18  }
   0x7   : > { %p50_p4 = por %p49_p2, %p48_p1  ;;  %p1507_p5 = por %p99_p3, %p48_p1 }
   0x8   : > { %p1172_p6 = scmp.ge.s32.totalorder %s1454_s14, 2 }
   0xa   : > { %127 = sbr.rel (%p1172_p6) target bundleno = 63 (0x3f), region = 24 }
  0x11   : > { %130 = sbr.rel (!%p50_p4) target bundleno = 63 (0x3f), region = 28  ;;  %s132_s21 = sand.u32 (%p50_p4), 1, %s1450_s13  }
  0x12   : > { %s1174_s22 = sshll.u32 (%p50_p4), %s1454_s14, 2  ;;  %s1173_s23 = sshll.u32 (%p50_p4), %s132_s21, 8 }
  0x13   : > { %s1517_s26 = scalar_lea.vmem (%p50_p4), %s1794_s1, %s1174_s22  ;;  %s1521_s27 = scalar_lea.vmem (%p50_p4), [#allocation2], %s1173_s23 }
  0x14   : > { %v152_v0 = vld [vmem:[%s1517_s26] sm:$0xf] (%p50_p4)  ;;  %v154_v1 = vld [vmem:[%s1517_s26 + $0x8] sm:$0xf] (%p50_p4)  ;;  %v156_v2 = vld [vmem:[%s1517_s26 + $0x10] sm:$0xf] (%p50_p4) }
  0x15   : > { %153 = vst [vmem:[%s1521_s27] sm:$0xf] (%p50_p4), %v152_v0  ;;  %155 = vst [vmem:[%s1521_s27 + $0x4] sm:$0xf] (%p50_p4), %v154_v1  ;;  %v158_v3 = vld [vmem:[%s1517_s26 + $0x18] sm:$0xf] (%p50_p4) }
  0x16   : > { %v160_v4 = vld [vmem:[%s1517_s26 + $0x20] sm:$0xf] (%p50_p4)  ;;  %157 = vst [vmem:[%s1521_s27 + $0x8] sm:$0xf] (%p50_p4), %v156_v2  ;;  %159 = vst [vmem:[%s1521_s27 + $0xc] sm:$0xf] (%p50_p4), %v158_v3 }
  0x17   : > { %161 = vst [vmem:[%s1521_s27 + $0x10] sm:$0xf] (%p50_p4), %v160_v4  ;;  %v162_v5 = vld [vmem:[%s1517_s26 + $0x28] sm:$0xf] (%p50_p4)  ;;  %v164_v6 = vld [vmem:[%s1517_s26 + $0x30] sm:$0xf] (%p50_p4) }
  0x18   : > { %v166_v7 = vld [vmem:[%s1517_s26 + $0x38] sm:$0xf]  ;;  %163 = vst [vmem:[%s1521_s27 + $0x14] sm:$0xf] %v162_v5  ;;  %165 = vst [vmem:[%s1521_s27 + $0x18] sm:$0xf] %v164_v6 }
  0x19   : > { %167 = vst [vmem:[%s1521_s27 + $0x1c] sm:$0xf] %v166_v7  ;;  %v168_v8 = vld [vmem:[%s1517_s26 + $0x40] sm:$0xf]  ;;  %v170_v9 = vld [vmem:[%s1517_s26 + $0x48] sm:$0xf] }
  0x1a   : > { %v172_v10 = vld [vmem:[%s1517_s26 + $0x50] sm:$0xf]  ;;  %169 = vst [vmem:[%s1521_s27 + $0x20] sm:$0xf] %v168_v8  ;;  %171 = vst [vmem:[%s1521_s27 + $0x24] sm:$0xf] %v170_v9 }
  0x1b   : > { %173 = vst [vmem:[%s1521_s27 + $0x28] sm:$0xf] %v172_v10  ;;  %v174_v11 = vld [vmem:[%s1517_s26 + $0x58] sm:$0xf]  ;;  %v176_v12 = vld [vmem:[%s1517_s26 + $0x60] sm:$0xf] }
  0x1c   : > { %v178_v13 = vld [vmem:[%s1517_s26 + $0x68] sm:$0xf]  ;;  %175 = vst [vmem:[%s1521_s27 + $0x2c] sm:$0xf] %v174_v11  ;;  %177 = vst [vmem:[%s1521_s27 + $0x30] sm:$0xf] %v176_v12 }
  0x1d   : > { %179 = vst [vmem:[%s1521_s27 + $0x34] sm:$0xf] %v178_v13  ;;  %v180_v14 = vld [vmem:[%s1517_s26 + $0x70] sm:$0xf]  ;;  %v182_v15 = vld [vmem:[%s1517_s26 + $0x78] sm:$0xf] }
  0x1e   : > { %v184_v16 = vld [vmem:[%s1517_s26 + $0x80] sm:$0xf]  ;;  %181 = vst [vmem:[%s1521_s27 + $0x38] sm:$0xf] %v180_v14  ;;  %183 = vst [vmem:[%s1521_s27 + $0x3c] sm:$0xf] %v182_v15 }
  0x1f   : > { %185 = vst [vmem:[%s1521_s27 + $0x40] sm:$0xf] %v184_v16  ;;  %v186_v17 = vld [vmem:[%s1517_s26 + $0x88] sm:$0xf]  ;;  %v188_v18 = vld [vmem:[%s1517_s26 + $0x90] sm:$0xf] }
  0x20   : > { %v190_v19 = vld [vmem:[%s1517_s26 + $0x98] sm:$0xf]  ;;  %187 = vst [vmem:[%s1521_s27 + $0x44] sm:$0xf] %v186_v17  ;;  %189 = vst [vmem:[%s1521_s27 + $0x48] sm:$0xf] %v188_v18 }
  0x21   : > { %191 = vst [vmem:[%s1521_s27 + $0x4c] sm:$0xf] %v190_v19  ;;  %v192_v20 = vld [vmem:[%s1517_s26 + $0xa0] sm:$0xf]  ;;  %v194_v21 = vld [vmem:[%s1517_s26 + $0xa8] sm:$0xf] }
  0x22   : > { %v196_v22 = vld [vmem:[%s1517_s26 + $0xb0] sm:$0xf]  ;;  %193 = vst [vmem:[%s1521_s27 + $0x50] sm:$0xf] %v192_v20  ;;  %195 = vst [vmem:[%s1521_s27 + $0x54] sm:$0xf] %v194_v21 }
  0x23   : > { %197 = vst [vmem:[%s1521_s27 + $0x58] sm:$0xf] %v196_v22  ;;  %v198_v23 = vld [vmem:[%s1517_s26 + $0xb8] sm:$0xf]  ;;  %v200_v24 = vld [vmem:[%s1517_s26 + $0xc0] sm:$0xf] }
  0x24   : > { %v202_v25 = vld [vmem:[%s1517_s26 + $0xc8] sm:$0xf]  ;;  %199 = vst [vmem:[%s1521_s27 + $0x5c] sm:$0xf] %v198_v23  ;;  %201 = vst [vmem:[%s1521_s27 + $0x60] sm:$0xf] %v200_v24 }
  0x25   : > { %203 = vst [vmem:[%s1521_s27 + $0x64] sm:$0xf] %v202_v25  ;;  %v204_v26 = vld [vmem:[%s1517_s26 + $0xd0] sm:$0xf]  ;;  %v206_v27 = vld [vmem:[%s1517_s26 + $0xd8] sm:$0xf] }
  0x26   : > { %v208_v28 = vld [vmem:[%s1517_s26 + $0xe0] sm:$0xf]  ;;  %205 = vst [vmem:[%s1521_s27 + $0x68] sm:$0xf] %v204_v26  ;;  %207 = vst [vmem:[%s1521_s27 + $0x6c] sm:$0xf] %v206_v27 }
  0x27   : > { %209 = vst [vmem:[%s1521_s27 + $0x70] sm:$0xf] %v208_v28  ;;  %v210_v29 = vld [vmem:[%s1517_s26 + $0xe8] sm:$0xf]  ;;  %v212_v30 = vld [vmem:[%s1517_s26 + $0xf0] sm:$0xf] }
  0x28   : > { %v214_v31 = vld [vmem:[%s1517_s26 + $0xf8] sm:$0xf]  ;;  %211 = vst [vmem:[%s1521_s27 + $0x74] sm:$0xf] %v210_v29  ;;  %213 = vst [vmem:[%s1521_s27 + $0x78] sm:$0xf] %v212_v30 }
  0x29   : > { %215 = vst [vmem:[%s1521_s27 + $0x7c] sm:$0xf] %v214_v31  ;;  %v216_v32 = vld [vmem:[%s1517_s26 + $0x100] sm:$0xf]  ;;  %v218_v33 = vld [vmem:[%s1517_s26 + $0x108] sm:$0xf] }
  0x2a   : > { %v220_v34 = vld [vmem:[%s1517_s26 + $0x110] sm:$0xf]  ;;  %217 = vst [vmem:[%s1521_s27 + $0x80] sm:$0xf] %v216_v32  ;;  %219 = vst [vmem:[%s1521_s27 + $0x84] sm:$0xf] %v218_v33 }
  0x2b   : > { %221 = vst [vmem:[%s1521_s27 + $0x88] sm:$0xf] %v220_v34  ;;  %v222_v35 = vld [vmem:[%s1517_s26 + $0x118] sm:$0xf]  ;;  %v224_v36 = vld [vmem:[%s1517_s26 + $0x120] sm:$0xf] }
  0x2c   : > { %v226_v37 = vld [vmem:[%s1517_s26 + $0x128] sm:$0xf]  ;;  %223 = vst [vmem:[%s1521_s27 + $0x8c] sm:$0xf] %v222_v35  ;;  %225 = vst [vmem:[%s1521_s27 + $0x90] sm:$0xf] %v224_v36 }
  0x2d   : > { %227 = vst [vmem:[%s1521_s27 + $0x94] sm:$0xf] %v226_v37  ;;  %v228_v38 = vld [vmem:[%s1517_s26 + $0x130] sm:$0xf]  ;;  %v230_v39 = vld [vmem:[%s1517_s26 + $0x138] sm:$0xf] }
  0x2e   : > { %v232_v40 = vld [vmem:[%s1517_s26 + $0x140] sm:$0xf]  ;;  %229 = vst [vmem:[%s1521_s27 + $0x98] sm:$0xf] %v228_v38  ;;  %231 = vst [vmem:[%s1521_s27 + $0x9c] sm:$0xf] %v230_v39 }
  0x2f   : > { %233 = vst [vmem:[%s1521_s27 + $0xa0] sm:$0xf] %v232_v40  ;;  %v234_v41 = vld [vmem:[%s1517_s26 + $0x148] sm:$0xf]  ;;  %v236_v42 = vld [vmem:[%s1517_s26 + $0x150] sm:$0xf] }
  0x30   : > { %v238_v43 = vld [vmem:[%s1517_s26 + $0x158] sm:$0xf]  ;;  %235 = vst [vmem:[%s1521_s27 + $0xa4] sm:$0xf] %v234_v41  ;;  %237 = vst [vmem:[%s1521_s27 + $0xa8] sm:$0xf] %v236_v42 }
  0x31   : > { %239 = vst [vmem:[%s1521_s27 + $0xac] sm:$0xf] %v238_v43  ;;  %v240_v44 = vld [vmem:[%s1517_s26 + $0x160] sm:$0xf]  ;;  %v242_v45 = vld [vmem:[%s1517_s26 + $0x168] sm:$0xf] }
  0x32   : > { %v244_v46 = vld [vmem:[%s1517_s26 + $0x170] sm:$0xf]  ;;  %241 = vst [vmem:[%s1521_s27 + $0xb0] sm:$0xf] %v240_v44  ;;  %243 = vst [vmem:[%s1521_s27 + $0xb4] sm:$0xf] %v242_v45 }
  0x33   : > { %245 = vst [vmem:[%s1521_s27 + $0xb8] sm:$0xf] %v244_v46  ;;  %v246_v47 = vld [vmem:[%s1517_s26 + $0x178] sm:$0xf]  ;;  %v248_v48 = vld [vmem:[%s1517_s26 + $0x180] sm:$0xf] }
  0x34   : > { %v250_v49 = vld [vmem:[%s1517_s26 + $0x188] sm:$0xf]  ;;  %247 = vst [vmem:[%s1521_s27 + $0xbc] sm:$0xf] %v246_v47  ;;  %249 = vst [vmem:[%s1521_s27 + $0xc0] sm:$0xf] %v248_v48 }
  0x35   : > { %251 = vst [vmem:[%s1521_s27 + $0xc4] sm:$0xf] %v250_v49  ;;  %v252_v50 = vld [vmem:[%s1517_s26 + $0x190] sm:$0xf]  ;;  %v254_v51 = vld [vmem:[%s1517_s26 + $0x198] sm:$0xf] }
  0x36   : > { %v256_v52 = vld [vmem:[%s1517_s26 + $0x1a0] sm:$0xf]  ;;  %253 = vst [vmem:[%s1521_s27 + $0xc8] sm:$0xf] %v252_v50  ;;  %255 = vst [vmem:[%s1521_s27 + $0xcc] sm:$0xf] %v254_v51 }
  0x37   : > { %257 = vst [vmem:[%s1521_s27 + $0xd0] sm:$0xf] %v256_v52  ;;  %v258_v53 = vld [vmem:[%s1517_s26 + $0x1a8] sm:$0xf]  ;;  %v260_v54 = vld [vmem:[%s1517_s26 + $0x1b0] sm:$0xf] }
  0x38   : > { %v262_v55 = vld [vmem:[%s1517_s26 + $0x1b8] sm:$0xf]  ;;  %259 = vst [vmem:[%s1521_s27 + $0xd4] sm:$0xf] %v258_v53  ;;  %261 = vst [vmem:[%s1521_s27 + $0xd8] sm:$0xf] %v260_v54 }
  0x39   : > { %263 = vst [vmem:[%s1521_s27 + $0xdc] sm:$0xf] %v262_v55  ;;  %v264_v56 = vld [vmem:[%s1517_s26 + $0x1c0] sm:$0xf]  ;;  %v266_v57 = vld [vmem:[%s1517_s26 + $0x1c8] sm:$0xf] }
  0x3a   : > { %v268_v58 = vld [vmem:[%s1517_s26 + $0x1d0] sm:$0xf]  ;;  %265 = vst [vmem:[%s1521_s27 + $0xe0] sm:$0xf] %v264_v56  ;;  %267 = vst [vmem:[%s1521_s27 + $0xe4] sm:$0xf] %v266_v57 }
  0x3b   : > { %269 = vst [vmem:[%s1521_s27 + $0xe8] sm:$0xf] %v268_v58  ;;  %v270_v59 = vld [vmem:[%s1517_s26 + $0x1d8] sm:$0xf]  ;;  %v272_v60 = vld [vmem:[%s1517_s26 + $0x1e0] sm:$0xf] }
  0x3c   : > { %v274_v61 = vld [vmem:[%s1517_s26 + $0x1e8] sm:$0xf]  ;;  %271 = vst [vmem:[%s1521_s27 + $0xec] sm:$0xf] %v270_v59  ;;  %273 = vst [vmem:[%s1521_s27 + $0xf0] sm:$0xf] %v272_v60 }
  0x3d   : > { %275 = vst [vmem:[%s1521_s27 + $0xf4] sm:$0xf] %v274_v61  ;;  %v276_v62 = vld [vmem:[%s1517_s26 + $0x1f0] sm:$0xf]  ;;  %v278_v63 = vld [vmem:[%s1517_s26 + $0x1f8] sm:$0xf] }
  0x3e   : > { %277 = vst [vmem:[%s1521_s27 + $0xf8] sm:$0xf] %v276_v62  ;;  %279 = vst [vmem:[%s1521_s27 + $0xfc] sm:$0xf] %v278_v63 }
  0x3f PF: > { %p1175_p7 = scmp.ge.s32.totalorder %s1454_s14, 1  ;;  %p429_p8 = scmp.lt.s32.totalorder %s1454_s14, 3 }
  0x41   : > { %p430_p9 = pnand %p1175_p7, %p429_p8 }
  0x42   : > { %s436_s28 = sand.u32 (!%p430_p9), 1, %s1446_s12   ;;  %v1410_v0 = vld [vmem:[%s1793_s0 + $0x4] ss:$16 sps:$4 sm:$0xff] (!%p430_p9)   ;;  %v1456_v1 = vmov (!%p430_p9), 0   ;;  %v1413_v2 = vld [vmem:[%s1793_s0 + $0xc] ss:$16 sps:$4 sm:$0xff] (!%p430_p9)  }
  0x43   : > { %433 = sbr.rel (%p430_p9) target bundleno = 361 (0x169), region = 69  ;;  %s1176_s29 = sshll.u32 (!%p430_p9), %s436_s28, 8  ;;  %1374 = vset.pattern.permute.xlu0 (!%p430_p9), %v1456_v1  ;;  %1375 = vset.pattern.permute.xlu1 (!%p430_p9), %v1456_v1  ;;  %v1408_v33 = vld [vmem:[%s1793_s0] ss:$16 sps:$4 sm:$0xff] (!%p430_p9)   ;;  %v1411_v35 = vld [vmem:[%s1793_s0 + $0x8] ss:$16 sps:$4 sm:$0xff] (!%p430_p9)  }
  0x44   : > { %s1660_s7 = scalar_lea.vmem (!%p430_p9), [#allocation2], %s1176_s29  ;;  %891 = vmatprep.mubr.bf16.mxu0 (!%p430_p9), %v1410_v0  ;;  %956 = vmatprep.mubr.bf16.mxu1 (!%p430_p9), %v1413_v2  ;;  %v1414_v37 = vld [vmem:[%s1793_s0 + $0x24] ss:$16 sps:$4 sm:$0xff] (!%p430_p9)   ;;  %v1416_v38 = vld [vmem:[%s1793_s0 + $0x2c] ss:$16 sps:$4 sm:$0xff] (!%p430_p9)   ;;  %s1177_s21 = sshll.u32 (!%p430_p9), %s436_s28, 5 }
  0x45   : > { %v1376_v3 = vld [vmem:[%s1660_s7 + $0x40] sm:$0xff] (!%p430_p9)   ;;  %v1380_v7 = vld [vmem:[%s1660_s7 + $0x48] sm:$0xff] (!%p430_p9)   ;;  %v1384_v11 = vld [vmem:[%s1660_s7 + $0x50] sm:$0xff] (!%p430_p9)   ;;  %s1762_s12 = scalar_lea.vmem (!%p430_p9), [#allocation3], %s1177_s21 }
  0x46   : > { %v1377_v4 = vld [vmem:[%s1660_s7 + $0xc0] sm:$0xff] (!%p430_p9)   ;;  %1269 = vmatprep.subr.bf16.mxu0 (!%p430_p9), %v1376_v3  ;;  %v1381_v8 = vld [vmem:[%s1660_s7 + $0xc8] sm:$0xff] (!%p430_p9)   ;;  %v1385_v12 = vld [vmem:[%s1660_s7 + $0xd0] sm:$0xff] (!%p430_p9)  }
  0x47   : > { %v1378_v5 = vld [vmem:[%s1660_s7] sm:$0xff] (!%p430_p9)   ;;  %1309 = vmatprep.subr.bf16.mxu1 (!%p430_p9), %v1377_v4  ;;  %v1382_v9 = vld [vmem:[%s1660_s7 + $0x8] sm:$0xff] (!%p430_p9)   ;;  %v1386_v13 = vld [vmem:[%s1660_s7 + $0x10] sm:$0xff] (!%p430_p9)  }
  0x48   : > { %v1379_v6 = vld [vmem:[%s1660_s7 + $0x80] sm:$0xff] (!%p430_p9)   ;;  %1270 = vmatpush3.bf16.msra.mxu0 (!%p430_p9), %v1378_v5  ;;  %v1383_v10 = vld [vmem:[%s1660_s7 + $0x88] sm:$0xff] (!%p430_p9)   ;;  %v1387_v14 = vld [vmem:[%s1660_s7 + $0x90] sm:$0xff] (!%p430_p9)  }
  0x49   : > { %1310 = vmatpush3.bf16.msra.mxu1 (!%p430_p9), %v1379_v6  ;;  %1271 = vmatprep.subr.bf16.mxu0 (!%p430_p9), %v1380_v7  ;;  %v1388_v15 = vld [vmem:[%s1660_s7 + $0x58] sm:$0xff] (!%p430_p9)   ;;  %v1392_v19 = vld [vmem:[%s1660_s7 + $0x60] sm:$0xff] (!%p430_p9)   ;;  %v1396_v23 = vld [vmem:[%s1660_s7 + $0x68] sm:$0xff] (!%p430_p9)  }
  0x4a   : > { %1311 = vmatprep.subr.bf16.mxu1 %v1381_v8  ;;  %v1389_v16 = vld [vmem:[%s1660_s7 + $0xd8] sm:$0xff]   ;;  %v1393_v20 = vld [vmem:[%s1660_s7 + $0xe0] sm:$0xff]   ;;  %v1397_v24 = vld [vmem:[%s1660_s7 + $0xe8] sm:$0xff]   ;;  %s1235_s28 = sshll.u32 (%p1507_p5), %s1169_s15, 2 }
  0x4b   : > { %v1390_v17 = vld [vmem:[%s1660_s7 + $0x18] sm:$0xff]   ;;  %v1394_v21 = vld [vmem:[%s1660_s7 + $0x20] sm:$0xff]   ;;  %v1398_v25 = vld [vmem:[%s1660_s7 + $0x28] sm:$0xff]   ;;  %s1045_s24 = scalar_lea.vmem (%p1507_p5), %s1796_s3, %s1235_s28 }
  0x4c   : > { %1272 = vmatpush3.bf16.msra.mxu0 %v1382_v9  ;;  %v1391_v18 = vld [vmem:[%s1660_s7 + $0x98] sm:$0xff]   ;;  %v1395_v22 = vld [vmem:[%s1660_s7 + $0xa0] sm:$0xff]   ;;  %v1399_v26 = vld [vmem:[%s1660_s7 + $0xa8] sm:$0xff]  }
  0x4d   : > { %1312 = vmatpush3.bf16.msra.mxu1 %v1383_v10  ;;  %1273 = vmatprep.subr.bf16.mxu0 %v1384_v11  ;;  %v1400_v27 = vld [vmem:[%s1660_s7 + $0x70] sm:$0xff]   ;;  %v1404_v31 = vld [vmem:[%s1660_s7 + $0x78] sm:$0xff]   ;;  %v539_v40 = vld [vmem:[%s1795_s2] sm:$0xff] }
  0x4e   : > { %1313 = vmatprep.subr.bf16.mxu1 %v1385_v12  ;;  %v1401_v28 = vld [vmem:[%s1660_s7 + $0xf0] sm:$0xff]   ;;  %v1405_v32 = vld [vmem:[%s1660_s7 + $0xf8] sm:$0xff]   ;;  %549 = vperm.xlu0 %1374, %v539_v40   ;;  %v540_v45 = vld [vmem:[%s1795_s2 + $0x8] sm:$0xff] }
  0x4f   : > { %v1402_v29 = vld [vmem:[%s1660_s7 + $0x30] sm:$0xff]   ;;  %v1406_v34 = vld [vmem:[%s1660_s7 + $0x38] sm:$0xff]   ;;  %v543_v47 = vld [vmem:[%s1795_s2 + $0x20] sm:$0xff] }
  0x50   : > { %1274 = vmatpush3.bf16.msra.mxu0 %v1386_v13  ;;  %v1403_v30 = vld [vmem:[%s1660_s7 + $0xb0] sm:$0xff]   ;;  %v1407_v36 = vld [vmem:[%s1660_s7 + $0xb8] sm:$0xff]   ;;  %v544_v49 = vld [vmem:[%s1795_s2 + $0x28] sm:$0xff] }
  0x51   : > { %1314 = vmatpush3.bf16.msra.mxu1 %v1387_v14  ;;  %1275 = vmatprep.subr.bf16.mxu0 %v1388_v15  ;;  %v1418_v39 = vld [vmem:[%s1793_s0 + $0x20] ss:$16 sps:$4 sm:$0xff]   ;;  %v1419_v41 = vld [vmem:[%s1793_s0 + $0x28] ss:$16 sps:$4 sm:$0xff]   ;;  %v1420_v42 = vld [vmem:[%s1793_s0 + $0x44] ss:$16 sps:$4 sm:$0xff]  }
  0x52   : > { %1315 = vmatprep.subr.bf16.mxu1 %v1389_v16  ;;  %v541_v43 = vld [vmem:[%s1795_s2 + $0x10] sm:$0xff]  ;;  %v1422_v44 = vld [vmem:[%s1793_s0 + $0x4c] ss:$16 sps:$4 sm:$0xff]   ;;  %554 = vperm.xlu0 %1374, %v540_v45   ;;  %v1425_v50 = vld [vmem:[%s1793_s0 + $0x48] ss:$16 sps:$4 sm:$0xff]  }
  0x53   : > { %559 = vperm.xlu1 %1375, %v541_v43   ;;  %v542_v46 = vld [vmem:[%s1795_s2 + $0x18] sm:$0xff]  ;;  %v1424_v48 = vld [vmem:[%s1793_s0 + $0x40] ss:$16 sps:$4 sm:$0xff]   ;;  %v1426_v51 = vld [vmem:[%s1793_s0 + $0x64] ss:$16 sps:$4 sm:$0xff]  }
  0x54   : > { %1276 = vmatpush3.bf16.msra.mxu0 %v1390_v17  ;;  %v1428_v52 = vld [vmem:[%s1793_s0 + $0x6c] ss:$16 sps:$4 sm:$0xff]   ;;  %v545_v53 = vld [vmem:[%s1795_s2 + $0x30] sm:$0xff]  ;;  %v1431_v56 = vld [vmem:[%s1793_s0 + $0x68] ss:$16 sps:$4 sm:$0xff]  }
  0x55   : > { %1316 = vmatpush3.bf16.msra.mxu1 %v1391_v18  ;;  %1277 = vmatprep.subr.bf16.mxu0 %v1392_v19  ;;  %v546_v54 = vld [vmem:[%s1795_s2 + $0x38] sm:$0xff]  ;;  %v1430_v55 = vld [vmem:[%s1793_s0 + $0x60] ss:$16 sps:$4 sm:$0xff]  }
  0x56   : > { %1317 = vmatprep.subr.bf16.mxu1 %v1393_v20  ;;  %569 = vperm.xlu0 %1374, %v543_v47  }
  0x57   : > { %564 = vperm.xlu1 %1375, %v542_v46  }
  0x58   : > { %1278 = vmatpush3.bf16.msra.mxu0 %v1394_v21 }
  0x59   : > { %1318 = vmatpush3.bf16.msra.mxu1 %v1395_v22  ;;  %1279 = vmatprep.subr.bf16.mxu0 %v1396_v23 }
  0x5a   : > { %1319 = vmatprep.subr.bf16.mxu1 %v1397_v24  ;;  %579 = vperm.xlu0 %1374, %v545_v53  }
  0x5b   : > { %574 = vperm.xlu1 %1375, %v544_v49  }
  0x5c   : > { %1280 = vmatpush3.bf16.msra.mxu0 %v1398_v25 }
  0x5d   : > { %1320 = vmatpush3.bf16.msra.mxu1 %v1399_v26  ;;  %1281 = vmatprep.subr.bf16.mxu0 %v1400_v27 }
  0x5e   : > { %1321 = vmatprep.subr.bf16.mxu1 %v1401_v28 }
  0x5f   : > { %584 = vperm.xlu1 %1375, %v546_v54  }
  0x60   : > { %1282 = vmatpush3.bf16.msra.mxu0 %v1402_v29 }
  0x61   : > { %1322 = vmatpush3.bf16.msra.mxu1 %v1403_v30  ;;  %1283 = vmatprep.subr.bf16.mxu0 %v1404_v31 }
  0x62   : > { %1323 = vmatprep.subr.bf16.mxu1 %v1405_v32 }
  0x64   : > { %1284 = vmatpush3.bf16.msra.mxu0 %v1406_v34 }
  0x65   : > { %1324 = vmatpush3.bf16.msra.mxu1 %v1407_v36 }
  0x67   : > { %892 = vmatmul.mubr.bf16.vlgmr.msra.gmra.mrb[0].mxu0 %v1408_v33 }
  0x68   : > { %957 = vmatmul.mubr.bf16.vlgmr.msra.gmra.mrb[0].mxu1 %v1411_v35  ;;  %899 = vmatprep.mubr.bf16.mxu0 %v1414_v37 }
  0x69   : > { %964 = vmatprep.mubr.bf16.mxu1 %v1416_v38 }
  0x6f   : > { %900 = vmatmul.mubr.bf16.gmra.mrb[4].mxu0 %v1418_v39 }
  0x70   : > { %965 = vmatmul.mubr.bf16.gmra.mrb[4].mxu1 %v1419_v41  ;;  %907 = vmatprep.mubr.bf16.mxu0 %v1420_v42 }
  0x71   : > { %972 = vmatprep.mubr.bf16.mxu1 %v1422_v44 }
  0x77   : > { %908 = vmatmul.mubr.bf16.gmra.mrb[8].mxu0 %v1424_v48 }
  0x78   : > { %973 = vmatmul.mubr.bf16.gmra.mrb[8].mxu1 %v1425_v50  ;;  %915 = vmatprep.mubr.bf16.mxu0 %v1426_v51 }
  0x79   : > { %980 = vmatprep.mubr.bf16.mxu1 %v1428_v52 }
  0x7f   : > { %916 = vmatmul.mubr.bf16.gmra.mrb[12].mxu0 %v1430_v55 }
  0x80   : > { %981 = vmatmul.mubr.bf16.gmra.mrb[12].mxu1 %v1431_v56 }
  0xcd   : > { %v550_v57 = vpop.permute.xlu0 %549 }
  0xd1   : > { %v555_v59 = vpop.permute.xlu0 %554 }
  0xd2   : > { %v560_v10 = vpop.permute.xlu1 %559 }
  0xd5   : > { %v570_v32 = vpop.permute.xlu0 %569 }
  0xd6   : > { %v565_v27 = vpop.permute.xlu1 %564 }
  0xd9   : > { %v580_v52 = vpop.permute.xlu0 %579 }
  0xda   : > { %v575_v48 = vpop.permute.xlu1 %574 }
 0x13a   : > { %v1285_v58 = vpop.f32.mrb[0].mxu0 }
 0x13b   : > { %v1325_v60 = vpop.f32.mrb[0].mxu1  ;;  %v1286_v61 = vpop.f32.mrb[1].mxu0 }
 0x13c   : > { %v1287_v62 = vadd.f32 %v1286_v61, %v1285_v58  ;;  %v1326_v63 = vpop.f32.mrb[1].mxu1  ;;  %v1288_v0 = vpop.f32.mrb[2].mxu0 }
 0x13d   : > { %v1327_v1 = vadd.f32 %v1326_v63, %v1325_v60  ;;  %v1328_v2 = vpop.f32.mrb[2].mxu1  ;;  %v1289_v3 = vpop.f32.mrb[3].mxu0 }
 0x13e   : > { %v894_v4 = vadd.f32 %v1287_v62, %v550_v57  ;;  %v1290_v5 = vadd.f32 %v1289_v3, %v1288_v0  ;;  %v1329_v6 = vpop.f32.mrb[3].mxu1 }
 0x13f   : > { %v1330_v7 = vadd.f32 %v1329_v6, %v1328_v2 }
 0x140   : > { %v959_v8 = vadd.f32 %v1327_v1, %v894_v4  ;;  %v897_v9 = vadd.f32 %v1290_v5, %v555_v59  ;;  %v585_v5 = vpop.permute.xlu1 %584 }
 0x142   : > { %v962_v11 = vadd.f32 %v1330_v7, %v897_v9  ;;  %v1291_v12 = vpop.f32.mrb[4].mxu0  ;;  %v989_v15 = vmax.f32 %v959_v8, 0.0 }
 0x143   : > { %v1331_v13 = vpop.f32.mrb[4].mxu1  ;;  %v1292_v14 = vpop.f32.mrb[5].mxu0 }
 0x144   : > { %v990_v16 = vmax.f32 %v962_v11, 0.0  ;;  %v1293_v17 = vadd.f32 %v1292_v14, %v1291_v12  ;;  %v1332_v18 = vpop.f32.mrb[5].mxu1  ;;  %v1294_v19 = vpop.f32.mrb[6].mxu0 }
 0x145   : > { %v1333_v20 = vadd.f32 %v1332_v18, %v1331_v13  ;;  %v1334_v21 = vpop.f32.mrb[6].mxu1  ;;  %v1295_v22 = vpop.f32.mrb[7].mxu0 }
 0x146   : > { %v1249_v23 = vpack.c.bf16 %v990_v16, %v989_v15  ;;  %v902_v24 = vadd.f32 %v1293_v17, %v560_v10  ;;  %v1296_v25 = vadd.f32 %v1295_v22, %v1294_v19  ;;  %v1335_v26 = vpop.f32.mrb[7].mxu1 }
 0x147   : > { %v1336_v28 = vadd.f32 %v1335_v26, %v1334_v21 }
 0x148   : > { %1250 = vst [vmem:[%s1762_s12] sm:$0xff] %v1249_v23   ;;  %v967_v29 = vadd.f32 %v1333_v20, %v902_v24  ;;  %v905_v30 = vadd.f32 %v1296_v25, %v565_v27 }
 0x14a   : > { %v970_v31 = vadd.f32 %v1336_v28, %v905_v30  ;;  %v1297_v33 = vpop.f32.mrb[8].mxu0  ;;  %v991_v36 = vmax.f32 %v967_v29, 0.0 }
 0x14b   : > { %v1337_v34 = vpop.f32.mrb[8].mxu1  ;;  %v1298_v35 = vpop.f32.mrb[9].mxu0 }
 0x14c   : > { %v992_v37 = vmax.f32 %v970_v31, 0.0  ;;  %v1299_v38 = vadd.f32 %v1298_v35, %v1297_v33  ;;  %v1338_v39 = vpop.f32.mrb[9].mxu1  ;;  %v1300_v40 = vpop.f32.mrb[10].mxu0 }
 0x14d   : > { %v1339_v41 = vadd.f32 %v1338_v39, %v1337_v34  ;;  %v1340_v42 = vpop.f32.mrb[10].mxu1  ;;  %v1301_v43 = vpop.f32.mrb[11].mxu0 }
 0x14e   : > { %v1254_v44 = vpack.c.bf16 %v992_v37, %v991_v36  ;;  %v910_v45 = vadd.f32 %v1299_v38, %v570_v32  ;;  %v1302_v46 = vadd.f32 %v1301_v43, %v1300_v40  ;;  %v1341_v47 = vpop.f32.mrb[11].mxu1 }
 0x14f   : > { %v1342_v49 = vadd.f32 %v1341_v47, %v1340_v42  ;;  %v1061_v13 = vld [vmem:[%s1762_s12] sm:$0xf] (%p1507_p5)  ;;  %v1063_v14 = vld [vmem:[%s1762_s12 + $0x4] sm:$0xf] (%p1507_p5) }
 0x150   : > { %1266 = vst [vmem:[%s1762_s12 + $0x8] sm:$0xff] %v1254_v44   ;;  %v975_v50 = vadd.f32 %v1339_v41, %v910_v45  ;;  %v913_v51 = vadd.f32 %v1302_v46, %v575_v48  ;;  %1062 = vst [vmem:[%s1045_s24] sm:$0xf] (%p1507_p5), %v1061_v13 }
 0x151   : > { %1064 = vst [vmem:[%s1045_s24 + $0x8] sm:$0xf] (%p1507_p5), %v1063_v14 }
 0x152   : > { %v978_v53 = vadd.f32 %v1342_v49, %v913_v51  ;;  %v1303_v54 = vpop.f32.mrb[12].mxu0  ;;  %v993_v57 = vmax.f32 %v975_v50, 0.0 }
 0x153   : > { %v1343_v55 = vpop.f32.mrb[12].mxu1  ;;  %v1304_v56 = vpop.f32.mrb[13].mxu0 }
 0x154   : > { %v994_v58 = vmax.f32 %v978_v53, 0.0  ;;  %v1305_v59 = vadd.f32 %v1304_v56, %v1303_v54  ;;  %v1344_v60 = vpop.f32.mrb[13].mxu1  ;;  %v1306_v61 = vpop.f32.mrb[14].mxu0 }
 0x155   : > { %v1345_v62 = vadd.f32 %v1344_v60, %v1343_v55  ;;  %v1346_v63 = vpop.f32.mrb[14].mxu1  ;;  %v1307_v0 = vpop.f32.mrb[15].mxu0 }
 0x156   : > { %v1259_v1 = vpack.c.bf16 %v994_v58, %v993_v57  ;;  %v918_v2 = vadd.f32 %v1305_v59, %v580_v52  ;;  %v1308_v3 = vadd.f32 %v1307_v0, %v1306_v61  ;;  %v1347_v4 = vpop.f32.mrb[15].mxu1 }
 0x157   : > { %v1348_v6 = vadd.f32 %v1347_v4, %v1346_v63  ;;  %v1065_v15 = vld [vmem:[%s1762_s12 + $0x8] sm:$0xf] (%p1507_p5)  ;;  %v1067_v16 = vld [vmem:[%s1762_s12 + $0xc] sm:$0xf] (%p1507_p5) }
 0x158   : > { %1267 = vst [vmem:[%s1762_s12 + $0x10] sm:$0xff] %v1259_v1   ;;  %v983_v7 = vadd.f32 %v1345_v62, %v918_v2  ;;  %v921_v8 = vadd.f32 %v1308_v3, %v585_v5  ;;  %1066 = vst [vmem:[%s1045_s24 + $0x10] sm:$0xf] (%p1507_p5), %v1065_v15 }
 0x159   : > { %1068 = vst [vmem:[%s1045_s24 + $0x18] sm:$0xf] (%p1507_p5), %v1067_v16 }
 0x15a   : > { %v986_v9 = vadd.f32 %v1348_v6, %v921_v8  ;;  %v995_v10 = vmax.f32 %v983_v7, 0.0  ;;  %1043 = sbr.rel (!%p1507_p5) target bundleno = 361 (0x169), region = 77 }
 0x15c   : > { %v996_v11 = vmax.f32 %v986_v9, 0.0 }
 0x15e   : > { %v1264_v12 = vpack.c.bf16 %v996_v11, %v995_v10 }
 0x15f   : > { %v1069_v17 = vld [vmem:[%s1762_s12 + $0x10] sm:$0xf] (%p1507_p5)  ;;  %v1071_v18 = vld [vmem:[%s1762_s12 + $0x14] sm:$0xf] (%p1507_p5) }
 0x160   : > { %1268 = vst [vmem:[%s1762_s12 + $0x18] sm:$0xff] %v1264_v12   ;;  %1070 = vst [vmem:[%s1045_s24 + $0x20] sm:$0xf] (%p1507_p5), %v1069_v17 }
 0x161   : > { %1072 = vst [vmem:[%s1045_s24 + $0x28] sm:$0xf] %v1071_v18 }
 0x167   : > { %v1073_v19 = vld [vmem:[%s1762_s12 + $0x18] sm:$0xf]  ;;  %v1075_v20 = vld [vmem:[%s1762_s12 + $0x1c] sm:$0xf] }
 0x168   : > { %1074 = vst [vmem:[%s1045_s24 + $0x30] sm:$0xf] %v1073_v19  ;;  %1076 = vst [vmem:[%s1045_s24 + $0x38] sm:$0xf] %v1075_v20 }
 0x169 PF: > { %p10_p10 = scmp.ge.s32.totalorder %s1494_s16, 4   ;;  %s1798_s12 = smov %s1450_s13 }
 0x16a   : > { %s1799_s13 = smov %s1505_s19  ;;  %s1800_s14 = smov %s1494_s16 }
 0x16b   :  { %12 = sbr.rel (!%p10_p10) target bundleno = 2 (0x2), region = 149 }

// kernel: actor_forward.6
= control target key start
LH: loop header
LB: loop body
LE: loop exit
PB: predicated region body
PF: predicated region fallthrough
CT: control target
= control target key end

     0   :  { %v1013_v1 = vmov 0   ;;  %vm475_vm0 = vcmask 523264   ;;  %s1245_s1 = inlined_call_operand.vmem [shape: bf16[576,128], index: 1, kind: input, shape index: {}]   ;;  %s1246_s0 = inlined_call_operand.vmem [shape: bf16[64,576], index: 0, kind: input, shape index: {}]   ;;  %s1247_s2 = inlined_call_operand.vmem [shape: f32[64,1], index: 2, kind: input, shape index: {}]   ;;  %s1248_s3 = inlined_call_operand.vmem [shape: bf16[64,128], index: 3, kind: output, shape index: {}]  }
   0x1   :  { %v949_v0 = vld [vmem:[%s1245_s1 + $0x40] sm:$0xff]   ;;  %947 = vset.pattern.permute.xlu0 %v1013_v1  ;;  %948 = vset.pattern.permute.xlu1 %v1013_v1  ;;  %v953_v5 = vld [vmem:[%s1245_s1 + $0x48] sm:$0xff]   ;;  %v957_v9 = vld [vmem:[%s1245_s1 + $0x50] sm:$0xff]  }
   0x2   :  { %v950_v2 = vld [vmem:[%s1245_s1 + $0xc0] sm:$0xff]   ;;  %834 = vmatprep.subr.bf16.mxu0 %v949_v0  ;;  %v954_v6 = vld [vmem:[%s1245_s1 + $0xc8] sm:$0xff]   ;;  %v958_v10 = vld [vmem:[%s1245_s1 + $0xd0] sm:$0xff]  }
   0x3   :  { %v951_v3 = vld [vmem:[%s1245_s1] sm:$0xff]   ;;  %874 = vmatprep.subr.bf16.mxu1 %v950_v2  ;;  %v955_v7 = vld [vmem:[%s1245_s1 + $0x8] sm:$0xff]   ;;  %v959_v11 = vld [vmem:[%s1245_s1 + $0x10] sm:$0xff]  }
   0x4   :  { %v952_v4 = vld [vmem:[%s1245_s1 + $0x80] sm:$0xff]   ;;  %835 = vmatpush3.bf16.msra.mxu0 %v951_v3  ;;  %v956_v8 = vld [vmem:[%s1245_s1 + $0x88] sm:$0xff]   ;;  %v960_v12 = vld [vmem:[%s1245_s1 + $0x90] sm:$0xff]  }
   0x5   :  { %875 = vmatpush3.bf16.msra.mxu1 %v952_v4  ;;  %836 = vmatprep.subr.bf16.mxu0 %v953_v5  ;;  %v961_v13 = vld [vmem:[%s1245_s1 + $0x58] sm:$0xff]   ;;  %v965_v17 = vld [vmem:[%s1245_s1 + $0x60] sm:$0xff]   ;;  %v969_v21 = vld [vmem:[%s1245_s1 + $0x68] sm:$0xff]  }
   0x6   :  { %876 = vmatprep.subr.bf16.mxu1 %v954_v6  ;;  %v962_v14 = vld [vmem:[%s1245_s1 + $0xd8] sm:$0xff]   ;;  %v966_v18 = vld [vmem:[%s1245_s1 + $0xe0] sm:$0xff]   ;;  %v970_v22 = vld [vmem:[%s1245_s1 + $0xe8] sm:$0xff]  }
   0x7   :  { %v963_v15 = vld [vmem:[%s1245_s1 + $0x18] sm:$0xff]   ;;  %v967_v19 = vld [vmem:[%s1245_s1 + $0x20] sm:$0xff]   ;;  %v971_v23 = vld [vmem:[%s1245_s1 + $0x28] sm:$0xff]  }
   0x8   :  { %837 = vmatpush3.bf16.msra.mxu0 %v955_v7  ;;  %v964_v16 = vld [vmem:[%s1245_s1 + $0x98] sm:$0xff]   ;;  %v968_v20 = vld [vmem:[%s1245_s1 + $0xa0] sm:$0xff]   ;;  %v972_v24 = vld [vmem:[%s1245_s1 + $0xa8] sm:$0xff]  }
   0x9   :  { %877 = vmatpush3.bf16.msra.mxu1 %v956_v8  ;;  %838 = vmatprep.subr.bf16.mxu0 %v957_v9  ;;  %v973_v25 = vld [vmem:[%s1245_s1 + $0x70] sm:$0xff]   ;;  %v977_v29 = vld [vmem:[%s1245_s1 + $0x78] sm:$0xff]   ;;  %v986_v36 = vld [vmem:[%s1246_s0 + $0xc] ss:$20 sps:$4 sm:$0xff]  }
   0xa   :  { %878 = vmatprep.subr.bf16.mxu1 %v958_v10  ;;  %v974_v26 = vld [vmem:[%s1245_s1 + $0xf0] sm:$0xff]   ;;  %v978_v30 = vld [vmem:[%s1245_s1 + $0xf8] sm:$0xff]   ;;  %v987_v37 = vld [vmem:[%s1245_s1 + $0x100] sm:$0xff]   ;;  %585 = vmatprep.mubr.bf16.mxu1 %v986_v36 }
   0xb   :  { %v975_v27 = vld [vmem:[%s1245_s1 + $0x30] sm:$0xff]   ;;  %v979_v31 = vld [vmem:[%s1245_s1 + $0x38] sm:$0xff]   ;;  %v988_v38 = vld [vmem:[%s1246_s0 + $0x2c] ss:$20 sps:$4 sm:$0xff]  }
   0xc   :  { %839 = vmatpush3.bf16.msra.mxu0 %v959_v11  ;;  %v976_v28 = vld [vmem:[%s1245_s1 + $0xb0] sm:$0xff]   ;;  %v980_v32 = vld [vmem:[%s1245_s1 + $0xb8] sm:$0xff]   ;;  %v994_v40 = vld [vmem:[%s1245_s1 + $0x108] sm:$0xff]  }
   0xd   :  { %879 = vmatpush3.bf16.msra.mxu1 %v960_v12  ;;  %840 = vmatprep.subr.bf16.mxu0 %v961_v13  ;;  %v981_v33 = vld [vmem:[%s1246_s0] ss:$20 sps:$4 sm:$0xff]   ;;  %v983_v34 = vld [vmem:[%s1246_s0 + $0x4] ss:$20 sps:$4 sm:$0xff]   ;;  %v984_v35 = vld [vmem:[%s1246_s0 + $0x8] ss:$20 sps:$4 sm:$0xff]  }
   0xe   :  { %880 = vmatprep.subr.bf16.mxu1 %v962_v14  ;;  %520 = vmatprep.mubr.bf16.mxu0 %v983_v34  ;;  %v990_v39 = vld [vmem:[%s1246_s0 + $0x34] ss:$20 sps:$4 sm:$0xff]   ;;  %v993_v42 = vld [vmem:[%s1246_s0 + $0x30] ss:$20 sps:$4 sm:$0xff]   ;;  %v1008_v46 = vld [vmem:[%s1245_s1 + $0x118] sm:$0xff]  }
   0xf   :  { %v992_v41 = vld [vmem:[%s1246_s0 + $0x28] ss:$20 sps:$4 sm:$0xff]   ;;  %v1001_v45 = vld [vmem:[%s1245_s1 + $0x110] sm:$0xff]   ;;  %v1000_v48 = vld [vmem:[%s1246_s0 + $0x58] ss:$20 sps:$4 sm:$0xff]  }
  0x10   :  { %841 = vmatpush3.bf16.msra.mxu0 %v963_v15  ;;  %v995_v43 = vld [vmem:[%s1246_s0 + $0x54] ss:$20 sps:$4 sm:$0xff]   ;;  %v997_v44 = vld [vmem:[%s1246_s0 + $0x5c] ss:$20 sps:$4 sm:$0xff]   ;;  %v1004_v50 = vld [vmem:[%s1246_s0 + $0x84] ss:$20 sps:$4 sm:$0xff]  }
  0x11   :  { %881 = vmatpush3.bf16.msra.mxu1 %v964_v16  ;;  %842 = vmatprep.subr.bf16.mxu0 %v965_v17  ;;  %v999_v47 = vld [vmem:[%s1246_s0 + $0x50] ss:$20 sps:$4 sm:$0xff]   ;;  %v112_v53 = vld [vmem:[%s1247_s2 + $0x8] sm:$0xff]  ;;  %v114_v54 = vld [vmem:[%s1247_s2 + $0x18] sm:$0xff] }
  0x12   :  { %882 = vmatprep.subr.bf16.mxu1 %v966_v18  ;;  %v1002_v49 = vld [vmem:[%s1246_s0 + $0x7c] ss:$20 sps:$4 sm:$0xff]   ;;  %v111_v51 = vld [vmem:[%s1247_s2] sm:$0xff]  ;;  %v1006_v55 = vld [vmem:[%s1246_s0 + $0x78] ss:$20 sps:$4 sm:$0xff]  }
  0x13   :  { %v113_v52 = vld [vmem:[%s1247_s2 + $0x10] sm:$0xff]  ;;  %121 = vperm.xlu0 %947, %v111_v51   ;;  %v115_v58 = vld [vmem:[%s1247_s2 + $0x20] sm:$0xff]  ;;  %v116_v60 = vld [vmem:[%s1247_s2 + $0x28] sm:$0xff] }
  0x14   :  { %843 = vmatpush3.bf16.msra.mxu0 %v967_v19  ;;  %131 = vperm.xlu1 %948, %v113_v52   ;;  %v1007_v56 = vld [vmem:[%s1246_s0 + $0x80] ss:$20 sps:$4 sm:$0xff]   ;;  %v1009_v57 = vld [vmem:[%s1246_s0 + $0x10] ss:$20 sps:$4 sm:$0xff]   ;;  %v118_v62 = vld [vmem:[%s1247_s2 + $0x38] sm:$0xff] }
  0x15   :  { %883 = vmatpush3.bf16.msra.mxu1 %v968_v20  ;;  %844 = vmatprep.subr.bf16.mxu0 %v969_v21  ;;  %v1010_v59 = vld [vmem:[%s1246_s0 + $0x60] ss:$20 sps:$4 sm:$0xff]   ;;  %v1011_v63 = vld [vmem:[%s1246_s0 + $0x38] ss:$20 sps:$4 sm:$0xff]   ;;  %v1012_v0 = vld [vmem:[%s1246_s0 + $0x88] ss:$20 sps:$4 sm:$0xff]  }
  0x16   :  { %884 = vmatprep.subr.bf16.mxu1 %v970_v22  ;;  %v117_v61 = vld [vmem:[%s1247_s2 + $0x30] sm:$0xff] }
  0x17   :  { %126 = vperm.xlu0 %947, %v112_v53  }
  0x18   :  { %845 = vmatpush3.bf16.msra.mxu0 %v971_v23  ;;  %136 = vperm.xlu1 %948, %v114_v54  }
  0x19   :  { %885 = vmatpush3.bf16.msra.mxu1 %v972_v24  ;;  %846 = vmatprep.subr.bf16.mxu0 %v973_v25 }
  0x1a   :  { %886 = vmatprep.subr.bf16.mxu1 %v974_v26 }
  0x1b   :  { %141 = vperm.xlu0 %947, %v115_v58  }
  0x1c   :  { %847 = vmatpush3.bf16.msra.mxu0 %v975_v27  ;;  %146 = vperm.xlu1 %948, %v116_v60  }
  0x1d   :  { %887 = vmatpush3.bf16.msra.mxu1 %v976_v28  ;;  %848 = vmatprep.subr.bf16.mxu0 %v977_v29 }
  0x1e   :  { %888 = vmatprep.subr.bf16.mxu1 %v978_v30 }
  0x1f   :  { %151 = vperm.xlu0 %947, %v117_v61  }
  0x20   :  { %849 = vmatpush3.bf16.msra.mxu0 %v979_v31  ;;  %156 = vperm.xlu1 %948, %v118_v62  }
  0x21   :  { %889 = vmatpush3.bf16.msra.mxu1 %v980_v32  ;;  %922 = vmatprep.subr.bf16.mxu0 %v987_v37 }
  0x22   :  { %938 = vmatprep.subr.bf16.mxu1 %v987_v37 }
  0x23   :  { %521 = vmatmul.mubr.bf16.vlgmr.msra.gmra.mrb[0].mxu0 %v981_v33 }
  0x24   :  { %586 = vmatmul.mubr.bf16.vlgmr.msra.gmra.mrb[0].mxu1 %v984_v35  ;;  %923 = vmatpush3.bf16.msra.mxu0 %v987_v37 }
  0x25   :  { %942 = vmatpush3.bf16.msra.mxu1 %v987_v37  ;;  %528 = vmatprep.mubr.bf16.mxu0 %v988_v38 }
  0x26   :  { %593 = vmatprep.mubr.bf16.mxu1 %v990_v39  ;;  %924 = vmatprep.subr.bf16.mxu0 %v994_v40 }
  0x27   :  { %939 = vmatprep.subr.bf16.mxu1 %v994_v40 }
  0x28   :  { %925 = vmatpush3.bf16.msra.mxu0 %v994_v40 }
  0x29   :  { %943 = vmatpush3.bf16.msra.mxu1 %v994_v40  ;;  %926 = vmatprep.subr.bf16.mxu0 %v1001_v45 }
  0x2a   :  { %940 = vmatprep.subr.bf16.mxu1 %v1001_v45 }
  0x2b   :  { %529 = vmatmul.mubr.bf16.gmra.mrb[4].mxu0 %v992_v41 }
  0x2c   :  { %594 = vmatmul.mubr.bf16.gmra.mrb[4].mxu1 %v993_v42  ;;  %536 = vmatprep.mubr.bf16.mxu0 %v995_v43 }
  0x2d   :  { %601 = vmatprep.mubr.bf16.mxu1 %v997_v44  ;;  %927 = vmatpush3.bf16.msra.mxu0 %v1001_v45 }
  0x2e   :  { %944 = vmatpush3.bf16.msra.mxu1 %v1001_v45  ;;  %928 = vmatprep.subr.bf16.mxu0 %v1008_v46 }
  0x2f   :  { %941 = vmatprep.subr.bf16.mxu1 %v1008_v46 }
  0x31   :  { %929 = vmatpush3.bf16.msra.mxu0 %v1008_v46 }
  0x32   :  { %945 = vmatpush3.bf16.msra.mxu1 %v1008_v46 }
  0x33   :  { %537 = vmatmul.mubr.bf16.gmra.mrb[8].mxu0 %v999_v47 }
  0x34   :  { %602 = vmatmul.mubr.bf16.gmra.mrb[8].mxu1 %v1000_v48  ;;  %544 = vmatprep.mubr.bf16.mxu0 %v1002_v49 }
  0x35   :  { %609 = vmatprep.mubr.bf16.mxu1 %v1004_v50 }
  0x3b   :  { %545 = vmatmul.mubr.bf16.gmra.mrb[12].mxu0 %v1006_v55 }
  0x3c   :  { %610 = vmatmul.mubr.bf16.gmra.mrb[12].mxu1 %v1007_v56  ;;  %930 = vmatprep.mubr.msk.bf16.mxu0 %vm475_vm0, %v1009_v57 }
  0x3d   :  { %934 = vmatprep.mubr.msk.bf16.mxu1 %vm475_vm0, %v1010_v59 }
  0x43   :  { %931 = vmatmul.mubr.msk.bf16.vlgmr.msra.gmra.mrb[16].mxu0 %vm475_vm0, %v1011_v63 }
  0x44   :  { %935 = vmatmul.mubr.msk.bf16.vlgmr.msra.gmra.mrb[16].mxu1 %vm475_vm0, %v1012_v0 }
  0x92   :  { %v122_v1 = vpop.permute.xlu0 %121 }
  0x93   :  { %v132_v18 = vpop.permute.xlu1 %131 }
  0x96   :  { %v127_v3 = vpop.permute.xlu0 %126 }
  0x97   :  { %v137_v33 = vpop.permute.xlu1 %136 }
  0x9a   :  { %v142_v36 = vpop.permute.xlu0 %141 }
  0x9b   :  { %v147_v50 = vpop.permute.xlu1 %146 }
  0x9e   :  { %v152_v54 = vpop.permute.xlu0 %151 }
  0xf6   :  { %v850_v2 = vpop.f32.mrb[0].mxu0 }
  0xf7   :  { %v890_v4 = vpop.f32.mrb[0].mxu1  ;;  %v851_v5 = vpop.f32.mrb[1].mxu0 }
  0xf8   :  { %v852_v6 = vadd.f32 %v851_v5, %v850_v2  ;;  %v891_v7 = vpop.f32.mrb[1].mxu1  ;;  %v853_v8 = vpop.f32.mrb[2].mxu0 }
  0xf9   :  { %v892_v9 = vadd.f32 %v891_v7, %v890_v4  ;;  %v893_v10 = vpop.f32.mrb[2].mxu1  ;;  %v854_v11 = vpop.f32.mrb[3].mxu0 }
  0xfa   :  { %v523_v12 = vadd.f32 %v852_v6, %v122_v1  ;;  %v855_v13 = vadd.f32 %v854_v11, %v853_v8  ;;  %v894_v14 = vpop.f32.mrb[3].mxu1  ;;  %v157_v4 = vpop.permute.xlu1 %156 }
  0xfb   :  { %v895_v15 = vadd.f32 %v894_v14, %v893_v10 }
  0xfc   :  { %v526_v16 = vadd.f32 %v855_v13, %v127_v3  ;;  %v588_v17 = vadd.f32 %v892_v9, %v523_v12 }
  0xfe   :  { %v856_v19 = vpop.f32.mrb[4].mxu0  ;;  %v1230_v20 = vadd.f32 %v895_v15, %v526_v16 }
  0xff   :  { %v896_v21 = vpop.f32.mrb[4].mxu1  ;;  %v857_v22 = vpop.f32.mrb[5].mxu0 }
 0x100   :  { %v858_v23 = vadd.f32 %v857_v22, %v856_v19  ;;  %v897_v24 = vpop.f32.mrb[5].mxu1  ;;  %v859_v25 = vpop.f32.mrb[6].mxu0 }
 0x101   :  { %v898_v26 = vadd.f32 %v897_v24, %v896_v21  ;;  %v899_v27 = vpop.f32.mrb[6].mxu1  ;;  %v860_v28 = vpop.f32.mrb[7].mxu0 }
 0x102   :  { %v531_v29 = vadd.f32 %v858_v23, %v132_v18  ;;  %v861_v30 = vadd.f32 %v860_v28, %v859_v25  ;;  %v900_v31 = vpop.f32.mrb[7].mxu1 }
 0x103   :  { %v901_v32 = vadd.f32 %v900_v31, %v899_v27 }
 0x104   :  { %v534_v34 = vadd.f32 %v861_v30, %v137_v33  ;;  %v596_v35 = vadd.f32 %v898_v26, %v531_v29 }
 0x106   :  { %v862_v37 = vpop.f32.mrb[8].mxu0  ;;  %v599_v38 = vadd.f32 %v901_v32, %v534_v34 }
 0x107   :  { %v902_v39 = vpop.f32.mrb[8].mxu1  ;;  %v863_v40 = vpop.f32.mrb[9].mxu0 }
 0x108   :  { %v864_v41 = vadd.f32 %v863_v40, %v862_v37  ;;  %v903_v42 = vpop.f32.mrb[9].mxu1  ;;  %v865_v43 = vpop.f32.mrb[10].mxu0 }
 0x109   :  { %v904_v44 = vadd.f32 %v903_v42, %v902_v39  ;;  %v905_v45 = vpop.f32.mrb[10].mxu1  ;;  %v866_v46 = vpop.f32.mrb[11].mxu0 }
 0x10a   :  { %v539_v47 = vadd.f32 %v864_v41, %v142_v36  ;;  %v867_v48 = vadd.f32 %v866_v46, %v865_v43  ;;  %v906_v49 = vpop.f32.mrb[11].mxu1 }
 0x10b   :  { %v907_v51 = vadd.f32 %v906_v49, %v905_v45 }
 0x10c   :  { %v542_v52 = vadd.f32 %v867_v48, %v147_v50  ;;  %v604_v53 = vadd.f32 %v904_v44, %v539_v47 }
 0x10e   :  { %v868_v55 = vpop.f32.mrb[12].mxu0  ;;  %v607_v56 = vadd.f32 %v907_v51, %v542_v52 }
 0x10f   :  { %v908_v57 = vpop.f32.mrb[12].mxu1  ;;  %v869_v58 = vpop.f32.mrb[13].mxu0 }
 0x110   :  { %v870_v59 = vadd.f32 %v869_v58, %v868_v55  ;;  %v909_v60 = vpop.f32.mrb[13].mxu1  ;;  %v871_v61 = vpop.f32.mrb[14].mxu0 }
 0x111   :  { %v910_v62 = vadd.f32 %v909_v60, %v908_v57  ;;  %v911_v63 = vpop.f32.mrb[14].mxu1  ;;  %v872_v0 = vpop.f32.mrb[15].mxu0 }
 0x112   :  { %v547_v1 = vadd.f32 %v870_v59, %v152_v54  ;;  %v873_v2 = vadd.f32 %v872_v0, %v871_v61  ;;  %v912_v3 = vpop.f32.mrb[15].mxu1 }
 0x113   :  { %v913_v5 = vadd.f32 %v912_v3, %v911_v63 }
 0x114   :  { %v550_v6 = vadd.f32 %v873_v2, %v157_v4  ;;  %v612_v7 = vadd.f32 %v910_v62, %v547_v1 }
 0x116   :  { %v932_v8 = vpop.f32.mrb[16].mxu0  ;;  %v615_v9 = vadd.f32 %v913_v5, %v550_v6 }
 0x117   :  { %v661_v10 = vadd.f32 %v932_v8, %v596_v35  ;;  %v936_v11 = vpop.f32.mrb[16].mxu1  ;;  %v652_v12 = vpop.f32.mrb[17].mxu0 }
 0x118   :  { %v677_v13 = vadd.f32 %v936_v11, %v612_v7  ;;  %v653_v14 = vadd.f32 %v652_v12, %v588_v17  ;;  %v668_v15 = vpop.f32.mrb[17].mxu1  ;;  %v933_v16 = vpop.f32.mrb[18].mxu0 }
 0x119   :  { %v669_v18 = vadd.f32 %v668_v15, %v604_v53  ;;  %v664_v19 = vadd.f32 %v933_v16, %v599_v38  ;;  %v937_v21 = vpop.f32.mrb[18].mxu1  ;;  %v655_v22 = vpop.f32.mrb[19].mxu0  ;;  %v685_v26 = vmax.f32 %v661_v10, 0.0 }
 0x11a   :  { %v680_v23 = vadd.f32 %v937_v21, %v615_v9  ;;  %v656_v24 = vadd.f32 %v655_v22, %v1230_v20  ;;  %v671_v25 = vpop.f32.mrb[19].mxu1  ;;  %v689_v29 = vmax.f32 %v677_v13, 0.0  ;;  %v683_v30 = vmax.f32 %v653_v14, 0.0 }
 0x11b   :  { %v686_v27 = vmax.f32 %v664_v19, 0.0  ;;  %v672_v28 = vadd.f32 %v671_v25, %v607_v56  ;;  %v687_v33 = vmax.f32 %v669_v18, 0.0 }
 0x11c   :  { %v690_v31 = vmax.f32 %v680_v23, 0.0  ;;  %v684_v32 = vmax.f32 %v656_v24, 0.0 }
 0x11d   :  { %v819_v34 = vpack.c.bf16 %v686_v27, %v685_v26  ;;  %v688_v17 = vmax.f32 %v672_v28, 0.0 }
 0x11e   :  { %v829_v35 = vpack.c.bf16 %v690_v31, %v689_v29  ;;  %v814_v36 = vpack.c.bf16 %v684_v32, %v683_v30 }
 0x11f   :  { %831 = vst [vmem:[%s1248_s3 + $0x8] sm:$0xff] %v819_v34   ;;  %v824_v37 = vpack.c.bf16 %v688_v17, %v687_v33 }
 0x120   :  { %833 = vst [vmem:[%s1248_s3 + $0x18] sm:$0xff] %v829_v35   ;;  %815 = vst [vmem:[%s1248_s3] sm:$0xff] %v814_v36  }
 0x121   :  { %832 = vst [vmem:[%s1248_s3 + $0x10] sm:$0xff] %v824_v37  }

// kernel: actor_forward.7
= control target key start
LH: loop header
LB: loop body
LE: loop exit
PB: predicated region body
PF: predicated region fallthrough
CT: control target
= control target key end

     0   :  { %s11392_s1 = inlined_call_operand.vmem [shape: bf16[3200,512], index: 1, kind: input, shape index: {}]   ;;  %s11393_s0 = inlined_call_operand.vmem [shape: bf16[16,3200], index: 0, kind: input, shape index: {}]   ;;  %s11394_s3 = inlined_call_operand.vmem [shape: bf16[512,128], index: 3, kind: input, shape index: {}]   ;;  %s11395_s2 = inlined_call_operand.vmem [shape: f32[1,512], index: 2, kind: input, shape index: {}]   ;;  %s11396_s4 = inlined_call_operand.vmem [shape: f32[1,128], index: 4, kind: input, shape index: {}]   ;;  %s11397_s5 = inlined_call_operand.vmem [shape: f32[16,128], index: 5, kind: output, shape index: {}]  }
   0x1   :  { %v7501_v0 = vld [vmem:[%s11392_s1 + $0x4] ss:$16 sps:$4 sm:$0xff]   ;;  %v7503_v1 = vld [vmem:[%s11392_s1 + $0xc] ss:$16 sps:$4 sm:$0xff]   ;;  %v7505_v2 = vld [vmem:[%s11392_s1] ss:$16 sps:$4 sm:$0xff]  }
   0x2   :  { %4995 = vmatprep.subr.bf16.mxu0 %v7501_v0  ;;  %v7506_v3 = vld [vmem:[%s11392_s1 + $0x8] ss:$16 sps:$4 sm:$0xff]   ;;  %5554 = vmatprep.subr.bf16.mxu1 %v7503_v1  ;;  %v7507_v4 = vld [vmem:[%s11392_s1 + $0x24] ss:$16 sps:$4 sm:$0xff]   ;;  %v7509_v5 = vld [vmem:[%s11392_s1 + $0x2c] ss:$16 sps:$4 sm:$0xff]  }
   0x3   :  { %4996 = vmatpush1.bf16.msra.mxu0 %v7505_v2  ;;  %5555 = vmatpush1.bf16.msra.mxu1 %v7506_v3  ;;  %v7511_v6 = vld [vmem:[%s11392_s1 + $0x20] ss:$16 sps:$4 sm:$0xff]   ;;  %v7512_v7 = vld [vmem:[%s11392_s1 + $0x28] ss:$16 sps:$4 sm:$0xff]   ;;  %v7513_v8 = vld [vmem:[%s11392_s1 + $0x44] ss:$16 sps:$4 sm:$0xff]  }
   0x4   :  { %4997 = vmatprep.subr.bf16.mxu0 %v7507_v4  ;;  %5556 = vmatprep.subr.bf16.mxu1 %v7509_v5  ;;  %v7515_v9 = vld [vmem:[%s11392_s1 + $0x4c] ss:$16 sps:$4 sm:$0xff]   ;;  %v7517_v10 = vld [vmem:[%s11392_s1 + $0x40] ss:$16 sps:$4 sm:$0xff]   ;;  %v7518_v11 = vld [vmem:[%s11392_s1 + $0x48] ss:$16 sps:$4 sm:$0xff]  }
   0x5   :  { %v7519_v12 = vld [vmem:[%s11392_s1 + $0x64] ss:$16 sps:$4 sm:$0xff]   ;;  %v7521_v13 = vld [vmem:[%s11392_s1 + $0x6c] ss:$16 sps:$4 sm:$0xff]   ;;  %v7523_v14 = vld [vmem:[%s11392_s1 + $0x60] ss:$16 sps:$4 sm:$0xff]  }
   0x6   :  { %v7524_v15 = vld [vmem:[%s11392_s1 + $0x68] ss:$16 sps:$4 sm:$0xff]   ;;  %v7525_v16 = vld [vmem:[%s11392_s1 + $0x84] ss:$16 sps:$4 sm:$0xff]   ;;  %v7527_v17 = vld [vmem:[%s11392_s1 + $0x8c] ss:$16 sps:$4 sm:$0xff]  }
   0x7   :  { %4998 = vmatpush1.bf16.msra.mxu0 %v7511_v6  ;;  %5557 = vmatpush1.bf16.msra.mxu1 %v7512_v7  ;;  %v7529_v18 = vld [vmem:[%s11392_s1 + $0x80] ss:$16 sps:$4 sm:$0xff]   ;;  %v7530_v19 = vld [vmem:[%s11392_s1 + $0x88] ss:$16 sps:$4 sm:$0xff]   ;;  %v7531_v20 = vld [vmem:[%s11392_s1 + $0xa4] ss:$16 sps:$4 sm:$0xff]  }
   0x8   :  { %4999 = vmatprep.subr.bf16.mxu0 %v7513_v8  ;;  %5558 = vmatprep.subr.bf16.mxu1 %v7515_v9  ;;  %v7533_v21 = vld [vmem:[%s11392_s1 + $0xac] ss:$16 sps:$4 sm:$0xff]   ;;  %v7535_v22 = vld [vmem:[%s11392_s1 + $0xa0] ss:$16 sps:$4 sm:$0xff]   ;;  %v7536_v23 = vld [vmem:[%s11392_s1 + $0xa8] ss:$16 sps:$4 sm:$0xff]  }
   0x9   :  { %v7537_v24 = vld [vmem:[%s11392_s1 + $0xc4] ss:$16 sps:$4 sm:$0xff]   ;;  %v7539_v25 = vld [vmem:[%s11392_s1 + $0xcc] ss:$16 sps:$4 sm:$0xff]   ;;  %v7541_v26 = vld [vmem:[%s11392_s1 + $0xc0] ss:$16 sps:$4 sm:$0xff]  }
   0xa   :  { %v7542_v27 = vld [vmem:[%s11392_s1 + $0xc8] ss:$16 sps:$4 sm:$0xff]   ;;  %v7543_v28 = vld [vmem:[%s11392_s1 + $0xe4] ss:$16 sps:$4 sm:$0xff]   ;;  %v7545_v29 = vld [vmem:[%s11392_s1 + $0xec] ss:$16 sps:$4 sm:$0xff]  }
   0xb   :  { %5000 = vmatpush1.bf16.msra.mxu0 %v7517_v10  ;;  %5559 = vmatpush1.bf16.msra.mxu1 %v7518_v11  ;;  %v7547_v30 = vld [vmem:[%s11392_s1 + $0xe0] ss:$16 sps:$4 sm:$0xff]   ;;  %v7548_v31 = vld [vmem:[%s11392_s1 + $0xe8] ss:$16 sps:$4 sm:$0xff]   ;;  %v7549_v32 = vld [vmem:[%s11392_s1 + $0x104] ss:$16 sps:$4 sm:$0xff]  }
   0xc   :  { %5001 = vmatprep.subr.bf16.mxu0 %v7519_v12  ;;  %5560 = vmatprep.subr.bf16.mxu1 %v7521_v13  ;;  %v7551_v33 = vld [vmem:[%s11392_s1 + $0x10c] ss:$16 sps:$4 sm:$0xff]   ;;  %v7553_v34 = vld [vmem:[%s11392_s1 + $0x100] ss:$16 sps:$4 sm:$0xff]   ;;  %v7554_v35 = vld [vmem:[%s11392_s1 + $0x108] ss:$16 sps:$4 sm:$0xff]  }
   0xd   :  { %v7555_v36 = vld [vmem:[%s11392_s1 + $0x124] ss:$16 sps:$4 sm:$0xff]   ;;  %v7557_v37 = vld [vmem:[%s11392_s1 + $0x12c] ss:$16 sps:$4 sm:$0xff]   ;;  %v7559_v38 = vld [vmem:[%s11392_s1 + $0x120] ss:$16 sps:$4 sm:$0xff]  }
   0xe   :  { %v7560_v39 = vld [vmem:[%s11392_s1 + $0x128] ss:$16 sps:$4 sm:$0xff]   ;;  %v7561_v40 = vld [vmem:[%s11392_s1 + $0x144] ss:$16 sps:$4 sm:$0xff]   ;;  %v7563_v41 = vld [vmem:[%s11392_s1 + $0x14c] ss:$16 sps:$4 sm:$0xff]  }
   0xf   :  { %5002 = vmatpush1.bf16.msra.mxu0 %v7523_v14  ;;  %5561 = vmatpush1.bf16.msra.mxu1 %v7524_v15  ;;  %v7565_v42 = vld [vmem:[%s11392_s1 + $0x140] ss:$16 sps:$4 sm:$0xff]   ;;  %v7566_v43 = vld [vmem:[%s11392_s1 + $0x148] ss:$16 sps:$4 sm:$0xff]   ;;  %v7567_v44 = vld [vmem:[%s11392_s1 + $0x164] ss:$16 sps:$4 sm:$0xff]  }
  0x10   :  { %5003 = vmatprep.subr.bf16.mxu0 %v7525_v16  ;;  %5562 = vmatprep.subr.bf16.mxu1 %v7527_v17  ;;  %v7569_v45 = vld [vmem:[%s11392_s1 + $0x16c] ss:$16 sps:$4 sm:$0xff]   ;;  %v7571_v46 = vld [vmem:[%s11392_s1 + $0x160] ss:$16 sps:$4 sm:$0xff]   ;;  %v7572_v47 = vld [vmem:[%s11392_s1 + $0x168] ss:$16 sps:$4 sm:$0xff]  }
  0x11   :  { %v7599_v48 = vld [vmem:[%s11393_s0 + $0x4] ss:$100 sps:$4 sm:$0xff]   ;;  %v7575_v50 = vld [vmem:[%s11392_s1 + $0x18c] ss:$16 sps:$4 sm:$0xff]   ;;  %v7577_v51 = vld [vmem:[%s11392_s1 + $0x180] ss:$16 sps:$4 sm:$0xff]  }
  0x12   :  { %v7573_v49 = vld [vmem:[%s11392_s1 + $0x184] ss:$16 sps:$4 sm:$0xff]   ;;  %5027 = vmatprep.mubr.bf16.mxu0 %v7599_v48  ;;  %5586 = vmatprep.mubr.bf16.mxu1 %v7599_v48  ;;  %v7578_v52 = vld [vmem:[%s11392_s1 + $0x188] ss:$16 sps:$4 sm:$0xff]   ;;  %v7581_v54 = vld [vmem:[%s11392_s1 + $0x1ac] ss:$16 sps:$4 sm:$0xff]  }
  0x13   :  { %5004 = vmatpush1.bf16.msra.mxu0 %v7529_v18  ;;  %5563 = vmatpush1.bf16.msra.mxu1 %v7530_v19  ;;  %v7579_v53 = vld [vmem:[%s11392_s1 + $0x1a4] ss:$16 sps:$4 sm:$0xff]   ;;  %v7583_v55 = vld [vmem:[%s11392_s1 + $0x1a0] ss:$16 sps:$4 sm:$0xff]   ;;  %v7584_v56 = vld [vmem:[%s11392_s1 + $0x1a8] ss:$16 sps:$4 sm:$0xff]  }
  0x14   :  { %5005 = vmatprep.subr.bf16.mxu0 %v7531_v20  ;;  %5564 = vmatprep.subr.bf16.mxu1 %v7533_v21  ;;  %v7585_v57 = vld [vmem:[%s11392_s1 + $0x1c4] ss:$16 sps:$4 sm:$0xff]   ;;  %v7587_v58 = vld [vmem:[%s11392_s1 + $0x1cc] ss:$16 sps:$4 sm:$0xff]   ;;  %v7589_v59 = vld [vmem:[%s11392_s1 + $0x1c0] ss:$16 sps:$4 sm:$0xff]  }
  0x15   :  { %v7590_v60 = vld [vmem:[%s11392_s1 + $0x1c8] ss:$16 sps:$4 sm:$0xff]   ;;  %v7591_v61 = vld [vmem:[%s11392_s1 + $0x1e4] ss:$16 sps:$4 sm:$0xff]   ;;  %v7593_v62 = vld [vmem:[%s11392_s1 + $0x1ec] ss:$16 sps:$4 sm:$0xff]  }
  0x16   :  { %v7595_v63 = vld [vmem:[%s11392_s1 + $0x1e0] ss:$16 sps:$4 sm:$0xff]   ;;  %v7596_v0 = vld [vmem:[%s11392_s1 + $0x1e8] ss:$16 sps:$4 sm:$0xff]   ;;  %v7602_v1 = vld [vmem:[%s11392_s1 + $0x204] ss:$16 sps:$4 sm:$0xff]  }
  0x17   :  { %5006 = vmatpush1.bf16.msra.mxu0 %v7535_v22  ;;  %5565 = vmatpush1.bf16.msra.mxu1 %v7536_v23  ;;  %v7605_v2 = vld [vmem:[%s11392_s1 + $0x20c] ss:$16 sps:$4 sm:$0xff]   ;;  %v7597_v3 = vld [vmem:[%s11393_s0] ss:$100 sps:$4 sm:$0xff]   ;;  %v7603_v5 = vld [vmem:[%s11392_s1 + $0x208] ss:$16 sps:$4 sm:$0xff]  }
  0x18   :  { %5007 = vmatprep.subr.bf16.mxu0 %v7537_v24  ;;  %5566 = vmatprep.subr.bf16.mxu1 %v7539_v25  ;;  %v7600_v4 = vld [vmem:[%s11392_s1 + $0x200] ss:$16 sps:$4 sm:$0xff]   ;;  %v7608_v6 = vld [vmem:[%s11392_s1 + $0x224] ss:$16 sps:$4 sm:$0xff]   ;;  %v7611_v7 = vld [vmem:[%s11392_s1 + $0x22c] ss:$16 sps:$4 sm:$0xff]  }
  0x19   :  { %v7606_v8 = vld [vmem:[%s11392_s1 + $0x220] ss:$16 sps:$4 sm:$0xff]   ;;  %v7609_v9 = vld [vmem:[%s11392_s1 + $0x228] ss:$16 sps:$4 sm:$0xff]   ;;  %v7614_v10 = vld [vmem:[%s11392_s1 + $0x244] ss:$16 sps:$4 sm:$0xff]  }
  0x1a   :  { %v7617_v11 = vld [vmem:[%s11392_s1 + $0x24c] ss:$16 sps:$4 sm:$0xff]   ;;  %v7612_v12 = vld [vmem:[%s11392_s1 + $0x240] ss:$16 sps:$4 sm:$0xff]   ;;  %v7615_v13 = vld [vmem:[%s11392_s1 + $0x248] ss:$16 sps:$4 sm:$0xff]  }
  0x1b   :  { %5008 = vmatpush1.bf16.msra.mxu0 %v7541_v26  ;;  %5567 = vmatpush1.bf16.msra.mxu1 %v7542_v27  ;;  %v7620_v14 = vld [vmem:[%s11392_s1 + $0x264] ss:$16 sps:$4 sm:$0xff]   ;;  %v7623_v15 = vld [vmem:[%s11392_s1 + $0x26c] ss:$16 sps:$4 sm:$0xff]   ;;  %v7618_v16 = vld [vmem:[%s11392_s1 + $0x260] ss:$16 sps:$4 sm:$0xff]  }
  0x1c   :  { %5009 = vmatprep.subr.bf16.mxu0 %v7543_v28  ;;  %5568 = vmatprep.subr.bf16.mxu1 %v7545_v29  ;;  %v7621_v17 = vld [vmem:[%s11392_s1 + $0x268] ss:$16 sps:$4 sm:$0xff]   ;;  %v7626_v18 = vld [vmem:[%s11392_s1 + $0x284] ss:$16 sps:$4 sm:$0xff]   ;;  %v7629_v19 = vld [vmem:[%s11392_s1 + $0x28c] ss:$16 sps:$4 sm:$0xff]  }
  0x1d   :  { %v7624_v20 = vld [vmem:[%s11392_s1 + $0x280] ss:$16 sps:$4 sm:$0xff]   ;;  %v7627_v21 = vld [vmem:[%s11392_s1 + $0x288] ss:$16 sps:$4 sm:$0xff]   ;;  %v7632_v22 = vld [vmem:[%s11392_s1 + $0x2a4] ss:$16 sps:$4 sm:$0xff]  }
  0x1e   :  { %v7635_v23 = vld [vmem:[%s11392_s1 + $0x2ac] ss:$16 sps:$4 sm:$0xff]   ;;  %v7630_v24 = vld [vmem:[%s11392_s1 + $0x2a0] ss:$16 sps:$4 sm:$0xff]   ;;  %v7633_v25 = vld [vmem:[%s11392_s1 + $0x2a8] ss:$16 sps:$4 sm:$0xff]  }
  0x1f   :  { %5010 = vmatpush1.bf16.msra.mxu0 %v7547_v30  ;;  %5569 = vmatpush1.bf16.msra.mxu1 %v7548_v31  ;;  %v7638_v26 = vld [vmem:[%s11392_s1 + $0x2c4] ss:$16 sps:$4 sm:$0xff]   ;;  %v7641_v27 = vld [vmem:[%s11392_s1 + $0x2cc] ss:$16 sps:$4 sm:$0xff]   ;;  %v7636_v28 = vld [vmem:[%s11392_s1 + $0x2c0] ss:$16 sps:$4 sm:$0xff]  }
  0x20   :  { %5011 = vmatprep.subr.bf16.mxu0 %v7549_v32  ;;  %5570 = vmatprep.subr.bf16.mxu1 %v7551_v33  ;;  %v7639_v29 = vld [vmem:[%s11392_s1 + $0x2c8] ss:$16 sps:$4 sm:$0xff]   ;;  %v7698_v30 = vld [vmem:[%s11393_s0 + $0xc] ss:$100 sps:$4 sm:$0xff]   ;;  %v7644_v31 = vld [vmem:[%s11392_s1 + $0x2e4] ss:$16 sps:$4 sm:$0xff]  }
  0x21   :  { %v7647_v32 = vld [vmem:[%s11392_s1 + $0x2ec] ss:$16 sps:$4 sm:$0xff]   ;;  %v7642_v33 = vld [vmem:[%s11392_s1 + $0x2e0] ss:$16 sps:$4 sm:$0xff]  }
  0x22   :  { %v7671_v48 = vld [vmem:[%s11392_s1 + $0x36c] ss:$16 sps:$4 sm:$0xff]  }
  0x23   :  { %5012 = vmatpush1.bf16.msra.mxu0 %v7553_v34  ;;  %5571 = vmatpush1.bf16.msra.mxu1 %v7554_v35  ;;  %v7645_v34 = vld [vmem:[%s11392_s1 + $0x2e8] ss:$16 sps:$4 sm:$0xff]   ;;  %v7650_v35 = vld [vmem:[%s11392_s1 + $0x304] ss:$16 sps:$4 sm:$0xff]  }
  0x24   :  { %5013 = vmatprep.subr.bf16.mxu0 %v7555_v36  ;;  %5572 = vmatprep.subr.bf16.mxu1 %v7557_v37  ;;  %v7653_v36 = vld [vmem:[%s11392_s1 + $0x30c] ss:$16 sps:$4 sm:$0xff]   ;;  %v7648_v37 = vld [vmem:[%s11392_s1 + $0x300] ss:$16 sps:$4 sm:$0xff]  }
  0x27   :  { %5014 = vmatpush1.bf16.msra.mxu0 %v7559_v38  ;;  %5573 = vmatpush1.bf16.msra.mxu1 %v7560_v39  ;;  %v7651_v38 = vld [vmem:[%s11392_s1 + $0x308] ss:$16 sps:$4 sm:$0xff]   ;;  %v7656_v39 = vld [vmem:[%s11392_s1 + $0x324] ss:$16 sps:$4 sm:$0xff]  }
  0x28   :  { %5015 = vmatprep.subr.bf16.mxu0 %v7561_v40  ;;  %5574 = vmatprep.subr.bf16.mxu1 %v7563_v41  ;;  %v7659_v40 = vld [vmem:[%s11392_s1 + $0x32c] ss:$16 sps:$4 sm:$0xff]   ;;  %v7654_v41 = vld [vmem:[%s11392_s1 + $0x320] ss:$16 sps:$4 sm:$0xff]  }
  0x2b   :  { %5016 = vmatpush1.bf16.msra.mxu0 %v7565_v42  ;;  %5575 = vmatpush1.bf16.msra.mxu1 %v7566_v43  ;;  %v7657_v42 = vld [vmem:[%s11392_s1 + $0x328] ss:$16 sps:$4 sm:$0xff]   ;;  %v7662_v43 = vld [vmem:[%s11392_s1 + $0x344] ss:$16 sps:$4 sm:$0xff]  }
  0x2c   :  { %5017 = vmatprep.subr.bf16.mxu0 %v7567_v44  ;;  %5576 = vmatprep.subr.bf16.mxu1 %v7569_v45  ;;  %v7665_v44 = vld [vmem:[%s11392_s1 + $0x34c] ss:$16 sps:$4 sm:$0xff]   ;;  %v7660_v45 = vld [vmem:[%s11392_s1 + $0x340] ss:$16 sps:$4 sm:$0xff]  }
  0x2f   :  { %5018 = vmatpush1.bf16.msra.mxu0 %v7571_v46  ;;  %5577 = vmatpush1.bf16.msra.mxu1 %v7572_v47  ;;  %v7663_v46 = vld [vmem:[%s11392_s1 + $0x348] ss:$16 sps:$4 sm:$0xff]   ;;  %v7668_v47 = vld [vmem:[%s11392_s1 + $0x364] ss:$16 sps:$4 sm:$0xff]  }
  0x30   :  { %5019 = vmatprep.subr.bf16.mxu0 %v7573_v49  ;;  %5578 = vmatprep.subr.bf16.mxu1 %v7575_v50  ;;  %v7666_v49 = vld [vmem:[%s11392_s1 + $0x360] ss:$16 sps:$4 sm:$0xff]   ;;  %v7669_v50 = vld [vmem:[%s11392_s1 + $0x368] ss:$16 sps:$4 sm:$0xff]  }
  0x33   :  { %5020 = vmatpush1.bf16.msra.mxu0 %v7577_v51  ;;  %5579 = vmatpush1.bf16.msra.mxu1 %v7578_v52  ;;  %v7674_v51 = vld [vmem:[%s11392_s1 + $0x384] ss:$16 sps:$4 sm:$0xff]   ;;  %v7677_v52 = vld [vmem:[%s11392_s1 + $0x38c] ss:$16 sps:$4 sm:$0xff]  }
  0x34   :  { %5021 = vmatprep.subr.bf16.mxu0 %v7579_v53  ;;  %5580 = vmatprep.subr.bf16.mxu1 %v7581_v54  ;;  %v7672_v53 = vld [vmem:[%s11392_s1 + $0x380] ss:$16 sps:$4 sm:$0xff]   ;;  %v7675_v54 = vld [vmem:[%s11392_s1 + $0x388] ss:$16 sps:$4 sm:$0xff]  }
  0x37   :  { %5022 = vmatpush1.bf16.msra.mxu0 %v7583_v55  ;;  %5581 = vmatpush1.bf16.msra.mxu1 %v7584_v56  ;;  %v7680_v55 = vld [vmem:[%s11392_s1 + $0x3a4] ss:$16 sps:$4 sm:$0xff]   ;;  %v7683_v56 = vld [vmem:[%s11392_s1 + $0x3ac] ss:$16 sps:$4 sm:$0xff]  }
  0x38   :  { %5023 = vmatprep.subr.bf16.mxu0 %v7585_v57  ;;  %5582 = vmatprep.subr.bf16.mxu1 %v7587_v58  ;;  %v7678_v57 = vld [vmem:[%s11392_s1 + $0x3a0] ss:$16 sps:$4 sm:$0xff]   ;;  %v7681_v58 = vld [vmem:[%s11392_s1 + $0x3a8] ss:$16 sps:$4 sm:$0xff]  }
  0x3b   :  { %5024 = vmatpush1.bf16.msra.mxu0 %v7589_v59  ;;  %5583 = vmatpush1.bf16.msra.mxu1 %v7590_v60  ;;  %v7686_v59 = vld [vmem:[%s11392_s1 + $0x3c4] ss:$16 sps:$4 sm:$0xff]   ;;  %v7689_v60 = vld [vmem:[%s11392_s1 + $0x3cc] ss:$16 sps:$4 sm:$0xff]  }
  0x3c   :  { %5025 = vmatprep.subr.bf16.mxu0 %v7591_v61  ;;  %5584 = vmatprep.subr.bf16.mxu1 %v7593_v62  ;;  %v7684_v61 = vld [vmem:[%s11392_s1 + $0x3c0] ss:$16 sps:$4 sm:$0xff]   ;;  %v7687_v62 = vld [vmem:[%s11392_s1 + $0x3c8] ss:$16 sps:$4 sm:$0xff]  }
  0x3f   :  { %5026 = vmatpush1.bf16.msra.mxu0 %v7595_v63  ;;  %5585 = vmatpush1.bf16.msra.mxu1 %v7596_v0  ;;  %v7692_v63 = vld [vmem:[%s11392_s1 + $0x3e4] ss:$16 sps:$4 sm:$0xff]   ;;  %v7695_v0 = vld [vmem:[%s11392_s1 + $0x3ec] ss:$16 sps:$4 sm:$0xff]  }
  0x40   :  { %5038 = vmatprep.subr.bf16.mxu0 %v7602_v1  ;;  %5597 = vmatprep.subr.bf16.mxu1 %v7605_v2  ;;  %v7690_v1 = vld [vmem:[%s11392_s1 + $0x3e0] ss:$16 sps:$4 sm:$0xff]   ;;  %v7693_v2 = vld [vmem:[%s11392_s1 + $0x3e8] ss:$16 sps:$4 sm:$0xff]  }
  0x42   :  { %5028 = vmatmul.mubr.bf16.vlgmr.msra.gmra.mrb[0].mxu0 %v7597_v3  ;;  %5587 = vmatmul.mubr.bf16.vlgmr.msra.gmra.mrb[0].mxu1 %v7597_v3  ;;  %v7701_v3 = vld [vmem:[%s11392_s1 + $0x404] ss:$16 sps:$4 sm:$0xff]  }
  0x43   :  { %5039 = vmatpush1.bf16.msra.mxu0 %v7600_v4  ;;  %5598 = vmatpush1.bf16.msra.mxu1 %v7603_v5  ;;  %v7704_v4 = vld [vmem:[%s11392_s1 + $0x40c] ss:$16 sps:$4 sm:$0xff]  }
  0x44   :  { %5040 = vmatprep.subr.bf16.mxu0 %v7608_v6  ;;  %5599 = vmatprep.subr.bf16.mxu1 %v7611_v7  ;;  %v7696_v5 = vld [vmem:[%s11393_s0 + $0x8] ss:$100 sps:$4 sm:$0xff]   ;;  %v7699_v6 = vld [vmem:[%s11392_s1 + $0x400] ss:$16 sps:$4 sm:$0xff]  }
  0x45   :  { %5070 = vmatprep.mubr.bf16.mxu0 %v7698_v30  ;;  %5629 = vmatprep.mubr.bf16.mxu1 %v7698_v30  ;;  %v7702_v7 = vld [vmem:[%s11392_s1 + $0x408] ss:$16 sps:$4 sm:$0xff]   ;;  %v7740_v30 = vld [vmem:[%s11392_s1 + $0x4cc] ss:$16 sps:$4 sm:$0xff]  }
  0x47   :  { %5041 = vmatpush1.bf16.msra.mxu0 %v7606_v8  ;;  %5600 = vmatpush1.bf16.msra.mxu1 %v7609_v9  ;;  %v7707_v8 = vld [vmem:[%s11392_s1 + $0x424] ss:$16 sps:$4 sm:$0xff]   ;;  %v7710_v9 = vld [vmem:[%s11392_s1 + $0x42c] ss:$16 sps:$4 sm:$0xff]  }
  0x48   :  { %5042 = vmatprep.subr.bf16.mxu0 %v7614_v10  ;;  %5601 = vmatprep.subr.bf16.mxu1 %v7617_v11  ;;  %v7705_v10 = vld [vmem:[%s11392_s1 + $0x420] ss:$16 sps:$4 sm:$0xff]   ;;  %v7708_v11 = vld [vmem:[%s11392_s1 + $0x428] ss:$16 sps:$4 sm:$0xff]  }
  0x4b   :  { %5043 = vmatpush1.bf16.msra.mxu0 %v7612_v12  ;;  %5602 = vmatpush1.bf16.msra.mxu1 %v7615_v13  ;;  %v7797_v12 = vld [vmem:[%s11393_s0 + $0x14] ss:$100 sps:$4 sm:$0xff]  }
  0x4c   :  { %5044 = vmatprep.subr.bf16.mxu0 %v7620_v14  ;;  %5603 = vmatprep.subr.bf16.mxu1 %v7623_v15  ;;  %v7713_v13 = vld [vmem:[%s11392_s1 + $0x444] ss:$16 sps:$4 sm:$0xff]   ;;  %v7716_v14 = vld [vmem:[%s11392_s1 + $0x44c] ss:$16 sps:$4 sm:$0xff]   ;;  %v7711_v15 = vld [vmem:[%s11392_s1 + $0x440] ss:$16 sps:$4 sm:$0xff]  }
  0x4f   :  { %5045 = vmatpush1.bf16.msra.mxu0 %v7618_v16  ;;  %5604 = vmatpush1.bf16.msra.mxu1 %v7621_v17  ;;  %v7714_v16 = vld [vmem:[%s11392_s1 + $0x448] ss:$16 sps:$4 sm:$0xff]   ;;  %v7719_v17 = vld [vmem:[%s11392_s1 + $0x464] ss:$16 sps:$4 sm:$0xff]  }
  0x50   :  { %5046 = vmatprep.subr.bf16.mxu0 %v7626_v18  ;;  %5605 = vmatprep.subr.bf16.mxu1 %v7629_v19  ;;  %v7722_v18 = vld [vmem:[%s11392_s1 + $0x46c] ss:$16 sps:$4 sm:$0xff]   ;;  %v7717_v19 = vld [vmem:[%s11392_s1 + $0x460] ss:$16 sps:$4 sm:$0xff]  }
  0x53   :  { %5047 = vmatpush1.bf16.msra.mxu0 %v7624_v20  ;;  %5606 = vmatpush1.bf16.msra.mxu1 %v7627_v21  ;;  %v7720_v20 = vld [vmem:[%s11392_s1 + $0x468] ss:$16 sps:$4 sm:$0xff]   ;;  %v7725_v21 = vld [vmem:[%s11392_s1 + $0x484] ss:$16 sps:$4 sm:$0xff]  }
  0x54   :  { %5048 = vmatprep.subr.bf16.mxu0 %v7632_v22  ;;  %5607 = vmatprep.subr.bf16.mxu1 %v7635_v23  ;;  %v7728_v22 = vld [vmem:[%s11392_s1 + $0x48c] ss:$16 sps:$4 sm:$0xff]   ;;  %v7723_v23 = vld [vmem:[%s11392_s1 + $0x480] ss:$16 sps:$4 sm:$0xff]  }
  0x57   :  { %5049 = vmatpush1.bf16.msra.mxu0 %v7630_v24  ;;  %5608 = vmatpush1.bf16.msra.mxu1 %v7633_v25  ;;  %v7726_v24 = vld [vmem:[%s11392_s1 + $0x488] ss:$16 sps:$4 sm:$0xff]   ;;  %v7731_v25 = vld [vmem:[%s11392_s1 + $0x4a4] ss:$16 sps:$4 sm:$0xff]  }
  0x58   :  { %5050 = vmatprep.subr.bf16.mxu0 %v7638_v26  ;;  %5609 = vmatprep.subr.bf16.mxu1 %v7641_v27  ;;  %v7734_v26 = vld [vmem:[%s11392_s1 + $0x4ac] ss:$16 sps:$4 sm:$0xff]   ;;  %v7729_v27 = vld [vmem:[%s11392_s1 + $0x4a0] ss:$16 sps:$4 sm:$0xff]  }
  0x5b   :  { %5051 = vmatpush1.bf16.msra.mxu0 %v7636_v28  ;;  %5610 = vmatpush1.bf16.msra.mxu1 %v7639_v29  ;;  %v7732_v28 = vld [vmem:[%s11392_s1 + $0x4a8] ss:$16 sps:$4 sm:$0xff]   ;;  %v7737_v29 = vld [vmem:[%s11392_s1 + $0x4c4] ss:$16 sps:$4 sm:$0xff]  }
  0x5c   :  { %5052 = vmatprep.subr.bf16.mxu0 %v7644_v31  ;;  %5611 = vmatprep.subr.bf16.mxu1 %v7647_v32  ;;  %v7735_v31 = vld [vmem:[%s11392_s1 + $0x4c0] ss:$16 sps:$4 sm:$0xff]   ;;  %v7738_v32 = vld [vmem:[%s11392_s1 + $0x4c8] ss:$16 sps:$4 sm:$0xff]  }
  0x5f   :  { %5053 = vmatpush1.bf16.msra.mxu0 %v7642_v33  ;;  %5612 = vmatpush1.bf16.msra.mxu1 %v7645_v34  ;;  %v7743_v33 = vld [vmem:[%s11392_s1 + $0x4e4] ss:$16 sps:$4 sm:$0xff]   ;;  %v7746_v34 = vld [vmem:[%s11392_s1 + $0x4ec] ss:$16 sps:$4 sm:$0xff]  }
  0x60   :  { %5054 = vmatprep.subr.bf16.mxu0 %v7650_v35  ;;  %5613 = vmatprep.subr.bf16.mxu1 %v7653_v36  ;;  %v7741_v35 = vld [vmem:[%s11392_s1 + $0x4e0] ss:$16 sps:$4 sm:$0xff]   ;;  %v7744_v36 = vld [vmem:[%s11392_s1 + $0x4e8] ss:$16 sps:$4 sm:$0xff]  }
  0x63   :  { %5055 = vmatpush1.bf16.msra.mxu0 %v7648_v37  ;;  %5614 = vmatpush1.bf16.msra.mxu1 %v7651_v38  ;;  %v7749_v37 = vld [vmem:[%s11392_s1 + $0x504] ss:$16 sps:$4 sm:$0xff]   ;;  %v7752_v38 = vld [vmem:[%s11392_s1 + $0x50c] ss:$16 sps:$4 sm:$0xff]  }
  0x64   :  { %5056 = vmatprep.subr.bf16.mxu0 %v7656_v39  ;;  %5615 = vmatprep.subr.bf16.mxu1 %v7659_v40  ;;  %v7747_v39 = vld [vmem:[%s11392_s1 + $0x500] ss:$16 sps:$4 sm:$0xff]   ;;  %v7750_v40 = vld [vmem:[%s11392_s1 + $0x508] ss:$16 sps:$4 sm:$0xff]  }
  0x67   :  { %5057 = vmatpush1.bf16.msra.mxu0 %v7654_v41  ;;  %5616 = vmatpush1.bf16.msra.mxu1 %v7657_v42  ;;  %v7755_v41 = vld [vmem:[%s11392_s1 + $0x524] ss:$16 sps:$4 sm:$0xff]   ;;  %v7758_v42 = vld [vmem:[%s11392_s1 + $0x52c] ss:$16 sps:$4 sm:$0xff]  }
  0x68   :  { %5058 = vmatprep.subr.bf16.mxu0 %v7662_v43  ;;  %5617 = vmatprep.subr.bf16.mxu1 %v7665_v44  ;;  %v7753_v43 = vld [vmem:[%s11392_s1 + $0x520] ss:$16 sps:$4 sm:$0xff]   ;;  %v7756_v44 = vld [vmem:[%s11392_s1 + $0x528] ss:$16 sps:$4 sm:$0xff]  }
  0x6b   :  { %5059 = vmatpush1.bf16.msra.mxu0 %v7660_v45  ;;  %5618 = vmatpush1.bf16.msra.mxu1 %v7663_v46  ;;  %v7761_v45 = vld [vmem:[%s11392_s1 + $0x544] ss:$16 sps:$4 sm:$0xff]   ;;  %v7764_v46 = vld [vmem:[%s11392_s1 + $0x54c] ss:$16 sps:$4 sm:$0xff]  }
  0x6c   :  { %5060 = vmatprep.subr.bf16.mxu0 %v7668_v47  ;;  %5619 = vmatprep.subr.bf16.mxu1 %v7671_v48  ;;  %v7759_v47 = vld [vmem:[%s11392_s1 + $0x540] ss:$16 sps:$4 sm:$0xff]   ;;  %v7762_v48 = vld [vmem:[%s11392_s1 + $0x548] ss:$16 sps:$4 sm:$0xff]  }
  0x6f   :  { %5061 = vmatpush1.bf16.msra.mxu0 %v7666_v49  ;;  %5620 = vmatpush1.bf16.msra.mxu1 %v7669_v50  ;;  %v7767_v49 = vld [vmem:[%s11392_s1 + $0x564] ss:$16 sps:$4 sm:$0xff]   ;;  %v7770_v50 = vld [vmem:[%s11392_s1 + $0x56c] ss:$16 sps:$4 sm:$0xff]  }
  0x70   :  { %5062 = vmatprep.subr.bf16.mxu0 %v7674_v51  ;;  %5621 = vmatprep.subr.bf16.mxu1 %v7677_v52  ;;  %v7765_v51 = vld [vmem:[%s11392_s1 + $0x560] ss:$16 sps:$4 sm:$0xff]   ;;  %v7768_v52 = vld [vmem:[%s11392_s1 + $0x568] ss:$16 sps:$4 sm:$0xff]  }
  0x73   :  { %5063 = vmatpush1.bf16.msra.mxu0 %v7672_v53  ;;  %5622 = vmatpush1.bf16.msra.mxu1 %v7675_v54  ;;  %v7773_v53 = vld [vmem:[%s11392_s1 + $0x584] ss:$16 sps:$4 sm:$0xff]   ;;  %v7776_v54 = vld [vmem:[%s11392_s1 + $0x58c] ss:$16 sps:$4 sm:$0xff]  }
  0x74   :  { %5064 = vmatprep.subr.bf16.mxu0 %v7680_v55  ;;  %5623 = vmatprep.subr.bf16.mxu1 %v7683_v56  ;;  %v7771_v55 = vld [vmem:[%s11392_s1 + $0x580] ss:$16 sps:$4 sm:$0xff]   ;;  %v7774_v56 = vld [vmem:[%s11392_s1 + $0x588] ss:$16 sps:$4 sm:$0xff]  }
  0x77   :  { %5065 = vmatpush1.bf16.msra.mxu0 %v7678_v57  ;;  %5624 = vmatpush1.bf16.msra.mxu1 %v7681_v58  ;;  %v7779_v57 = vld [vmem:[%s11392_s1 + $0x5a4] ss:$16 sps:$4 sm:$0xff]   ;;  %v7782_v58 = vld [vmem:[%s11392_s1 + $0x5ac] ss:$16 sps:$4 sm:$0xff]  }
  0x78   :  { %5066 = vmatprep.subr.bf16.mxu0 %v7686_v59  ;;  %5625 = vmatprep.subr.bf16.mxu1 %v7689_v60  ;;  %v7777_v59 = vld [vmem:[%s11392_s1 + $0x5a0] ss:$16 sps:$4 sm:$0xff]   ;;  %v7780_v60 = vld [vmem:[%s11392_s1 + $0x5a8] ss:$16 sps:$4 sm:$0xff]  }
  0x7b   :  { %5067 = vmatpush1.bf16.msra.mxu0 %v7684_v61  ;;  %5626 = vmatpush1.bf16.msra.mxu1 %v7687_v62  ;;  %v7785_v61 = vld [vmem:[%s11392_s1 + $0x5c4] ss:$16 sps:$4 sm:$0xff]   ;;  %v7788_v62 = vld [vmem:[%s11392_s1 + $0x5cc] ss:$16 sps:$4 sm:$0xff]  }
  0x7c   :  { %5068 = vmatprep.subr.bf16.mxu0 %v7692_v63  ;;  %5627 = vmatprep.subr.bf16.mxu1 %v7695_v0  ;;  %v7783_v63 = vld [vmem:[%s11392_s1 + $0x5c0] ss:$16 sps:$4 sm:$0xff]   ;;  %v7786_v0 = vld [vmem:[%s11392_s1 + $0x5c8] ss:$16 sps:$4 sm:$0xff]  }
  0x7f   :  { %5069 = vmatpush1.bf16.msra.mxu0 %v7690_v1  ;;  %5628 = vmatpush1.bf16.msra.mxu1 %v7693_v2  ;;  %v7791_v1 = vld [vmem:[%s11392_s1 + $0x5e4] ss:$16 sps:$4 sm:$0xff]   ;;  %v7794_v2 = vld [vmem:[%s11392_s1 + $0x5ec] ss:$16 sps:$4 sm:$0xff]  }
  0x80   :  { %5081 = vmatprep.subr.bf16.mxu0 %v7701_v3  ;;  %5640 = vmatprep.subr.bf16.mxu1 %v7704_v4  ;;  %v7789_v3 = vld [vmem:[%s11392_s1 + $0x5e0] ss:$16 sps:$4 sm:$0xff]   ;;  %v7792_v4 = vld [vmem:[%s11392_s1 + $0x5e8] ss:$16 sps:$4 sm:$0xff]  }
  0x82   :  { %5071 = vmatmul.mubr.bf16.vlgmr.msra.gmra.mrb[0].mxu0 %v7696_v5  ;;  %5630 = vmatmul.mubr.bf16.vlgmr.msra.gmra.mrb[0].mxu1 %v7696_v5  ;;  %v7800_v5 = vld [vmem:[%s11392_s1 + $0x604] ss:$16 sps:$4 sm:$0xff]  }
  0x83   :  { %5082 = vmatpush1.bf16.msra.mxu0 %v7699_v6  ;;  %5641 = vmatpush1.bf16.msra.mxu1 %v7702_v7  ;;  %v7803_v6 = vld [vmem:[%s11392_s1 + $0x60c] ss:$16 sps:$4 sm:$0xff]   ;;  %v7795_v7 = vld [vmem:[%s11393_s0 + $0x10] ss:$100 sps:$4 sm:$0xff]  }
  0x84   :  { %5083 = vmatprep.subr.bf16.mxu0 %v7707_v8  ;;  %5642 = vmatprep.subr.bf16.mxu1 %v7710_v9  ;;  %v7798_v8 = vld [vmem:[%s11392_s1 + $0x600] ss:$16 sps:$4 sm:$0xff]   ;;  %v7801_v9 = vld [vmem:[%s11392_s1 + $0x608] ss:$16 sps:$4 sm:$0xff]  }
  0x85   :  { %5113 = vmatprep.mubr.bf16.mxu0 %v7797_v12  ;;  %5672 = vmatprep.mubr.bf16.mxu1 %v7797_v12  ;;  %v7896_v12 = vld [vmem:[%s11393_s0 + $0x1c] ss:$100 sps:$4 sm:$0xff]  }
  0x87   :  { %5084 = vmatpush1.bf16.msra.mxu0 %v7705_v10  ;;  %5643 = vmatpush1.bf16.msra.mxu1 %v7708_v11  ;;  %v7806_v10 = vld [vmem:[%s11392_s1 + $0x624] ss:$16 sps:$4 sm:$0xff]   ;;  %v7809_v11 = vld [vmem:[%s11392_s1 + $0x62c] ss:$16 sps:$4 sm:$0xff]  }
  0x88   :  { %5085 = vmatprep.subr.bf16.mxu0 %v7713_v13  ;;  %5644 = vmatprep.subr.bf16.mxu1 %v7716_v14  ;;  %v7804_v13 = vld [vmem:[%s11392_s1 + $0x620] ss:$16 sps:$4 sm:$0xff]   ;;  %v7807_v14 = vld [vmem:[%s11392_s1 + $0x628] ss:$16 sps:$4 sm:$0xff]  }
  0x8b   :  { %5086 = vmatpush1.bf16.msra.mxu0 %v7711_v15  ;;  %5645 = vmatpush1.bf16.msra.mxu1 %v7714_v16  ;;  %v7812_v15 = vld [vmem:[%s11392_s1 + $0x644] ss:$16 sps:$4 sm:$0xff]   ;;  %v7815_v16 = vld [vmem:[%s11392_s1 + $0x64c] ss:$16 sps:$4 sm:$0xff]  }
  0x8c   :  { %5087 = vmatprep.subr.bf16.mxu0 %v7719_v17  ;;  %5646 = vmatprep.subr.bf16.mxu1 %v7722_v18  ;;  %v7810_v17 = vld [vmem:[%s11392_s1 + $0x640] ss:$16 sps:$4 sm:$0xff]   ;;  %v7813_v18 = vld [vmem:[%s11392_s1 + $0x648] ss:$16 sps:$4 sm:$0xff]  }
  0x8f   :  { %5088 = vmatpush1.bf16.msra.mxu0 %v7717_v19  ;;  %5647 = vmatpush1.bf16.msra.mxu1 %v7720_v20  ;;  %v7818_v19 = vld [vmem:[%s11392_s1 + $0x664] ss:$16 sps:$4 sm:$0xff]   ;;  %v7821_v20 = vld [vmem:[%s11392_s1 + $0x66c] ss:$16 sps:$4 sm:$0xff]  }
  0x90   :  { %5089 = vmatprep.subr.bf16.mxu0 %v7725_v21  ;;  %5648 = vmatprep.subr.bf16.mxu1 %v7728_v22  ;;  %v7816_v21 = vld [vmem:[%s11392_s1 + $0x660] ss:$16 sps:$4 sm:$0xff]   ;;  %v7819_v22 = vld [vmem:[%s11392_s1 + $0x668] ss:$16 sps:$4 sm:$0xff]  }
  0x93   :  { %5090 = vmatpush1.bf16.msra.mxu0 %v7723_v23  ;;  %5649 = vmatpush1.bf16.msra.mxu1 %v7726_v24  ;;  %v7824_v23 = vld [vmem:[%s11392_s1 + $0x684] ss:$16 sps:$4 sm:$0xff]   ;;  %v7827_v24 = vld [vmem:[%s11392_s1 + $0x68c] ss:$16 sps:$4 sm:$0xff]  }
  0x94   :  { %5091 = vmatprep.subr.bf16.mxu0 %v7731_v25  ;;  %5650 = vmatprep.subr.bf16.mxu1 %v7734_v26  ;;  %v7822_v25 = vld [vmem:[%s11392_s1 + $0x680] ss:$16 sps:$4 sm:$0xff]   ;;  %v7825_v26 = vld [vmem:[%s11392_s1 + $0x688] ss:$16 sps:$4 sm:$0xff]  }
  0x97   :  { %5092 = vmatpush1.bf16.msra.mxu0 %v7729_v27  ;;  %5651 = vmatpush1.bf16.msra.mxu1 %v7732_v28  ;;  %v7830_v27 = vld [vmem:[%s11392_s1 + $0x6a4] ss:$16 sps:$4 sm:$0xff]   ;;  %v7833_v28 = vld [vmem:[%s11392_s1 + $0x6ac] ss:$16 sps:$4 sm:$0xff]  }
  0x98   :  { %5093 = vmatprep.subr.bf16.mxu0 %v7737_v29  ;;  %5652 = vmatprep.subr.bf16.mxu1 %v7740_v30  ;;  %v7828_v29 = vld [vmem:[%s11392_s1 + $0x6a0] ss:$16 sps:$4 sm:$0xff]   ;;  %v7831_v30 = vld [vmem:[%s11392_s1 + $0x6a8] ss:$16 sps:$4 sm:$0xff]  }
  0x9b   :  { %5094 = vmatpush1.bf16.msra.mxu0 %v7735_v31  ;;  %5653 = vmatpush1.bf16.msra.mxu1 %v7738_v32  ;;  %v7836_v31 = vld [vmem:[%s11392_s1 + $0x6c4] ss:$16 sps:$4 sm:$0xff]   ;;  %v7839_v32 = vld [vmem:[%s11392_s1 + $0x6cc] ss:$16 sps:$4 sm:$0xff]  }
  0x9c   :  { %5095 = vmatprep.subr.bf16.mxu0 %v7743_v33  ;;  %5654 = vmatprep.subr.bf16.mxu1 %v7746_v34  ;;  %v7834_v33 = vld [vmem:[%s11392_s1 + $0x6c0] ss:$16 sps:$4 sm:$0xff]   ;;  %v7837_v34 = vld [vmem:[%s11392_s1 + $0x6c8] ss:$16 sps:$4 sm:$0xff]  }
  0x9f   :  { %5096 = vmatpush1.bf16.msra.mxu0 %v7741_v35  ;;  %5655 = vmatpush1.bf16.msra.mxu1 %v7744_v36  ;;  %v7842_v35 = vld [vmem:[%s11392_s1 + $0x6e4] ss:$16 sps:$4 sm:$0xff]   ;;  %v7845_v36 = vld [vmem:[%s11392_s1 + $0x6ec] ss:$16 sps:$4 sm:$0xff]  }
  0xa0   :  { %5097 = vmatprep.subr.bf16.mxu0 %v7749_v37  ;;  %5656 = vmatprep.subr.bf16.mxu1 %v7752_v38  ;;  %v7840_v37 = vld [vmem:[%s11392_s1 + $0x6e0] ss:$16 sps:$4 sm:$0xff]   ;;  %v7843_v38 = vld [vmem:[%s11392_s1 + $0x6e8] ss:$16 sps:$4 sm:$0xff]  }
  0xa3   :  { %5098 = vmatpush1.bf16.msra.mxu0 %v7747_v39  ;;  %5657 = vmatpush1.bf16.msra.mxu1 %v7750_v40  ;;  %v7848_v39 = vld [vmem:[%s11392_s1 + $0x704] ss:$16 sps:$4 sm:$0xff]   ;;  %v7851_v40 = vld [vmem:[%s11392_s1 + $0x70c] ss:$16 sps:$4 sm:$0xff]  }
  0xa4   :  { %5099 = vmatprep.subr.bf16.mxu0 %v7755_v41  ;;  %5658 = vmatprep.subr.bf16.mxu1 %v7758_v42  ;;  %v7846_v41 = vld [vmem:[%s11392_s1 + $0x700] ss:$16 sps:$4 sm:$0xff]   ;;  %v7849_v42 = vld [vmem:[%s11392_s1 + $0x708] ss:$16 sps:$4 sm:$0xff]  }
  0xa7   :  { %5100 = vmatpush1.bf16.msra.mxu0 %v7753_v43  ;;  %5659 = vmatpush1.bf16.msra.mxu1 %v7756_v44  ;;  %v7854_v43 = vld [vmem:[%s11392_s1 + $0x724] ss:$16 sps:$4 sm:$0xff]   ;;  %v7857_v44 = vld [vmem:[%s11392_s1 + $0x72c] ss:$16 sps:$4 sm:$0xff]  }
  0xa8   :  { %5101 = vmatprep.subr.bf16.mxu0 %v7761_v45  ;;  %5660 = vmatprep.subr.bf16.mxu1 %v7764_v46  ;;  %v7852_v45 = vld [vmem:[%s11392_s1 + $0x720] ss:$16 sps:$4 sm:$0xff]   ;;  %v7855_v46 = vld [vmem:[%s11392_s1 + $0x728] ss:$16 sps:$4 sm:$0xff]  }
  0xab   :  { %5102 = vmatpush1.bf16.msra.mxu0 %v7759_v47  ;;  %5661 = vmatpush1.bf16.msra.mxu1 %v7762_v48  ;;  %v7860_v47 = vld [vmem:[%s11392_s1 + $0x744] ss:$16 sps:$4 sm:$0xff]   ;;  %v7863_v48 = vld [vmem:[%s11392_s1 + $0x74c] ss:$16 sps:$4 sm:$0xff]  }
  0xac   :  { %5103 = vmatprep.subr.bf16.mxu0 %v7767_v49  ;;  %5662 = vmatprep.subr.bf16.mxu1 %v7770_v50  ;;  %v7858_v49 = vld [vmem:[%s11392_s1 + $0x740] ss:$16 sps:$4 sm:$0xff]   ;;  %v7861_v50 = vld [vmem:[%s11392_s1 + $0x748] ss:$16 sps:$4 sm:$0xff]  }
  0xaf   :  { %5104 = vmatpush1.bf16.msra.mxu0 %v7765_v51  ;;  %5663 = vmatpush1.bf16.msra.mxu1 %v7768_v52  ;;  %v7866_v51 = vld [vmem:[%s11392_s1 + $0x764] ss:$16 sps:$4 sm:$0xff]   ;;  %v7869_v52 = vld [vmem:[%s11392_s1 + $0x76c] ss:$16 sps:$4 sm:$0xff]  }
  0xb0   :  { %5105 = vmatprep.subr.bf16.mxu0 %v7773_v53  ;;  %5664 = vmatprep.subr.bf16.mxu1 %v7776_v54  ;;  %v7864_v53 = vld [vmem:[%s11392_s1 + $0x760] ss:$16 sps:$4 sm:$0xff]   ;;  %v7867_v54 = vld [vmem:[%s11392_s1 + $0x768] ss:$16 sps:$4 sm:$0xff]  }
  0xb3   :  { %5106 = vmatpush1.bf16.msra.mxu0 %v7771_v55  ;;  %5665 = vmatpush1.bf16.msra.mxu1 %v7774_v56  ;;  %v7872_v55 = vld [vmem:[%s11392_s1 + $0x784] ss:$16 sps:$4 sm:$0xff]   ;;  %v7875_v56 = vld [vmem:[%s11392_s1 + $0x78c] ss:$16 sps:$4 sm:$0xff]  }
  0xb4   :  { %5107 = vmatprep.subr.bf16.mxu0 %v7779_v57  ;;  %5666 = vmatprep.subr.bf16.mxu1 %v7782_v58  ;;  %v7870_v57 = vld [vmem:[%s11392_s1 + $0x780] ss:$16 sps:$4 sm:$0xff]   ;;  %v7873_v58 = vld [vmem:[%s11392_s1 + $0x788] ss:$16 sps:$4 sm:$0xff]  }
  0xb7   :  { %5108 = vmatpush1.bf16.msra.mxu0 %v7777_v59  ;;  %5667 = vmatpush1.bf16.msra.mxu1 %v7780_v60  ;;  %v7878_v59 = vld [vmem:[%s11392_s1 + $0x7a4] ss:$16 sps:$4 sm:$0xff]   ;;  %v7881_v60 = vld [vmem:[%s11392_s1 + $0x7ac] ss:$16 sps:$4 sm:$0xff]  }
  0xb8   :  { %5109 = vmatprep.subr.bf16.mxu0 %v7785_v61  ;;  %5668 = vmatprep.subr.bf16.mxu1 %v7788_v62  ;;  %v7876_v61 = vld [vmem:[%s11392_s1 + $0x7a0] ss:$16 sps:$4 sm:$0xff]   ;;  %v7879_v62 = vld [vmem:[%s11392_s1 + $0x7a8] ss:$16 sps:$4 sm:$0xff]  }
  0xbb   :  { %5110 = vmatpush1.bf16.msra.mxu0 %v7783_v63  ;;  %5669 = vmatpush1.bf16.msra.mxu1 %v7786_v0  ;;  %v7884_v63 = vld [vmem:[%s11392_s1 + $0x7c4] ss:$16 sps:$4 sm:$0xff]   ;;  %v7887_v0 = vld [vmem:[%s11392_s1 + $0x7cc] ss:$16 sps:$4 sm:$0xff]  }
  0xbc   :  { %5111 = vmatprep.subr.bf16.mxu0 %v7791_v1  ;;  %5670 = vmatprep.subr.bf16.mxu1 %v7794_v2  ;;  %v7882_v1 = vld [vmem:[%s11392_s1 + $0x7c0] ss:$16 sps:$4 sm:$0xff]   ;;  %v7885_v2 = vld [vmem:[%s11392_s1 + $0x7c8] ss:$16 sps:$4 sm:$0xff]  }
  0xbf   :  { %5112 = vmatpush1.bf16.msra.mxu0 %v7789_v3  ;;  %5671 = vmatpush1.bf16.msra.mxu1 %v7792_v4  ;;  %v7890_v3 = vld [vmem:[%s11392_s1 + $0x7e4] ss:$16 sps:$4 sm:$0xff]   ;;  %v7893_v4 = vld [vmem:[%s11392_s1 + $0x7ec] ss:$16 sps:$4 sm:$0xff]  }
  0xc0   :  { %5124 = vmatprep.subr.bf16.mxu0 %v7800_v5  ;;  %5683 = vmatprep.subr.bf16.mxu1 %v7803_v6  ;;  %v7888_v5 = vld [vmem:[%s11392_s1 + $0x7e0] ss:$16 sps:$4 sm:$0xff]   ;;  %v7891_v6 = vld [vmem:[%s11392_s1 + $0x7e8] ss:$16 sps:$4 sm:$0xff]  }
  0xc2   :  { %5114 = vmatmul.mubr.bf16.vlgmr.msra.gmra.mrb[0].mxu0 %v7795_v7  ;;  %5673 = vmatmul.mubr.bf16.vlgmr.msra.gmra.mrb[0].mxu1 %v7795_v7  ;;  %v7899_v7 = vld [vmem:[%s11392_s1 + $0x804] ss:$16 sps:$4 sm:$0xff]  }
  0xc3   :  { %5125 = vmatpush1.bf16.msra.mxu0 %v7798_v8  ;;  %5684 = vmatpush1.bf16.msra.mxu1 %v7801_v9  ;;  %v7902_v8 = vld [vmem:[%s11392_s1 + $0x80c] ss:$16 sps:$4 sm:$0xff]  }
  0xc4   :  { %5126 = vmatprep.subr.bf16.mxu0 %v7806_v10  ;;  %5685 = vmatprep.subr.bf16.mxu1 %v7809_v11  ;;  %v7894_v9 = vld [vmem:[%s11393_s0 + $0x18] ss:$100 sps:$4 sm:$0xff]   ;;  %v7897_v10 = vld [vmem:[%s11392_s1 + $0x800] ss:$16 sps:$4 sm:$0xff]  }
  0xc5   :  { %5156 = vmatprep.mubr.bf16.mxu0 %v7896_v12  ;;  %5715 = vmatprep.mubr.bf16.mxu1 %v7896_v12  ;;  %v7900_v11 = vld [vmem:[%s11392_s1 + $0x808] ss:$16 sps:$4 sm:$0xff]   ;;  %v7905_v12 = vld [vmem:[%s11392_s1 + $0x824] ss:$16 sps:$4 sm:$0xff]  }
  0xc7   :  { %5127 = vmatpush1.bf16.msra.mxu0 %v7804_v13  ;;  %5686 = vmatpush1.bf16.msra.mxu1 %v7807_v14  ;;  %v7908_v13 = vld [vmem:[%s11392_s1 + $0x82c] ss:$16 sps:$4 sm:$0xff]   ;;  %v7995_v14 = vld [vmem:[%s11393_s0 + $0x24] ss:$100 sps:$4 sm:$0xff]  }
  0xc8   :  { %5128 = vmatprep.subr.bf16.mxu0 %v7812_v15  ;;  %5687 = vmatprep.subr.bf16.mxu1 %v7815_v16  ;;  %v7903_v15 = vld [vmem:[%s11392_s1 + $0x820] ss:$16 sps:$4 sm:$0xff]   ;;  %v7906_v16 = vld [vmem:[%s11392_s1 + $0x828] ss:$16 sps:$4 sm:$0xff]  }
  0xcb   :  { %5129 = vmatpush1.bf16.msra.mxu0 %v7810_v17  ;;  %5688 = vmatpush1.bf16.msra.mxu1 %v7813_v18  ;;  %v7911_v17 = vld [vmem:[%s11392_s1 + $0x844] ss:$16 sps:$4 sm:$0xff]   ;;  %v7914_v18 = vld [vmem:[%s11392_s1 + $0x84c] ss:$16 sps:$4 sm:$0xff]  }
  0xcc   :  { %5130 = vmatprep.subr.bf16.mxu0 %v7818_v19  ;;  %5689 = vmatprep.subr.bf16.mxu1 %v7821_v20  ;;  %v7909_v19 = vld [vmem:[%s11392_s1 + $0x840] ss:$16 sps:$4 sm:$0xff]   ;;  %v7912_v20 = vld [vmem:[%s11392_s1 + $0x848] ss:$16 sps:$4 sm:$0xff]  }
  0xcf   :  { %5131 = vmatpush1.bf16.msra.mxu0 %v7816_v21  ;;  %5690 = vmatpush1.bf16.msra.mxu1 %v7819_v22  ;;  %v7917_v21 = vld [vmem:[%s11392_s1 + $0x864] ss:$16 sps:$4 sm:$0xff]   ;;  %v7920_v22 = vld [vmem:[%s11392_s1 + $0x86c] ss:$16 sps:$4 sm:$0xff]  }
  0xd0   :  { %5132 = vmatprep.subr.bf16.mxu0 %v7824_v23  ;;  %5691 = vmatprep.subr.bf16.mxu1 %v7827_v24  ;;  %v7915_v23 = vld [vmem:[%s11392_s1 + $0x860] ss:$16 sps:$4 sm:$0xff]   ;;  %v7918_v24 = vld [vmem:[%s11392_s1 + $0x868] ss:$16 sps:$4 sm:$0xff]  }
  0xd3   :  { %5133 = vmatpush1.bf16.msra.mxu0 %v7822_v25  ;;  %5692 = vmatpush1.bf16.msra.mxu1 %v7825_v26  ;;  %v7923_v25 = vld [vmem:[%s11392_s1 + $0x884] ss:$16 sps:$4 sm:$0xff]   ;;  %v7926_v26 = vld [vmem:[%s11392_s1 + $0x88c] ss:$16 sps:$4 sm:$0xff]  }
  0xd4   :  { %5134 = vmatprep.subr.bf16.mxu0 %v7830_v27  ;;  %5693 = vmatprep.subr.bf16.mxu1 %v7833_v28  ;;  %v7921_v27 = vld [vmem:[%s11392_s1 + $0x880] ss:$16 sps:$4 sm:$0xff]   ;;  %v7924_v28 = vld [vmem:[%s11392_s1 + $0x888] ss:$16 sps:$4 sm:$0xff]  }
  0xd7   :  { %5135 = vmatpush1.bf16.msra.mxu0 %v7828_v29  ;;  %5694 = vmatpush1.bf16.msra.mxu1 %v7831_v30  ;;  %v7929_v29 = vld [vmem:[%s11392_s1 + $0x8a4] ss:$16 sps:$4 sm:$0xff]   ;;  %v7932_v30 = vld [vmem:[%s11392_s1 + $0x8ac] ss:$16 sps:$4 sm:$0xff]  }
  0xd8   :  { %5136 = vmatprep.subr.bf16.mxu0 %v7836_v31  ;;  %5695 = vmatprep.subr.bf16.mxu1 %v7839_v32  ;;  %v7927_v31 = vld [vmem:[%s11392_s1 + $0x8a0] ss:$16 sps:$4 sm:$0xff]   ;;  %v7930_v32 = vld [vmem:[%s11392_s1 + $0x8a8] ss:$16 sps:$4 sm:$0xff]  }
  0xdb   :  { %5137 = vmatpush1.bf16.msra.mxu0 %v7834_v33  ;;  %5696 = vmatpush1.bf16.msra.mxu1 %v7837_v34  ;;  %v7935_v33 = vld [vmem:[%s11392_s1 + $0x8c4] ss:$16 sps:$4 sm:$0xff]   ;;  %v7938_v34 = vld [vmem:[%s11392_s1 + $0x8cc] ss:$16 sps:$4 sm:$0xff]  }
  0xdc   :  { %5138 = vmatprep.subr.bf16.mxu0 %v7842_v35  ;;  %5697 = vmatprep.subr.bf16.mxu1 %v7845_v36  ;;  %v7933_v35 = vld [vmem:[%s11392_s1 + $0x8c0] ss:$16 sps:$4 sm:$0xff]   ;;  %v7936_v36 = vld [vmem:[%s11392_s1 + $0x8c8] ss:$16 sps:$4 sm:$0xff]  }
  0xdf   :  { %5139 = vmatpush1.bf16.msra.mxu0 %v7840_v37  ;;  %5698 = vmatpush1.bf16.msra.mxu1 %v7843_v38  ;;  %v7941_v37 = vld [vmem:[%s11392_s1 + $0x8e4] ss:$16 sps:$4 sm:$0xff]   ;;  %v7944_v38 = vld [vmem:[%s11392_s1 + $0x8ec] ss:$16 sps:$4 sm:$0xff]  }
  0xe0   :  { %5140 = vmatprep.subr.bf16.mxu0 %v7848_v39  ;;  %5699 = vmatprep.subr.bf16.mxu1 %v7851_v40  ;;  %v7939_v39 = vld [vmem:[%s11392_s1 + $0x8e0] ss:$16 sps:$4 sm:$0xff]   ;;  %v7942_v40 = vld [vmem:[%s11392_s1 + $0x8e8] ss:$16 sps:$4 sm:$0xff]  }
  0xe3   :  { %5141 = vmatpush1.bf16.msra.mxu0 %v7846_v41  ;;  %5700 = vmatpush1.bf16.msra.mxu1 %v7849_v42  ;;  %v7947_v41 = vld [vmem:[%s11392_s1 + $0x904] ss:$16 sps:$4 sm:$0xff]   ;;  %v7950_v42 = vld [vmem:[%s11392_s1 + $0x90c] ss:$16 sps:$4 sm:$0xff]  }
  0xe4   :  { %5142 = vmatprep.subr.bf16.mxu0 %v7854_v43  ;;  %5701 = vmatprep.subr.bf16.mxu1 %v7857_v44  ;;  %v7945_v43 = vld [vmem:[%s11392_s1 + $0x900] ss:$16 sps:$4 sm:$0xff]   ;;  %v7948_v44 = vld [vmem:[%s11392_s1 + $0x908] ss:$16 sps:$4 sm:$0xff]  }
  0xe7   :  { %5143 = vmatpush1.bf16.msra.mxu0 %v7852_v45  ;;  %5702 = vmatpush1.bf16.msra.mxu1 %v7855_v46  ;;  %v7953_v45 = vld [vmem:[%s11392_s1 + $0x924] ss:$16 sps:$4 sm:$0xff]   ;;  %v7956_v46 = vld [vmem:[%s11392_s1 + $0x92c] ss:$16 sps:$4 sm:$0xff]  }
  0xe8   :  { %5144 = vmatprep.subr.bf16.mxu0 %v7860_v47  ;;  %5703 = vmatprep.subr.bf16.mxu1 %v7863_v48  ;;  %v7951_v47 = vld [vmem:[%s11392_s1 + $0x920] ss:$16 sps:$4 sm:$0xff]   ;;  %v7954_v48 = vld [vmem:[%s11392_s1 + $0x928] ss:$16 sps:$4 sm:$0xff]  }
  0xeb   :  { %5145 = vmatpush1.bf16.msra.mxu0 %v7858_v49  ;;  %5704 = vmatpush1.bf16.msra.mxu1 %v7861_v50  ;;  %v7959_v49 = vld [vmem:[%s11392_s1 + $0x944] ss:$16 sps:$4 sm:$0xff]   ;;  %v7962_v50 = vld [vmem:[%s11392_s1 + $0x94c] ss:$16 sps:$4 sm:$0xff]  }
  0xec   :  { %5146 = vmatprep.subr.bf16.mxu0 %v7866_v51  ;;  %5705 = vmatprep.subr.bf16.mxu1 %v7869_v52  ;;  %v7957_v51 = vld [vmem:[%s11392_s1 + $0x940] ss:$16 sps:$4 sm:$0xff]   ;;  %v7960_v52 = vld [vmem:[%s11392_s1 + $0x948] ss:$16 sps:$4 sm:$0xff]  }
  0xef   :  { %5147 = vmatpush1.bf16.msra.mxu0 %v7864_v53  ;;  %5706 = vmatpush1.bf16.msra.mxu1 %v7867_v54  ;;  %v7965_v53 = vld [vmem:[%s11392_s1 + $0x964] ss:$16 sps:$4 sm:$0xff]   ;;  %v7968_v54 = vld [vmem:[%s11392_s1 + $0x96c] ss:$16 sps:$4 sm:$0xff]  }
  0xf0   :  { %5148 = vmatprep.subr.bf16.mxu0 %v7872_v55  ;;  %5707 = vmatprep.subr.bf16.mxu1 %v7875_v56  ;;  %v7963_v55 = vld [vmem:[%s11392_s1 + $0x960] ss:$16 sps:$4 sm:$0xff]   ;;  %v7966_v56 = vld [vmem:[%s11392_s1 + $0x968] ss:$16 sps:$4 sm:$0xff]  }
  0xf3   :  { %5149 = vmatpush1.bf16.msra.mxu0 %v7870_v57  ;;  %5708 = vmatpush1.bf16.msra.mxu1 %v7873_v58  ;;  %v7971_v57 = vld [vmem:[%s11392_s1 + $0x984] ss:$16 sps:$4 sm:$0xff]   ;;  %v7974_v58 = vld [vmem:[%s11392_s1 + $0x98c] ss:$16 sps:$4 sm:$0xff]  }
  0xf4   :  { %5150 = vmatprep.subr.bf16.mxu0 %v7878_v59  ;;  %5709 = vmatprep.subr.bf16.mxu1 %v7881_v60  ;;  %v7969_v59 = vld [vmem:[%s11392_s1 + $0x980] ss:$16 sps:$4 sm:$0xff]   ;;  %v7972_v60 = vld [vmem:[%s11392_s1 + $0x988] ss:$16 sps:$4 sm:$0xff]  }
  0xf7   :  { %5151 = vmatpush1.bf16.msra.mxu0 %v7876_v61  ;;  %5710 = vmatpush1.bf16.msra.mxu1 %v7879_v62  ;;  %v7977_v61 = vld [vmem:[%s11392_s1 + $0x9a4] ss:$16 sps:$4 sm:$0xff]   ;;  %v7980_v62 = vld [vmem:[%s11392_s1 + $0x9ac] ss:$16 sps:$4 sm:$0xff]  }
  0xf8   :  { %5152 = vmatprep.subr.bf16.mxu0 %v7884_v63  ;;  %5711 = vmatprep.subr.bf16.mxu1 %v7887_v0  ;;  %v7975_v63 = vld [vmem:[%s11392_s1 + $0x9a0] ss:$16 sps:$4 sm:$0xff]   ;;  %v7978_v0 = vld [vmem:[%s11392_s1 + $0x9a8] ss:$16 sps:$4 sm:$0xff]  }
  0xfb   :  { %5153 = vmatpush1.bf16.msra.mxu0 %v7882_v1  ;;  %5712 = vmatpush1.bf16.msra.mxu1 %v7885_v2  ;;  %v7983_v1 = vld [vmem:[%s11392_s1 + $0x9c4] ss:$16 sps:$4 sm:$0xff]   ;;  %v7986_v2 = vld [vmem:[%s11392_s1 + $0x9cc] ss:$16 sps:$4 sm:$0xff]  }
  0xfc   :  { %5154 = vmatprep.subr.bf16.mxu0 %v7890_v3  ;;  %5713 = vmatprep.subr.bf16.mxu1 %v7893_v4  ;;  %v7981_v3 = vld [vmem:[%s11392_s1 + $0x9c0] ss:$16 sps:$4 sm:$0xff]   ;;  %v7984_v4 = vld [vmem:[%s11392_s1 + $0x9c8] ss:$16 sps:$4 sm:$0xff]  }
  0xff   :  { %5155 = vmatpush1.bf16.msra.mxu0 %v7888_v5  ;;  %5714 = vmatpush1.bf16.msra.mxu1 %v7891_v6  ;;  %v7989_v5 = vld [vmem:[%s11392_s1 + $0x9e4] ss:$16 sps:$4 sm:$0xff]   ;;  %v7992_v6 = vld [vmem:[%s11392_s1 + $0x9ec] ss:$16 sps:$4 sm:$0xff]  }
 0x100   :  { %5167 = vmatprep.subr.bf16.mxu0 %v7899_v7  ;;  %5726 = vmatprep.subr.bf16.mxu1 %v7902_v8  ;;  %v7987_v7 = vld [vmem:[%s11392_s1 + $0x9e0] ss:$16 sps:$4 sm:$0xff]   ;;  %v7990_v8 = vld [vmem:[%s11392_s1 + $0x9e8] ss:$16 sps:$4 sm:$0xff]  }
 0x102   :  { %5157 = vmatmul.mubr.bf16.vlgmr.msra.gmra.mrb[0].mxu0 %v7894_v9  ;;  %5716 = vmatmul.mubr.bf16.vlgmr.msra.gmra.mrb[0].mxu1 %v7894_v9  ;;  %v7993_v9 = vld [vmem:[%s11393_s0 + $0x20] ss:$100 sps:$4 sm:$0xff]  }
 0x103   :  { %5168 = vmatpush1.bf16.msra.mxu0 %v7897_v10  ;;  %5727 = vmatpush1.bf16.msra.mxu1 %v7900_v11  ;;  %v7998_v10 = vld [vmem:[%s11392_s1 + $0xa04] ss:$16 sps:$4 sm:$0xff]   ;;  %v8001_v11 = vld [vmem:[%s11392_s1 + $0xa0c] ss:$16 sps:$4 sm:$0xff]  }
 0x104   :  { %5169 = vmatprep.subr.bf16.mxu0 %v7905_v12  ;;  %5728 = vmatprep.subr.bf16.mxu1 %v7908_v13  ;;  %v7996_v12 = vld [vmem:[%s11392_s1 + $0xa00] ss:$16 sps:$4 sm:$0xff]   ;;  %v7999_v13 = vld [vmem:[%s11392_s1 + $0xa08] ss:$16 sps:$4 sm:$0xff]  }
 0x105   :  { %5199 = vmatprep.mubr.bf16.mxu0 %v7995_v14  ;;  %5758 = vmatprep.mubr.bf16.mxu1 %v7995_v14  ;;  %v8004_v14 = vld [vmem:[%s11392_s1 + $0xa24] ss:$16 sps:$4 sm:$0xff]  }
 0x107   :  { %5170 = vmatpush1.bf16.msra.mxu0 %v7903_v15  ;;  %5729 = vmatpush1.bf16.msra.mxu1 %v7906_v16  ;;  %v8007_v15 = vld [vmem:[%s11392_s1 + $0xa2c] ss:$16 sps:$4 sm:$0xff]  }
 0x108   :  { %5171 = vmatprep.subr.bf16.mxu0 %v7911_v17  ;;  %5730 = vmatprep.subr.bf16.mxu1 %v7914_v18  ;;  %v8094_v16 = vld [vmem:[%s11393_s0 + $0x2c] ss:$100 sps:$4 sm:$0xff]   ;;  %v8005_v18 = vld [vmem:[%s11392_s1 + $0xa28] ss:$16 sps:$4 sm:$0xff]  }
 0x109   :  { %v8002_v17 = vld [vmem:[%s11392_s1 + $0xa20] ss:$16 sps:$4 sm:$0xff]  }
 0x10b   :  { %5172 = vmatpush1.bf16.msra.mxu0 %v7909_v19  ;;  %5731 = vmatpush1.bf16.msra.mxu1 %v7912_v20  ;;  %v8010_v19 = vld [vmem:[%s11392_s1 + $0xa44] ss:$16 sps:$4 sm:$0xff]   ;;  %v8013_v20 = vld [vmem:[%s11392_s1 + $0xa4c] ss:$16 sps:$4 sm:$0xff]  }
 0x10c   :  { %5173 = vmatprep.subr.bf16.mxu0 %v7917_v21  ;;  %5732 = vmatprep.subr.bf16.mxu1 %v7920_v22  ;;  %v8008_v21 = vld [vmem:[%s11392_s1 + $0xa40] ss:$16 sps:$4 sm:$0xff]   ;;  %v8011_v22 = vld [vmem:[%s11392_s1 + $0xa48] ss:$16 sps:$4 sm:$0xff]  }
 0x10f   :  { %5174 = vmatpush1.bf16.msra.mxu0 %v7915_v23  ;;  %5733 = vmatpush1.bf16.msra.mxu1 %v7918_v24  ;;  %v8016_v23 = vld [vmem:[%s11392_s1 + $0xa64] ss:$16 sps:$4 sm:$0xff]   ;;  %v8019_v24 = vld [vmem:[%s11392_s1 + $0xa6c] ss:$16 sps:$4 sm:$0xff]  }
 0x110   :  { %5175 = vmatprep.subr.bf16.mxu0 %v7923_v25  ;;  %5734 = vmatprep.subr.bf16.mxu1 %v7926_v26  ;;  %v8014_v25 = vld [vmem:[%s11392_s1 + $0xa60] ss:$16 sps:$4 sm:$0xff]   ;;  %v8017_v26 = vld [vmem:[%s11392_s1 + $0xa68] ss:$16 sps:$4 sm:$0xff]  }
 0x113   :  { %5176 = vmatpush1.bf16.msra.mxu0 %v7921_v27  ;;  %5735 = vmatpush1.bf16.msra.mxu1 %v7924_v28  ;;  %v8022_v27 = vld [vmem:[%s11392_s1 + $0xa84] ss:$16 sps:$4 sm:$0xff]   ;;  %v8025_v28 = vld [vmem:[%s11392_s1 + $0xa8c] ss:$16 sps:$4 sm:$0xff]  }
 0x114   :  { %5177 = vmatprep.subr.bf16.mxu0 %v7929_v29  ;;  %5736 = vmatprep.subr.bf16.mxu1 %v7932_v30  ;;  %v8020_v29 = vld [vmem:[%s11392_s1 + $0xa80] ss:$16 sps:$4 sm:$0xff]   ;;  %v8023_v30 = vld [vmem:[%s11392_s1 + $0xa88] ss:$16 sps:$4 sm:$0xff]  }
 0x117   :  { %5178 = vmatpush1.bf16.msra.mxu0 %v7927_v31  ;;  %5737 = vmatpush1.bf16.msra.mxu1 %v7930_v32  ;;  %v8028_v31 = vld [vmem:[%s11392_s1 + $0xaa4] ss:$16 sps:$4 sm:$0xff]   ;;  %v8031_v32 = vld [vmem:[%s11392_s1 + $0xaac] ss:$16 sps:$4 sm:$0xff]  }
 0x118   :  { %5179 = vmatprep.subr.bf16.mxu0 %v7935_v33  ;;  %5738 = vmatprep.subr.bf16.mxu1 %v7938_v34  ;;  %v8026_v33 = vld [vmem:[%s11392_s1 + $0xaa0] ss:$16 sps:$4 sm:$0xff]   ;;  %v8029_v34 = vld [vmem:[%s11392_s1 + $0xaa8] ss:$16 sps:$4 sm:$0xff]  }
 0x11b   :  { %5180 = vmatpush1.bf16.msra.mxu0 %v7933_v35  ;;  %5739 = vmatpush1.bf16.msra.mxu1 %v7936_v36  ;;  %v8034_v35 = vld [vmem:[%s11392_s1 + $0xac4] ss:$16 sps:$4 sm:$0xff]   ;;  %v8037_v36 = vld [vmem:[%s11392_s1 + $0xacc] ss:$16 sps:$4 sm:$0xff]  }
 0x11c   :  { %5181 = vmatprep.subr.bf16.mxu0 %v7941_v37  ;;  %5740 = vmatprep.subr.bf16.mxu1 %v7944_v38  ;;  %v8032_v37 = vld [vmem:[%s11392_s1 + $0xac0] ss:$16 sps:$4 sm:$0xff]   ;;  %v8035_v38 = vld [vmem:[%s11392_s1 + $0xac8] ss:$16 sps:$4 sm:$0xff]  }
 0x11f   :  { %5182 = vmatpush1.bf16.msra.mxu0 %v7939_v39  ;;  %5741 = vmatpush1.bf16.msra.mxu1 %v7942_v40  ;;  %v8040_v39 = vld [vmem:[%s11392_s1 + $0xae4] ss:$16 sps:$4 sm:$0xff]   ;;  %v8043_v40 = vld [vmem:[%s11392_s1 + $0xaec] ss:$16 sps:$4 sm:$0xff]  }
 0x120   :  { %5183 = vmatprep.subr.bf16.mxu0 %v7947_v41  ;;  %5742 = vmatprep.subr.bf16.mxu1 %v7950_v42  ;;  %v8038_v41 = vld [vmem:[%s11392_s1 + $0xae0] ss:$16 sps:$4 sm:$0xff]   ;;  %v8041_v42 = vld [vmem:[%s11392_s1 + $0xae8] ss:$16 sps:$4 sm:$0xff]  }
 0x123   :  { %5184 = vmatpush1.bf16.msra.mxu0 %v7945_v43  ;;  %5743 = vmatpush1.bf16.msra.mxu1 %v7948_v44  ;;  %v8046_v43 = vld [vmem:[%s11392_s1 + $0xb04] ss:$16 sps:$4 sm:$0xff]   ;;  %v8049_v44 = vld [vmem:[%s11392_s1 + $0xb0c] ss:$16 sps:$4 sm:$0xff]  }
 0x124   :  { %5185 = vmatprep.subr.bf16.mxu0 %v7953_v45  ;;  %5744 = vmatprep.subr.bf16.mxu1 %v7956_v46  ;;  %v8044_v45 = vld [vmem:[%s11392_s1 + $0xb00] ss:$16 sps:$4 sm:$0xff]   ;;  %v8047_v46 = vld [vmem:[%s11392_s1 + $0xb08] ss:$16 sps:$4 sm:$0xff]  }
 0x127   :  { %5186 = vmatpush1.bf16.msra.mxu0 %v7951_v47  ;;  %5745 = vmatpush1.bf16.msra.mxu1 %v7954_v48  ;;  %v8052_v47 = vld [vmem:[%s11392_s1 + $0xb24] ss:$16 sps:$4 sm:$0xff]   ;;  %v8055_v48 = vld [vmem:[%s11392_s1 + $0xb2c] ss:$16 sps:$4 sm:$0xff]  }
 0x128   :  { %5187 = vmatprep.subr.bf16.mxu0 %v7959_v49  ;;  %5746 = vmatprep.subr.bf16.mxu1 %v7962_v50  ;;  %v8050_v49 = vld [vmem:[%s11392_s1 + $0xb20] ss:$16 sps:$4 sm:$0xff]   ;;  %v8053_v50 = vld [vmem:[%s11392_s1 + $0xb28] ss:$16 sps:$4 sm:$0xff]  }
 0x12b   :  { %5188 = vmatpush1.bf16.msra.mxu0 %v7957_v51  ;;  %5747 = vmatpush1.bf16.msra.mxu1 %v7960_v52  ;;  %v8058_v51 = vld [vmem:[%s11392_s1 + $0xb44] ss:$16 sps:$4 sm:$0xff]   ;;  %v8061_v52 = vld [vmem:[%s11392_s1 + $0xb4c] ss:$16 sps:$4 sm:$0xff]  }
 0x12c   :  { %5189 = vmatprep.subr.bf16.mxu0 %v7965_v53  ;;  %5748 = vmatprep.subr.bf16.mxu1 %v7968_v54  ;;  %v8056_v53 = vld [vmem:[%s11392_s1 + $0xb40] ss:$16 sps:$4 sm:$0xff]   ;;  %v8059_v54 = vld [vmem:[%s11392_s1 + $0xb48] ss:$16 sps:$4 sm:$0xff]  }
 0x12f   :  { %5190 = vmatpush1.bf16.msra.mxu0 %v7963_v55  ;;  %5749 = vmatpush1.bf16.msra.mxu1 %v7966_v56  ;;  %v8064_v55 = vld [vmem:[%s11392_s1 + $0xb64] ss:$16 sps:$4 sm:$0xff]   ;;  %v8067_v56 = vld [vmem:[%s11392_s1 + $0xb6c] ss:$16 sps:$4 sm:$0xff]  }
 0x130   :  { %5191 = vmatprep.subr.bf16.mxu0 %v7971_v57  ;;  %5750 = vmatprep.subr.bf16.mxu1 %v7974_v58  ;;  %v8062_v57 = vld [vmem:[%s11392_s1 + $0xb60] ss:$16 sps:$4 sm:$0xff]   ;;  %v8065_v58 = vld [vmem:[%s11392_s1 + $0xb68] ss:$16 sps:$4 sm:$0xff]  }
 0x133   :  { %5192 = vmatpush1.bf16.msra.mxu0 %v7969_v59  ;;  %5751 = vmatpush1.bf16.msra.mxu1 %v7972_v60  ;;  %v8070_v59 = vld [vmem:[%s11392_s1 + $0xb84] ss:$16 sps:$4 sm:$0xff]   ;;  %v8073_v60 = vld [vmem:[%s11392_s1 + $0xb8c] ss:$16 sps:$4 sm:$0xff]  }
 0x134   :  { %5193 = vmatprep.subr.bf16.mxu0 %v7977_v61  ;;  %5752 = vmatprep.subr.bf16.mxu1 %v7980_v62  ;;  %v8068_v61 = vld [vmem:[%s11392_s1 + $0xb80] ss:$16 sps:$4 sm:$0xff]   ;;  %v8071_v62 = vld [vmem:[%s11392_s1 + $0xb88] ss:$16 sps:$4 sm:$0xff]  }
 0x137   :  { %5194 = vmatpush1.bf16.msra.mxu0 %v7975_v63  ;;  %5753 = vmatpush1.bf16.msra.mxu1 %v7978_v0  ;;  %v8076_v63 = vld [vmem:[%s11392_s1 + $0xba4] ss:$16 sps:$4 sm:$0xff]   ;;  %v8079_v0 = vld [vmem:[%s11392_s1 + $0xbac] ss:$16 sps:$4 sm:$0xff]  }
 0x138   :  { %5195 = vmatprep.subr.bf16.mxu0 %v7983_v1  ;;  %5754 = vmatprep.subr.bf16.mxu1 %v7986_v2  ;;  %v8074_v1 = vld [vmem:[%s11392_s1 + $0xba0] ss:$16 sps:$4 sm:$0xff]   ;;  %v8077_v2 = vld [vmem:[%s11392_s1 + $0xba8] ss:$16 sps:$4 sm:$0xff]  }
 0x13b   :  { %5196 = vmatpush1.bf16.msra.mxu0 %v7981_v3  ;;  %5755 = vmatpush1.bf16.msra.mxu1 %v7984_v4  ;;  %v8082_v3 = vld [vmem:[%s11392_s1 + $0xbc4] ss:$16 sps:$4 sm:$0xff]   ;;  %v8085_v4 = vld [vmem:[%s11392_s1 + $0xbcc] ss:$16 sps:$4 sm:$0xff]  }
 0x13c   :  { %5197 = vmatprep.subr.bf16.mxu0 %v7989_v5  ;;  %5756 = vmatprep.subr.bf16.mxu1 %v7992_v6  ;;  %v8080_v5 = vld [vmem:[%s11392_s1 + $0xbc0] ss:$16 sps:$4 sm:$0xff]   ;;  %v8083_v6 = vld [vmem:[%s11392_s1 + $0xbc8] ss:$16 sps:$4 sm:$0xff]  }
 0x13f   :  { %5198 = vmatpush1.bf16.msra.mxu0 %v7987_v7  ;;  %5757 = vmatpush1.bf16.msra.mxu1 %v7990_v8  ;;  %v8088_v7 = vld [vmem:[%s11392_s1 + $0xbe4] ss:$16 sps:$4 sm:$0xff]   ;;  %v8091_v8 = vld [vmem:[%s11392_s1 + $0xbec] ss:$16 sps:$4 sm:$0xff]  }
 0x140   :  { %5210 = vmatprep.subr.bf16.mxu0 %v7998_v10  ;;  %5769 = vmatprep.subr.bf16.mxu1 %v8001_v11  ;;  %v8089_v10 = vld [vmem:[%s11392_s1 + $0xbe8] ss:$16 sps:$4 sm:$0xff]  }
 0x141   :  { %v8092_v11 = vld [vmem:[%s11393_s0 + $0x28] ss:$100 sps:$4 sm:$0xff]  }
 0x142   :  { %5200 = vmatmul.mubr.bf16.vlgmr.msra.gmra.mrb[0].mxu0 %v7993_v9  ;;  %5759 = vmatmul.mubr.bf16.vlgmr.msra.gmra.mrb[0].mxu1 %v7993_v9  ;;  %v8086_v9 = vld [vmem:[%s11392_s1 + $0xbe0] ss:$16 sps:$4 sm:$0xff]  }
 0x143   :  { %5211 = vmatpush1.bf16.msra.mxu0 %v7996_v12  ;;  %5770 = vmatpush1.bf16.msra.mxu1 %v7999_v13  ;;  %v8097_v12 = vld [vmem:[%s11392_s1 + $0xc04] ss:$16 sps:$4 sm:$0xff]   ;;  %v8100_v13 = vld [vmem:[%s11392_s1 + $0xc0c] ss:$16 sps:$4 sm:$0xff]  }
 0x144   :  { %5212 = vmatprep.subr.bf16.mxu0 %v8004_v14  ;;  %5771 = vmatprep.subr.bf16.mxu1 %v8007_v15  ;;  %v8095_v14 = vld [vmem:[%s11392_s1 + $0xc00] ss:$16 sps:$4 sm:$0xff]   ;;  %v8098_v15 = vld [vmem:[%s11392_s1 + $0xc08] ss:$16 sps:$4 sm:$0xff]  }
 0x145   :  { %5242 = vmatprep.mubr.bf16.mxu0 %v8094_v16  ;;  %5801 = vmatprep.mubr.bf16.mxu1 %v8094_v16  ;;  %v8103_v16 = vld [vmem:[%s11392_s1 + $0xc24] ss:$16 sps:$4 sm:$0xff]  }
 0x147   :  { %5213 = vmatpush1.bf16.msra.mxu0 %v8002_v17  ;;  %5772 = vmatpush1.bf16.msra.mxu1 %v8005_v18  ;;  %v8106_v17 = vld [vmem:[%s11392_s1 + $0xc2c] ss:$16 sps:$4 sm:$0xff]   ;;  %v8193_v18 = vld [vmem:[%s11393_s0 + $0x34] ss:$100 sps:$4 sm:$0xff]  }
 0x148   :  { %5214 = vmatprep.subr.bf16.mxu0 %v8010_v19  ;;  %5773 = vmatprep.subr.bf16.mxu1 %v8013_v20  ;;  %v8101_v19 = vld [vmem:[%s11392_s1 + $0xc20] ss:$16 sps:$4 sm:$0xff]   ;;  %v8104_v20 = vld [vmem:[%s11392_s1 + $0xc28] ss:$16 sps:$4 sm:$0xff]  }
 0x14b   :  { %5215 = vmatpush1.bf16.msra.mxu0 %v8008_v21  ;;  %5774 = vmatpush1.bf16.msra.mxu1 %v8011_v22  ;;  %v8109_v21 = vld [vmem:[%s11392_s1 + $0xc44] ss:$16 sps:$4 sm:$0xff]   ;;  %v8112_v22 = vld [vmem:[%s11392_s1 + $0xc4c] ss:$16 sps:$4 sm:$0xff]  }
 0x14c   :  { %5216 = vmatprep.subr.bf16.mxu0 %v8016_v23  ;;  %5775 = vmatprep.subr.bf16.mxu1 %v8019_v24  ;;  %v8107_v23 = vld [vmem:[%s11392_s1 + $0xc40] ss:$16 sps:$4 sm:$0xff]   ;;  %v8110_v24 = vld [vmem:[%s11392_s1 + $0xc48] ss:$16 sps:$4 sm:$0xff]  }
 0x14f   :  { %5217 = vmatpush1.bf16.msra.mxu0 %v8014_v25  ;;  %5776 = vmatpush1.bf16.msra.mxu1 %v8017_v26  ;;  %v8115_v25 = vld [vmem:[%s11392_s1 + $0xc64] ss:$16 sps:$4 sm:$0xff]   ;;  %v8118_v26 = vld [vmem:[%s11392_s1 + $0xc6c] ss:$16 sps:$4 sm:$0xff]  }
 0x150   :  { %5218 = vmatprep.subr.bf16.mxu0 %v8022_v27  ;;  %5777 = vmatprep.subr.bf16.mxu1 %v8025_v28  ;;  %v8113_v27 = vld [vmem:[%s11392_s1 + $0xc60] ss:$16 sps:$4 sm:$0xff]   ;;  %v8116_v28 = vld [vmem:[%s11392_s1 + $0xc68] ss:$16 sps:$4 sm:$0xff]  }
 0x153   :  { %5219 = vmatpush1.bf16.msra.mxu0 %v8020_v29  ;;  %5778 = vmatpush1.bf16.msra.mxu1 %v8023_v30  ;;  %v8121_v29 = vld [vmem:[%s11392_s1 + $0xc84] ss:$16 sps:$4 sm:$0xff]   ;;  %v8124_v30 = vld [vmem:[%s11392_s1 + $0xc8c] ss:$16 sps:$4 sm:$0xff]  }
 0x154   :  { %5220 = vmatprep.subr.bf16.mxu0 %v8028_v31  ;;  %5779 = vmatprep.subr.bf16.mxu1 %v8031_v32  ;;  %v8119_v31 = vld [vmem:[%s11392_s1 + $0xc80] ss:$16 sps:$4 sm:$0xff]   ;;  %v8122_v32 = vld [vmem:[%s11392_s1 + $0xc88] ss:$16 sps:$4 sm:$0xff]  }
 0x157   :  { %5221 = vmatpush1.bf16.msra.mxu0 %v8026_v33  ;;  %5780 = vmatpush1.bf16.msra.mxu1 %v8029_v34  ;;  %v8127_v33 = vld [vmem:[%s11392_s1 + $0xca4] ss:$16 sps:$4 sm:$0xff]   ;;  %v8130_v34 = vld [vmem:[%s11392_s1 + $0xcac] ss:$16 sps:$4 sm:$0xff]  }
 0x158   :  { %5222 = vmatprep.subr.bf16.mxu0 %v8034_v35  ;;  %5781 = vmatprep.subr.bf16.mxu1 %v8037_v36  ;;  %v8125_v35 = vld [vmem:[%s11392_s1 + $0xca0] ss:$16 sps:$4 sm:$0xff]   ;;  %v8128_v36 = vld [vmem:[%s11392_s1 + $0xca8] ss:$16 sps:$4 sm:$0xff]  }
 0x15b   :  { %5223 = vmatpush1.bf16.msra.mxu0 %v8032_v37  ;;  %5782 = vmatpush1.bf16.msra.mxu1 %v8035_v38  ;;  %v8133_v37 = vld [vmem:[%s11392_s1 + $0xcc4] ss:$16 sps:$4 sm:$0xff]   ;;  %v8136_v38 = vld [vmem:[%s11392_s1 + $0xccc] ss:$16 sps:$4 sm:$0xff]  }
 0x15c   :  { %5224 = vmatprep.subr.bf16.mxu0 %v8040_v39  ;;  %5783 = vmatprep.subr.bf16.mxu1 %v8043_v40  ;;  %v8131_v39 = vld [vmem:[%s11392_s1 + $0xcc0] ss:$16 sps:$4 sm:$0xff]   ;;  %v8134_v40 = vld [vmem:[%s11392_s1 + $0xcc8] ss:$16 sps:$4 sm:$0xff]  }
 0x15f   :  { %5225 = vmatpush1.bf16.msra.mxu0 %v8038_v41  ;;  %5784 = vmatpush1.bf16.msra.mxu1 %v8041_v42  ;;  %v8139_v41 = vld [vmem:[%s11392_s1 + $0xce4] ss:$16 sps:$4 sm:$0xff]   ;;  %v8142_v42 = vld [vmem:[%s11392_s1 + $0xcec] ss:$16 sps:$4 sm:$0xff]  }
 0x160   :  { %5226 = vmatprep.subr.bf16.mxu0 %v8046_v43  ;;  %5785 = vmatprep.subr.bf16.mxu1 %v8049_v44  ;;  %v8137_v43 = vld [vmem:[%s11392_s1 + $0xce0] ss:$16 sps:$4 sm:$0xff]   ;;  %v8140_v44 = vld [vmem:[%s11392_s1 + $0xce8] ss:$16 sps:$4 sm:$0xff]  }
 0x163   :  { %5227 = vmatpush1.bf16.msra.mxu0 %v8044_v45  ;;  %5786 = vmatpush1.bf16.msra.mxu1 %v8047_v46  ;;  %v8145_v45 = vld [vmem:[%s11392_s1 + $0xd04] ss:$16 sps:$4 sm:$0xff]   ;;  %v8148_v46 = vld [vmem:[%s11392_s1 + $0xd0c] ss:$16 sps:$4 sm:$0xff]  }
 0x164   :  { %5228 = vmatprep.subr.bf16.mxu0 %v8052_v47  ;;  %5787 = vmatprep.subr.bf16.mxu1 %v8055_v48  ;;  %v8143_v47 = vld [vmem:[%s11392_s1 + $0xd00] ss:$16 sps:$4 sm:$0xff]   ;;  %v8146_v48 = vld [vmem:[%s11392_s1 + $0xd08] ss:$16 sps:$4 sm:$0xff]  }
 0x167   :  { %5229 = vmatpush1.bf16.msra.mxu0 %v8050_v49  ;;  %5788 = vmatpush1.bf16.msra.mxu1 %v8053_v50  ;;  %v8151_v49 = vld [vmem:[%s11392_s1 + $0xd24] ss:$16 sps:$4 sm:$0xff]   ;;  %v8154_v50 = vld [vmem:[%s11392_s1 + $0xd2c] ss:$16 sps:$4 sm:$0xff]  }
 0x168   :  { %5230 = vmatprep.subr.bf16.mxu0 %v8058_v51  ;;  %5789 = vmatprep.subr.bf16.mxu1 %v8061_v52  ;;  %v8149_v51 = vld [vmem:[%s11392_s1 + $0xd20] ss:$16 sps:$4 sm:$0xff]   ;;  %v8152_v52 = vld [vmem:[%s11392_s1 + $0xd28] ss:$16 sps:$4 sm:$0xff]  }
 0x16b   :  { %5231 = vmatpush1.bf16.msra.mxu0 %v8056_v53  ;;  %5790 = vmatpush1.bf16.msra.mxu1 %v8059_v54  ;;  %v8157_v53 = vld [vmem:[%s11392_s1 + $0xd44] ss:$16 sps:$4 sm:$0xff]   ;;  %v8160_v54 = vld [vmem:[%s11392_s1 + $0xd4c] ss:$16 sps:$4 sm:$0xff]  }
 0x16c   :  { %5232 = vmatprep.subr.bf16.mxu0 %v8064_v55  ;;  %5791 = vmatprep.subr.bf16.mxu1 %v8067_v56  ;;  %v8155_v55 = vld [vmem:[%s11392_s1 + $0xd40] ss:$16 sps:$4 sm:$0xff]   ;;  %v8158_v56 = vld [vmem:[%s11392_s1 + $0xd48] ss:$16 sps:$4 sm:$0xff]  }
 0x16f   :  { %5233 = vmatpush1.bf16.msra.mxu0 %v8062_v57  ;;  %5792 = vmatpush1.bf16.msra.mxu1 %v8065_v58  ;;  %v8163_v57 = vld [vmem:[%s11392_s1 + $0xd64] ss:$16 sps:$4 sm:$0xff]   ;;  %v8166_v58 = vld [vmem:[%s11392_s1 + $0xd6c] ss:$16 sps:$4 sm:$0xff]  }
 0x170   :  { %5234 = vmatprep.subr.bf16.mxu0 %v8070_v59  ;;  %5793 = vmatprep.subr.bf16.mxu1 %v8073_v60  ;;  %v8161_v59 = vld [vmem:[%s11392_s1 + $0xd60] ss:$16 sps:$4 sm:$0xff]   ;;  %v8164_v60 = vld [vmem:[%s11392_s1 + $0xd68] ss:$16 sps:$4 sm:$0xff]  }
 0x173   :  { %5235 = vmatpush1.bf16.msra.mxu0 %v8068_v61  ;;  %5794 = vmatpush1.bf16.msra.mxu1 %v8071_v62  ;;  %v8169_v61 = vld [vmem:[%s11392_s1 + $0xd84] ss:$16 sps:$4 sm:$0xff]   ;;  %v8172_v62 = vld [vmem:[%s11392_s1 + $0xd8c] ss:$16 sps:$4 sm:$0xff]  }
 0x174   :  { %5236 = vmatprep.subr.bf16.mxu0 %v8076_v63  ;;  %5795 = vmatprep.subr.bf16.mxu1 %v8079_v0  ;;  %v8167_v63 = vld [vmem:[%s11392_s1 + $0xd80] ss:$16 sps:$4 sm:$0xff]   ;;  %v8170_v0 = vld [vmem:[%s11392_s1 + $0xd88] ss:$16 sps:$4 sm:$0xff]  }
 0x177   :  { %5237 = vmatpush1.bf16.msra.mxu0 %v8074_v1  ;;  %5796 = vmatpush1.bf16.msra.mxu1 %v8077_v2  ;;  %v8175_v1 = vld [vmem:[%s11392_s1 + $0xda4] ss:$16 sps:$4 sm:$0xff]   ;;  %v8178_v2 = vld [vmem:[%s11392_s1 + $0xdac] ss:$16 sps:$4 sm:$0xff]  }
 0x178   :  { %5238 = vmatprep.subr.bf16.mxu0 %v8082_v3  ;;  %5797 = vmatprep.subr.bf16.mxu1 %v8085_v4  ;;  %v8173_v3 = vld [vmem:[%s11392_s1 + $0xda0] ss:$16 sps:$4 sm:$0xff]   ;;  %v8176_v4 = vld [vmem:[%s11392_s1 + $0xda8] ss:$16 sps:$4 sm:$0xff]  }
 0x17b   :  { %5239 = vmatpush1.bf16.msra.mxu0 %v8080_v5  ;;  %5798 = vmatpush1.bf16.msra.mxu1 %v8083_v6  ;;  %v8181_v5 = vld [vmem:[%s11392_s1 + $0xdc4] ss:$16 sps:$4 sm:$0xff]   ;;  %v8184_v6 = vld [vmem:[%s11392_s1 + $0xdcc] ss:$16 sps:$4 sm:$0xff]  }
 0x17c   :  { %5240 = vmatprep.subr.bf16.mxu0 %v8088_v7  ;;  %5799 = vmatprep.subr.bf16.mxu1 %v8091_v8  ;;  %v8179_v7 = vld [vmem:[%s11392_s1 + $0xdc0] ss:$16 sps:$4 sm:$0xff]   ;;  %v8182_v8 = vld [vmem:[%s11392_s1 + $0xdc8] ss:$16 sps:$4 sm:$0xff]  }
 0x17f   :  { %5241 = vmatpush1.bf16.msra.mxu0 %v8086_v9  ;;  %5800 = vmatpush1.bf16.msra.mxu1 %v8089_v10  ;;  %v8187_v9 = vld [vmem:[%s11392_s1 + $0xde4] ss:$16 sps:$4 sm:$0xff]   ;;  %v8190_v10 = vld [vmem:[%s11392_s1 + $0xdec] ss:$16 sps:$4 sm:$0xff]  }
 0x180   :  { %5253 = vmatprep.subr.bf16.mxu0 %v8097_v12  ;;  %5812 = vmatprep.subr.bf16.mxu1 %v8100_v13  ;;  %v8188_v12 = vld [vmem:[%s11392_s1 + $0xde8] ss:$16 sps:$4 sm:$0xff]   ;;  %v8191_v13 = vld [vmem:[%s11393_s0 + $0x30] ss:$100 sps:$4 sm:$0xff]  }
 0x182   :  { %5243 = vmatmul.mubr.bf16.vlgmr.msra.gmra.mrb[0].mxu0 %v8092_v11  ;;  %5802 = vmatmul.mubr.bf16.vlgmr.msra.gmra.mrb[0].mxu1 %v8092_v11  ;;  %v8185_v11 = vld [vmem:[%s11392_s1 + $0xde0] ss:$16 sps:$4 sm:$0xff]  }
 0x183   :  { %5254 = vmatpush1.bf16.msra.mxu0 %v8095_v14  ;;  %5813 = vmatpush1.bf16.msra.mxu1 %v8098_v15  ;;  %v8196_v14 = vld [vmem:[%s11392_s1 + $0xe04] ss:$16 sps:$4 sm:$0xff]   ;;  %v8199_v15 = vld [vmem:[%s11392_s1 + $0xe0c] ss:$16 sps:$4 sm:$0xff]  }
 0x184   :  { %5255 = vmatprep.subr.bf16.mxu0 %v8103_v16  ;;  %5814 = vmatprep.subr.bf16.mxu1 %v8106_v17  ;;  %v8194_v16 = vld [vmem:[%s11392_s1 + $0xe00] ss:$16 sps:$4 sm:$0xff]   ;;  %v8197_v17 = vld [vmem:[%s11392_s1 + $0xe08] ss:$16 sps:$4 sm:$0xff]  }
 0x185   :  { %5285 = vmatprep.mubr.bf16.mxu0 %v8193_v18  ;;  %5844 = vmatprep.mubr.bf16.mxu1 %v8193_v18  ;;  %v8202_v18 = vld [vmem:[%s11392_s1 + $0xe24] ss:$16 sps:$4 sm:$0xff]  }
 0x187   :  { %5256 = vmatpush1.bf16.msra.mxu0 %v8101_v19  ;;  %5815 = vmatpush1.bf16.msra.mxu1 %v8104_v20  ;;  %v8205_v19 = vld [vmem:[%s11392_s1 + $0xe2c] ss:$16 sps:$4 sm:$0xff]  }
 0x188   :  { %5257 = vmatprep.subr.bf16.mxu0 %v8109_v21  ;;  %5816 = vmatprep.subr.bf16.mxu1 %v8112_v22  ;;  %v8292_v20 = vld [vmem:[%s11393_s0 + $0x3c] ss:$100 sps:$4 sm:$0xff]   ;;  %v8203_v22 = vld [vmem:[%s11392_s1 + $0xe28] ss:$16 sps:$4 sm:$0xff]  }
 0x189   :  { %v8200_v21 = vld [vmem:[%s11392_s1 + $0xe20] ss:$16 sps:$4 sm:$0xff]  }
 0x18b   :  { %5258 = vmatpush1.bf16.msra.mxu0 %v8107_v23  ;;  %5817 = vmatpush1.bf16.msra.mxu1 %v8110_v24  ;;  %v8208_v23 = vld [vmem:[%s11392_s1 + $0xe44] ss:$16 sps:$4 sm:$0xff]   ;;  %v8211_v24 = vld [vmem:[%s11392_s1 + $0xe4c] ss:$16 sps:$4 sm:$0xff]  }
 0x18c   :  { %5259 = vmatprep.subr.bf16.mxu0 %v8115_v25  ;;  %5818 = vmatprep.subr.bf16.mxu1 %v8118_v26  ;;  %v8206_v25 = vld [vmem:[%s11392_s1 + $0xe40] ss:$16 sps:$4 sm:$0xff]   ;;  %v8209_v26 = vld [vmem:[%s11392_s1 + $0xe48] ss:$16 sps:$4 sm:$0xff]  }
 0x18f   :  { %5260 = vmatpush1.bf16.msra.mxu0 %v8113_v27  ;;  %5819 = vmatpush1.bf16.msra.mxu1 %v8116_v28  ;;  %v8214_v27 = vld [vmem:[%s11392_s1 + $0xe64] ss:$16 sps:$4 sm:$0xff]   ;;  %v8217_v28 = vld [vmem:[%s11392_s1 + $0xe6c] ss:$16 sps:$4 sm:$0xff]  }
 0x190   :  { %5261 = vmatprep.subr.bf16.mxu0 %v8121_v29  ;;  %5820 = vmatprep.subr.bf16.mxu1 %v8124_v30  ;;  %v8212_v29 = vld [vmem:[%s11392_s1 + $0xe60] ss:$16 sps:$4 sm:$0xff]   ;;  %v8215_v30 = vld [vmem:[%s11392_s1 + $0xe68] ss:$16 sps:$4 sm:$0xff]  }
 0x193   :  { %5262 = vmatpush1.bf16.msra.mxu0 %v8119_v31  ;;  %5821 = vmatpush1.bf16.msra.mxu1 %v8122_v32  ;;  %v8220_v31 = vld [vmem:[%s11392_s1 + $0xe84] ss:$16 sps:$4 sm:$0xff]   ;;  %v8223_v32 = vld [vmem:[%s11392_s1 + $0xe8c] ss:$16 sps:$4 sm:$0xff]  }
 0x194   :  { %5263 = vmatprep.subr.bf16.mxu0 %v8127_v33  ;;  %5822 = vmatprep.subr.bf16.mxu1 %v8130_v34  ;;  %v8218_v33 = vld [vmem:[%s11392_s1 + $0xe80] ss:$16 sps:$4 sm:$0xff]   ;;  %v8221_v34 = vld [vmem:[%s11392_s1 + $0xe88] ss:$16 sps:$4 sm:$0xff]  }
 0x197   :  { %5264 = vmatpush1.bf16.msra.mxu0 %v8125_v35  ;;  %5823 = vmatpush1.bf16.msra.mxu1 %v8128_v36  ;;  %v8226_v35 = vld [vmem:[%s11392_s1 + $0xea4] ss:$16 sps:$4 sm:$0xff]   ;;  %v8229_v36 = vld [vmem:[%s11392_s1 + $0xeac] ss:$16 sps:$4 sm:$0xff]  }
 0x198   :  { %5265 = vmatprep.subr.bf16.mxu0 %v8133_v37  ;;  %5824 = vmatprep.subr.bf16.mxu1 %v8136_v38  ;;  %v8224_v37 = vld [vmem:[%s11392_s1 + $0xea0] ss:$16 sps:$4 sm:$0xff]   ;;  %v8227_v38 = vld [vmem:[%s11392_s1 + $0xea8] ss:$16 sps:$4 sm:$0xff]  }
 0x19b   :  { %5266 = vmatpush1.bf16.msra.mxu0 %v8131_v39  ;;  %5825 = vmatpush1.bf16.msra.mxu1 %v8134_v40  ;;  %v8232_v39 = vld [vmem:[%s11392_s1 + $0xec4] ss:$16 sps:$4 sm:$0xff]   ;;  %v8235_v40 = vld [vmem:[%s11392_s1 + $0xecc] ss:$16 sps:$4 sm:$0xff]  }
 0x19c   :  { %5267 = vmatprep.subr.bf16.mxu0 %v8139_v41  ;;  %5826 = vmatprep.subr.bf16.mxu1 %v8142_v42  ;;  %v8230_v41 = vld [vmem:[%s11392_s1 + $0xec0] ss:$16 sps:$4 sm:$0xff]   ;;  %v8233_v42 = vld [vmem:[%s11392_s1 + $0xec8] ss:$16 sps:$4 sm:$0xff]  }
 0x19f   :  { %5268 = vmatpush1.bf16.msra.mxu0 %v8137_v43  ;;  %5827 = vmatpush1.bf16.msra.mxu1 %v8140_v44  ;;  %v8238_v43 = vld [vmem:[%s11392_s1 + $0xee4] ss:$16 sps:$4 sm:$0xff]   ;;  %v8241_v44 = vld [vmem:[%s11392_s1 + $0xeec] ss:$16 sps:$4 sm:$0xff]  }
 0x1a0   :  { %5269 = vmatprep.subr.bf16.mxu0 %v8145_v45  ;;  %5828 = vmatprep.subr.bf16.mxu1 %v8148_v46  ;;  %v8236_v45 = vld [vmem:[%s11392_s1 + $0xee0] ss:$16 sps:$4 sm:$0xff]   ;;  %v8239_v46 = vld [vmem:[%s11392_s1 + $0xee8] ss:$16 sps:$4 sm:$0xff]  }
 0x1a3   :  { %5270 = vmatpush1.bf16.msra.mxu0 %v8143_v47  ;;  %5829 = vmatpush1.bf16.msra.mxu1 %v8146_v48  ;;  %v8244_v47 = vld [vmem:[%s11392_s1 + $0xf04] ss:$16 sps:$4 sm:$0xff]   ;;  %v8247_v48 = vld [vmem:[%s11392_s1 + $0xf0c] ss:$16 sps:$4 sm:$0xff]  }
 0x1a4   :  { %5271 = vmatprep.subr.bf16.mxu0 %v8151_v49  ;;  %5830 = vmatprep.subr.bf16.mxu1 %v8154_v50  ;;  %v8242_v49 = vld [vmem:[%s11392_s1 + $0xf00] ss:$16 sps:$4 sm:$0xff]   ;;  %v8245_v50 = vld [vmem:[%s11392_s1 + $0xf08] ss:$16 sps:$4 sm:$0xff]  }
 0x1a7   :  { %5272 = vmatpush1.bf16.msra.mxu0 %v8149_v51  ;;  %5831 = vmatpush1.bf16.msra.mxu1 %v8152_v52  ;;  %v8250_v51 = vld [vmem:[%s11392_s1 + $0xf24] ss:$16 sps:$4 sm:$0xff]   ;;  %v8253_v52 = vld [vmem:[%s11392_s1 + $0xf2c] ss:$16 sps:$4 sm:$0xff]  }
 0x1a8   :  { %5273 = vmatprep.subr.bf16.mxu0 %v8157_v53  ;;  %5832 = vmatprep.subr.bf16.mxu1 %v8160_v54  ;;  %v8248_v53 = vld [vmem:[%s11392_s1 + $0xf20] ss:$16 sps:$4 sm:$0xff]   ;;  %v8251_v54 = vld [vmem:[%s11392_s1 + $0xf28] ss:$16 sps:$4 sm:$0xff]  }
 0x1ab   :  { %5274 = vmatpush1.bf16.msra.mxu0 %v8155_v55  ;;  %5833 = vmatpush1.bf16.msra.mxu1 %v8158_v56  ;;  %v8256_v55 = vld [vmem:[%s11392_s1 + $0xf44] ss:$16 sps:$4 sm:$0xff]   ;;  %v8259_v56 = vld [vmem:[%s11392_s1 + $0xf4c] ss:$16 sps:$4 sm:$0xff]  }
 0x1ac   :  { %5275 = vmatprep.subr.bf16.mxu0 %v8163_v57  ;;  %5834 = vmatprep.subr.bf16.mxu1 %v8166_v58  ;;  %v8254_v57 = vld [vmem:[%s11392_s1 + $0xf40] ss:$16 sps:$4 sm:$0xff]   ;;  %v8257_v58 = vld [vmem:[%s11392_s1 + $0xf48] ss:$16 sps:$4 sm:$0xff]  }
 0x1af   :  { %5276 = vmatpush1.bf16.msra.mxu0 %v8161_v59  ;;  %5835 = vmatpush1.bf16.msra.mxu1 %v8164_v60  ;;  %v8262_v59 = vld [vmem:[%s11392_s1 + $0xf64] ss:$16 sps:$4 sm:$0xff]   ;;  %v8265_v60 = vld [vmem:[%s11392_s1 + $0xf6c] ss:$16 sps:$4 sm:$0xff]  }
 0x1b0   :  { %5277 = vmatprep.subr.bf16.mxu0 %v8169_v61  ;;  %5836 = vmatprep.subr.bf16.mxu1 %v8172_v62  ;;  %v8260_v61 = vld [vmem:[%s11392_s1 + $0xf60] ss:$16 sps:$4 sm:$0xff]   ;;  %v8263_v62 = vld [vmem:[%s11392_s1 + $0xf68] ss:$16 sps:$4 sm:$0xff]  }
 0x1b3   :  { %5278 = vmatpush1.bf16.msra.mxu0 %v8167_v63  ;;  %5837 = vmatpush1.bf16.msra.mxu1 %v8170_v0  ;;  %v8268_v63 = vld [vmem:[%s11392_s1 + $0xf84] ss:$16 sps:$4 sm:$0xff]   ;;  %v8271_v0 = vld [vmem:[%s11392_s1 + $0xf8c] ss:$16 sps:$4 sm:$0xff]  }
 0x1b4   :  { %5279 = vmatprep.subr.bf16.mxu0 %v8175_v1  ;;  %5838 = vmatprep.subr.bf16.mxu1 %v8178_v2  ;;  %v8266_v1 = vld [vmem:[%s11392_s1 + $0xf80] ss:$16 sps:$4 sm:$0xff]   ;;  %v8269_v2 = vld [vmem:[%s11392_s1 + $0xf88] ss:$16 sps:$4 sm:$0xff]  }
 0x1b7   :  { %5280 = vmatpush1.bf16.msra.mxu0 %v8173_v3  ;;  %5839 = vmatpush1.bf16.msra.mxu1 %v8176_v4  ;;  %v8274_v3 = vld [vmem:[%s11392_s1 + $0xfa4] ss:$16 sps:$4 sm:$0xff]   ;;  %v8277_v4 = vld [vmem:[%s11392_s1 + $0xfac] ss:$16 sps:$4 sm:$0xff]  }
 0x1b8   :  { %5281 = vmatprep.subr.bf16.mxu0 %v8181_v5  ;;  %5840 = vmatprep.subr.bf16.mxu1 %v8184_v6  ;;  %v8272_v5 = vld [vmem:[%s11392_s1 + $0xfa0] ss:$16 sps:$4 sm:$0xff]   ;;  %v8275_v6 = vld [vmem:[%s11392_s1 + $0xfa8] ss:$16 sps:$4 sm:$0xff]  }
 0x1bb   :  { %5282 = vmatpush1.bf16.msra.mxu0 %v8179_v7  ;;  %5841 = vmatpush1.bf16.msra.mxu1 %v8182_v8  ;;  %v8280_v7 = vld [vmem:[%s11392_s1 + $0xfc4] ss:$16 sps:$4 sm:$0xff]   ;;  %v8283_v8 = vld [vmem:[%s11392_s1 + $0xfcc] ss:$16 sps:$4 sm:$0xff]  }
 0x1bc   :  { %5283 = vmatprep.subr.bf16.mxu0 %v8187_v9  ;;  %5842 = vmatprep.subr.bf16.mxu1 %v8190_v10  ;;  %v8278_v9 = vld [vmem:[%s11392_s1 + $0xfc0] ss:$16 sps:$4 sm:$0xff]   ;;  %v8281_v10 = vld [vmem:[%s11392_s1 + $0xfc8] ss:$16 sps:$4 sm:$0xff]  }
 0x1bf   :  { %5284 = vmatpush1.bf16.msra.mxu0 %v8185_v11  ;;  %5843 = vmatpush1.bf16.msra.mxu1 %v8188_v12  ;;  %v8286_v11 = vld [vmem:[%s11392_s1 + $0xfe4] ss:$16 sps:$4 sm:$0xff]   ;;  %v8289_v12 = vld [vmem:[%s11392_s1 + $0xfec] ss:$16 sps:$4 sm:$0xff]  }
 0x1c0   :  { %5296 = vmatprep.subr.bf16.mxu0 %v8196_v14  ;;  %5855 = vmatprep.subr.bf16.mxu1 %v8199_v15  ;;  %v8287_v14 = vld [vmem:[%s11392_s1 + $0xfe8] ss:$16 sps:$4 sm:$0xff]   ;;  %v8295_v15 = vld [vmem:[%s11392_s1 + $0x1004] ss:$16 sps:$4 sm:$0xff]  }
 0x1c2   :  { %5286 = vmatmul.mubr.bf16.vlgmr.msra.gmra.mrb[0].mxu0 %v8191_v13  ;;  %5845 = vmatmul.mubr.bf16.vlgmr.msra.gmra.mrb[0].mxu1 %v8191_v13  ;;  %v8284_v13 = vld [vmem:[%s11392_s1 + $0xfe0] ss:$16 sps:$4 sm:$0xff]  }
 0x1c3   :  { %5297 = vmatpush1.bf16.msra.mxu0 %v8194_v16  ;;  %5856 = vmatpush1.bf16.msra.mxu1 %v8197_v17  ;;  %v8298_v16 = vld [vmem:[%s11392_s1 + $0x100c] ss:$16 sps:$4 sm:$0xff]  }
 0x1c4   :  { %5298 = vmatprep.subr.bf16.mxu0 %v8202_v18  ;;  %5857 = vmatprep.subr.bf16.mxu1 %v8205_v19  ;;  %v8290_v17 = vld [vmem:[%s11393_s0 + $0x38] ss:$100 sps:$4 sm:$0xff]   ;;  %v8293_v18 = vld [vmem:[%s11392_s1 + $0x1000] ss:$16 sps:$4 sm:$0xff]  }
 0x1c5   :  { %5328 = vmatprep.mubr.bf16.mxu0 %v8292_v20  ;;  %5887 = vmatprep.mubr.bf16.mxu1 %v8292_v20  ;;  %v8296_v19 = vld [vmem:[%s11392_s1 + $0x1008] ss:$16 sps:$4 sm:$0xff]   ;;  %v8301_v20 = vld [vmem:[%s11392_s1 + $0x1024] ss:$16 sps:$4 sm:$0xff]  }
 0x1c7   :  { %5299 = vmatpush1.bf16.msra.mxu0 %v8200_v21  ;;  %5858 = vmatpush1.bf16.msra.mxu1 %v8203_v22  ;;  %v8304_v21 = vld [vmem:[%s11392_s1 + $0x102c] ss:$16 sps:$4 sm:$0xff]   ;;  %v8391_v22 = vld [vmem:[%s11393_s0 + $0x44] ss:$100 sps:$4 sm:$0xff]  }
 0x1c8   :  { %5300 = vmatprep.subr.bf16.mxu0 %v8208_v23  ;;  %5859 = vmatprep.subr.bf16.mxu1 %v8211_v24  ;;  %v8299_v23 = vld [vmem:[%s11392_s1 + $0x1020] ss:$16 sps:$4 sm:$0xff]   ;;  %v8302_v24 = vld [vmem:[%s11392_s1 + $0x1028] ss:$16 sps:$4 sm:$0xff]  }
 0x1cb   :  { %5301 = vmatpush1.bf16.msra.mxu0 %v8206_v25  ;;  %5860 = vmatpush1.bf16.msra.mxu1 %v8209_v26  ;;  %v8307_v25 = vld [vmem:[%s11392_s1 + $0x1044] ss:$16 sps:$4 sm:$0xff]   ;;  %v8310_v26 = vld [vmem:[%s11392_s1 + $0x104c] ss:$16 sps:$4 sm:$0xff]  }
 0x1cc   :  { %5302 = vmatprep.subr.bf16.mxu0 %v8214_v27  ;;  %5861 = vmatprep.subr.bf16.mxu1 %v8217_v28  ;;  %v8305_v27 = vld [vmem:[%s11392_s1 + $0x1040] ss:$16 sps:$4 sm:$0xff]   ;;  %v8308_v28 = vld [vmem:[%s11392_s1 + $0x1048] ss:$16 sps:$4 sm:$0xff]  }
 0x1cf   :  { %5303 = vmatpush1.bf16.msra.mxu0 %v8212_v29  ;;  %5862 = vmatpush1.bf16.msra.mxu1 %v8215_v30  ;;  %v8313_v29 = vld [vmem:[%s11392_s1 + $0x1064] ss:$16 sps:$4 sm:$0xff]   ;;  %v8316_v30 = vld [vmem:[%s11392_s1 + $0x106c] ss:$16 sps:$4 sm:$0xff]  }
 0x1d0   :  { %5304 = vmatprep.subr.bf16.mxu0 %v8220_v31  ;;  %5863 = vmatprep.subr.bf16.mxu1 %v8223_v32  ;;  %v8311_v31 = vld [vmem:[%s11392_s1 + $0x1060] ss:$16 sps:$4 sm:$0xff]   ;;  %v8314_v32 = vld [vmem:[%s11392_s1 + $0x1068] ss:$16 sps:$4 sm:$0xff]  }
 0x1d3   :  { %5305 = vmatpush1.bf16.msra.mxu0 %v8218_v33  ;;  %5864 = vmatpush1.bf16.msra.mxu1 %v8221_v34  ;;  %v8319_v33 = vld [vmem:[%s11392_s1 + $0x1084] ss:$16 sps:$4 sm:$0xff]   ;;  %v8322_v34 = vld [vmem:[%s11392_s1 + $0x108c] ss:$16 sps:$4 sm:$0xff]  }
 0x1d4   :  { %5306 = vmatprep.subr.bf16.mxu0 %v8226_v35  ;;  %5865 = vmatprep.subr.bf16.mxu1 %v8229_v36  ;;  %v8317_v35 = vld [vmem:[%s11392_s1 + $0x1080] ss:$16 sps:$4 sm:$0xff]   ;;  %v8320_v36 = vld [vmem:[%s11392_s1 + $0x1088] ss:$16 sps:$4 sm:$0xff]  }
 0x1d7   :  { %5307 = vmatpush1.bf16.msra.mxu0 %v8224_v37  ;;  %5866 = vmatpush1.bf16.msra.mxu1 %v8227_v38  ;;  %v8325_v37 = vld [vmem:[%s11392_s1 + $0x10a4] ss:$16 sps:$4 sm:$0xff]   ;;  %v8328_v38 = vld [vmem:[%s11392_s1 + $0x10ac] ss:$16 sps:$4 sm:$0xff]  }
 0x1d8   :  { %5308 = vmatprep.subr.bf16.mxu0 %v8232_v39  ;;  %5867 = vmatprep.subr.bf16.mxu1 %v8235_v40  ;;  %v8323_v39 = vld [vmem:[%s11392_s1 + $0x10a0] ss:$16 sps:$4 sm:$0xff]   ;;  %v8326_v40 = vld [vmem:[%s11392_s1 + $0x10a8] ss:$16 sps:$4 sm:$0xff]  }
 0x1db   :  { %5309 = vmatpush1.bf16.msra.mxu0 %v8230_v41  ;;  %5868 = vmatpush1.bf16.msra.mxu1 %v8233_v42  ;;  %v8331_v41 = vld [vmem:[%s11392_s1 + $0x10c4] ss:$16 sps:$4 sm:$0xff]   ;;  %v8334_v42 = vld [vmem:[%s11392_s1 + $0x10cc] ss:$16 sps:$4 sm:$0xff]  }
 0x1dc   :  { %5310 = vmatprep.subr.bf16.mxu0 %v8238_v43  ;;  %5869 = vmatprep.subr.bf16.mxu1 %v8241_v44  ;;  %v8329_v43 = vld [vmem:[%s11392_s1 + $0x10c0] ss:$16 sps:$4 sm:$0xff]   ;;  %v8332_v44 = vld [vmem:[%s11392_s1 + $0x10c8] ss:$16 sps:$4 sm:$0xff]  }
 0x1df   :  { %5311 = vmatpush1.bf16.msra.mxu0 %v8236_v45  ;;  %5870 = vmatpush1.bf16.msra.mxu1 %v8239_v46  ;;  %v8337_v45 = vld [vmem:[%s11392_s1 + $0x10e4] ss:$16 sps:$4 sm:$0xff]   ;;  %v8340_v46 = vld [vmem:[%s11392_s1 + $0x10ec] ss:$16 sps:$4 sm:$0xff]  }
 0x1e0   :  { %5312 = vmatprep.subr.bf16.mxu0 %v8244_v47  ;;  %5871 = vmatprep.subr.bf16.mxu1 %v8247_v48  ;;  %v8335_v47 = vld [vmem:[%s11392_s1 + $0x10e0] ss:$16 sps:$4 sm:$0xff]   ;;  %v8338_v48 = vld [vmem:[%s11392_s1 + $0x10e8] ss:$16 sps:$4 sm:$0xff]  }
 0x1e3   :  { %5313 = vmatpush1.bf16.msra.mxu0 %v8242_v49  ;;  %5872 = vmatpush1.bf16.msra.mxu1 %v8245_v50  ;;  %v8343_v49 = vld [vmem:[%s11392_s1 + $0x1104] ss:$16 sps:$4 sm:$0xff]   ;;  %v8346_v50 = vld [vmem:[%s11392_s1 + $0x110c] ss:$16 sps:$4 sm:$0xff]  }
 0x1e4   :  { %5314 = vmatprep.subr.bf16.mxu0 %v8250_v51  ;;  %5873 = vmatprep.subr.bf16.mxu1 %v8253_v52  ;;  %v8341_v51 = vld [vmem:[%s11392_s1 + $0x1100] ss:$16 sps:$4 sm:$0xff]   ;;  %v8344_v52 = vld [vmem:[%s11392_s1 + $0x1108] ss:$16 sps:$4 sm:$0xff]  }
 0x1e7   :  { %5315 = vmatpush1.bf16.msra.mxu0 %v8248_v53  ;;  %5874 = vmatpush1.bf16.msra.mxu1 %v8251_v54  ;;  %v8349_v53 = vld [vmem:[%s11392_s1 + $0x1124] ss:$16 sps:$4 sm:$0xff]   ;;  %v8352_v54 = vld [vmem:[%s11392_s1 + $0x112c] ss:$16 sps:$4 sm:$0xff]  }
 0x1e8   :  { %5316 = vmatprep.subr.bf16.mxu0 %v8256_v55  ;;  %5875 = vmatprep.subr.bf16.mxu1 %v8259_v56  ;;  %v8347_v55 = vld [vmem:[%s11392_s1 + $0x1120] ss:$16 sps:$4 sm:$0xff]   ;;  %v8350_v56 = vld [vmem:[%s11392_s1 + $0x1128] ss:$16 sps:$4 sm:$0xff]  }
 0x1eb   :  { %5317 = vmatpush1.bf16.msra.mxu0 %v8254_v57  ;;  %5876 = vmatpush1.bf16.msra.mxu1 %v8257_v58  ;;  %v8355_v57 = vld [vmem:[%s11392_s1 + $0x1144] ss:$16 sps:$4 sm:$0xff]   ;;  %v8358_v58 = vld [vmem:[%s11392_s1 + $0x114c] ss:$16 sps:$4 sm:$0xff]  }
 0x1ec   :  { %5318 = vmatprep.subr.bf16.mxu0 %v8262_v59  ;;  %5877 = vmatprep.subr.bf16.mxu1 %v8265_v60  ;;  %v8353_v59 = vld [vmem:[%s11392_s1 + $0x1140] ss:$16 sps:$4 sm:$0xff]   ;;  %v8356_v60 = vld [vmem:[%s11392_s1 + $0x1148] ss:$16 sps:$4 sm:$0xff]  }
 0x1ef   :  { %5319 = vmatpush1.bf16.msra.mxu0 %v8260_v61  ;;  %5878 = vmatpush1.bf16.msra.mxu1 %v8263_v62  ;;  %v8361_v61 = vld [vmem:[%s11392_s1 + $0x1164] ss:$16 sps:$4 sm:$0xff]   ;;  %v8364_v62 = vld [vmem:[%s11392_s1 + $0x116c] ss:$16 sps:$4 sm:$0xff]  }
 0x1f0   :  { %5320 = vmatprep.subr.bf16.mxu0 %v8268_v63  ;;  %5879 = vmatprep.subr.bf16.mxu1 %v8271_v0  ;;  %v8359_v63 = vld [vmem:[%s11392_s1 + $0x1160] ss:$16 sps:$4 sm:$0xff]   ;;  %v8362_v0 = vld [vmem:[%s11392_s1 + $0x1168] ss:$16 sps:$4 sm:$0xff]  }
 0x1f3   :  { %5321 = vmatpush1.bf16.msra.mxu0 %v8266_v1  ;;  %5880 = vmatpush1.bf16.msra.mxu1 %v8269_v2  ;;  %v8367_v1 = vld [vmem:[%s11392_s1 + $0x1184] ss:$16 sps:$4 sm:$0xff]   ;;  %v8370_v2 = vld [vmem:[%s11392_s1 + $0x118c] ss:$16 sps:$4 sm:$0xff]  }
 0x1f4   :  { %5322 = vmatprep.subr.bf16.mxu0 %v8274_v3  ;;  %5881 = vmatprep.subr.bf16.mxu1 %v8277_v4  ;;  %v8365_v3 = vld [vmem:[%s11392_s1 + $0x1180] ss:$16 sps:$4 sm:$0xff]   ;;  %v8368_v4 = vld [vmem:[%s11392_s1 + $0x1188] ss:$16 sps:$4 sm:$0xff]  }
 0x1f7   :  { %5323 = vmatpush1.bf16.msra.mxu0 %v8272_v5  ;;  %5882 = vmatpush1.bf16.msra.mxu1 %v8275_v6  ;;  %v8373_v5 = vld [vmem:[%s11392_s1 + $0x11a4] ss:$16 sps:$4 sm:$0xff]   ;;  %v8376_v6 = vld [vmem:[%s11392_s1 + $0x11ac] ss:$16 sps:$4 sm:$0xff]  }
 0x1f8   :  { %5324 = vmatprep.subr.bf16.mxu0 %v8280_v7  ;;  %5883 = vmatprep.subr.bf16.mxu1 %v8283_v8  ;;  %v8371_v7 = vld [vmem:[%s11392_s1 + $0x11a0] ss:$16 sps:$4 sm:$0xff]   ;;  %v8374_v8 = vld [vmem:[%s11392_s1 + $0x11a8] ss:$16 sps:$4 sm:$0xff]  }
 0x1fb   :  { %5325 = vmatpush1.bf16.msra.mxu0 %v8278_v9  ;;  %5884 = vmatpush1.bf16.msra.mxu1 %v8281_v10  ;;  %v8379_v9 = vld [vmem:[%s11392_s1 + $0x11c4] ss:$16 sps:$4 sm:$0xff]   ;;  %v8382_v10 = vld [vmem:[%s11392_s1 + $0x11cc] ss:$16 sps:$4 sm:$0xff]  }
 0x1fc   :  { %5326 = vmatprep.subr.bf16.mxu0 %v8286_v11  ;;  %5885 = vmatprep.subr.bf16.mxu1 %v8289_v12  ;;  %v8377_v11 = vld [vmem:[%s11392_s1 + $0x11c0] ss:$16 sps:$4 sm:$0xff]   ;;  %v8380_v12 = vld [vmem:[%s11392_s1 + $0x11c8] ss:$16 sps:$4 sm:$0xff]  }
 0x1ff   :  { %5327 = vmatpush1.bf16.msra.mxu0 %v8284_v13  ;;  %5886 = vmatpush1.bf16.msra.mxu1 %v8287_v14  ;;  %v8385_v13 = vld [vmem:[%s11392_s1 + $0x11e4] ss:$16 sps:$4 sm:$0xff]   ;;  %v8388_v14 = vld [vmem:[%s11392_s1 + $0x11ec] ss:$16 sps:$4 sm:$0xff]  }
 0x200   :  { %5339 = vmatprep.subr.bf16.mxu0 %v8295_v15  ;;  %5898 = vmatprep.subr.bf16.mxu1 %v8298_v16  ;;  %v8383_v15 = vld [vmem:[%s11392_s1 + $0x11e0] ss:$16 sps:$4 sm:$0xff]   ;;  %v8386_v16 = vld [vmem:[%s11392_s1 + $0x11e8] ss:$16 sps:$4 sm:$0xff]  }
 0x202   :  { %5329 = vmatmul.mubr.bf16.vlgmr.msra.gmra.mrb[0].mxu0 %v8290_v17  ;;  %5888 = vmatmul.mubr.bf16.vlgmr.msra.gmra.mrb[0].mxu1 %v8290_v17  ;;  %v8394_v17 = vld [vmem:[%s11392_s1 + $0x1204] ss:$16 sps:$4 sm:$0xff]  }
 0x203   :  { %5340 = vmatpush1.bf16.msra.mxu0 %v8293_v18  ;;  %5899 = vmatpush1.bf16.msra.mxu1 %v8296_v19  ;;  %v8397_v18 = vld [vmem:[%s11392_s1 + $0x120c] ss:$16 sps:$4 sm:$0xff]   ;;  %v8389_v19 = vld [vmem:[%s11393_s0 + $0x40] ss:$100 sps:$4 sm:$0xff]  }
 0x204   :  { %5341 = vmatprep.subr.bf16.mxu0 %v8301_v20  ;;  %5900 = vmatprep.subr.bf16.mxu1 %v8304_v21  ;;  %v8392_v20 = vld [vmem:[%s11392_s1 + $0x1200] ss:$16 sps:$4 sm:$0xff]   ;;  %v8395_v21 = vld [vmem:[%s11392_s1 + $0x1208] ss:$16 sps:$4 sm:$0xff]  }
 0x205   :  { %5371 = vmatprep.mubr.bf16.mxu0 %v8391_v22  ;;  %5930 = vmatprep.mubr.bf16.mxu1 %v8391_v22  ;;  %v8400_v22 = vld [vmem:[%s11392_s1 + $0x1224] ss:$16 sps:$4 sm:$0xff]  }
 0x207   :  { %5342 = vmatpush1.bf16.msra.mxu0 %v8299_v23  ;;  %5901 = vmatpush1.bf16.msra.mxu1 %v8302_v24  ;;  %v8403_v23 = vld [vmem:[%s11392_s1 + $0x122c] ss:$16 sps:$4 sm:$0xff]  }
 0x208   :  { %5343 = vmatprep.subr.bf16.mxu0 %v8307_v25  ;;  %5902 = vmatprep.subr.bf16.mxu1 %v8310_v26  ;;  %v8490_v24 = vld [vmem:[%s11393_s0 + $0x4c] ss:$100 sps:$4 sm:$0xff]   ;;  %v8401_v26 = vld [vmem:[%s11392_s1 + $0x1228] ss:$16 sps:$4 sm:$0xff]  }
 0x209   :  { %v8398_v25 = vld [vmem:[%s11392_s1 + $0x1220] ss:$16 sps:$4 sm:$0xff]  }
 0x20b   :  { %5344 = vmatpush1.bf16.msra.mxu0 %v8305_v27  ;;  %5903 = vmatpush1.bf16.msra.mxu1 %v8308_v28  ;;  %v8406_v27 = vld [vmem:[%s11392_s1 + $0x1244] ss:$16 sps:$4 sm:$0xff]   ;;  %v8409_v28 = vld [vmem:[%s11392_s1 + $0x124c] ss:$16 sps:$4 sm:$0xff]  }
 0x20c   :  { %5345 = vmatprep.subr.bf16.mxu0 %v8313_v29  ;;  %5904 = vmatprep.subr.bf16.mxu1 %v8316_v30  ;;  %v8404_v29 = vld [vmem:[%s11392_s1 + $0x1240] ss:$16 sps:$4 sm:$0xff]   ;;  %v8407_v30 = vld [vmem:[%s11392_s1 + $0x1248] ss:$16 sps:$4 sm:$0xff]  }
 0x20f   :  { %5346 = vmatpush1.bf16.msra.mxu0 %v8311_v31  ;;  %5905 = vmatpush1.bf16.msra.mxu1 %v8314_v32  ;;  %v8412_v31 = vld [vmem:[%s11392_s1 + $0x1264] ss:$16 sps:$4 sm:$0xff]   ;;  %v8415_v32 = vld [vmem:[%s11392_s1 + $0x126c] ss:$16 sps:$4 sm:$0xff]  }
 0x210   :  { %5347 = vmatprep.subr.bf16.mxu0 %v8319_v33  ;;  %5906 = vmatprep.subr.bf16.mxu1 %v8322_v34  ;;  %v8410_v33 = vld [vmem:[%s11392_s1 + $0x1260] ss:$16 sps:$4 sm:$0xff]   ;;  %v8413_v34 = vld [vmem:[%s11392_s1 + $0x1268] ss:$16 sps:$4 sm:$0xff]  }
 0x213   :  { %5348 = vmatpush1.bf16.msra.mxu0 %v8317_v35  ;;  %5907 = vmatpush1.bf16.msra.mxu1 %v8320_v36  ;;  %v8418_v35 = vld [vmem:[%s11392_s1 + $0x1284] ss:$16 sps:$4 sm:$0xff]   ;;  %v8421_v36 = vld [vmem:[%s11392_s1 + $0x128c] ss:$16 sps:$4 sm:$0xff]  }
 0x214   :  { %5349 = vmatprep.subr.bf16.mxu0 %v8325_v37  ;;  %5908 = vmatprep.subr.bf16.mxu1 %v8328_v38  ;;  %v8416_v37 = vld [vmem:[%s11392_s1 + $0x1280] ss:$16 sps:$4 sm:$0xff]   ;;  %v8419_v38 = vld [vmem:[%s11392_s1 + $0x1288] ss:$16 sps:$4 sm:$0xff]  }
 0x217   :  { %5350 = vmatpush1.bf16.msra.mxu0 %v8323_v39  ;;  %5909 = vmatpush1.bf16.msra.mxu1 %v8326_v40  ;;  %v8424_v39 = vld [vmem:[%s11392_s1 + $0x12a4] ss:$16 sps:$4 sm:$0xff]   ;;  %v8427_v40 = vld [vmem:[%s11392_s1 + $0x12ac] ss:$16 sps:$4 sm:$0xff]  }
 0x218   :  { %5351 = vmatprep.subr.bf16.mxu0 %v8331_v41  ;;  %5910 = vmatprep.subr.bf16.mxu1 %v8334_v42  ;;  %v8422_v41 = vld [vmem:[%s11392_s1 + $0x12a0] ss:$16 sps:$4 sm:$0xff]   ;;  %v8425_v42 = vld [vmem:[%s11392_s1 + $0x12a8] ss:$16 sps:$4 sm:$0xff]  }
 0x21b   :  { %5352 = vmatpush1.bf16.msra.mxu0 %v8329_v43  ;;  %5911 = vmatpush1.bf16.msra.mxu1 %v8332_v44  ;;  %v8430_v43 = vld [vmem:[%s11392_s1 + $0x12c4] ss:$16 sps:$4 sm:$0xff]   ;;  %v8433_v44 = vld [vmem:[%s11392_s1 + $0x12cc] ss:$16 sps:$4 sm:$0xff]  }
 0x21c   :  { %5353 = vmatprep.subr.bf16.mxu0 %v8337_v45  ;;  %5912 = vmatprep.subr.bf16.mxu1 %v8340_v46  ;;  %v8428_v45 = vld [vmem:[%s11392_s1 + $0x12c0] ss:$16 sps:$4 sm:$0xff]   ;;  %v8431_v46 = vld [vmem:[%s11392_s1 + $0x12c8] ss:$16 sps:$4 sm:$0xff]  }
 0x21f   :  { %5354 = vmatpush1.bf16.msra.mxu0 %v8335_v47  ;;  %5913 = vmatpush1.bf16.msra.mxu1 %v8338_v48  ;;  %v8436_v47 = vld [vmem:[%s11392_s1 + $0x12e4] ss:$16 sps:$4 sm:$0xff]   ;;  %v8439_v48 = vld [vmem:[%s11392_s1 + $0x12ec] ss:$16 sps:$4 sm:$0xff]  }
 0x220   :  { %5355 = vmatprep.subr.bf16.mxu0 %v8343_v49  ;;  %5914 = vmatprep.subr.bf16.mxu1 %v8346_v50  ;;  %v8434_v49 = vld [vmem:[%s11392_s1 + $0x12e0] ss:$16 sps:$4 sm:$0xff]   ;;  %v8437_v50 = vld [vmem:[%s11392_s1 + $0x12e8] ss:$16 sps:$4 sm:$0xff]  }
 0x223   :  { %5356 = vmatpush1.bf16.msra.mxu0 %v8341_v51  ;;  %5915 = vmatpush1.bf16.msra.mxu1 %v8344_v52  ;;  %v8442_v51 = vld [vmem:[%s11392_s1 + $0x1304] ss:$16 sps:$4 sm:$0xff]   ;;  %v8445_v52 = vld [vmem:[%s11392_s1 + $0x130c] ss:$16 sps:$4 sm:$0xff]  }
 0x224   :  { %5357 = vmatprep.subr.bf16.mxu0 %v8349_v53  ;;  %5916 = vmatprep.subr.bf16.mxu1 %v8352_v54  ;;  %v8440_v53 = vld [vmem:[%s11392_s1 + $0x1300] ss:$16 sps:$4 sm:$0xff]   ;;  %v8443_v54 = vld [vmem:[%s11392_s1 + $0x1308] ss:$16 sps:$4 sm:$0xff]  }
 0x227   :  { %5358 = vmatpush1.bf16.msra.mxu0 %v8347_v55  ;;  %5917 = vmatpush1.bf16.msra.mxu1 %v8350_v56  ;;  %v8448_v55 = vld [vmem:[%s11392_s1 + $0x1324] ss:$16 sps:$4 sm:$0xff]   ;;  %v8451_v56 = vld [vmem:[%s11392_s1 + $0x132c] ss:$16 sps:$4 sm:$0xff]  }
 0x228   :  { %5359 = vmatprep.subr.bf16.mxu0 %v8355_v57  ;;  %5918 = vmatprep.subr.bf16.mxu1 %v8358_v58  ;;  %v8446_v57 = vld [vmem:[%s11392_s1 + $0x1320] ss:$16 sps:$4 sm:$0xff]   ;;  %v8449_v58 = vld [vmem:[%s11392_s1 + $0x1328] ss:$16 sps:$4 sm:$0xff]  }
 0x22b   :  { %5360 = vmatpush1.bf16.msra.mxu0 %v8353_v59  ;;  %5919 = vmatpush1.bf16.msra.mxu1 %v8356_v60  ;;  %v8454_v59 = vld [vmem:[%s11392_s1 + $0x1344] ss:$16 sps:$4 sm:$0xff]   ;;  %v8457_v60 = vld [vmem:[%s11392_s1 + $0x134c] ss:$16 sps:$4 sm:$0xff]  }
 0x22c   :  { %5361 = vmatprep.subr.bf16.mxu0 %v8361_v61  ;;  %5920 = vmatprep.subr.bf16.mxu1 %v8364_v62  ;;  %v8452_v61 = vld [vmem:[%s11392_s1 + $0x1340] ss:$16 sps:$4 sm:$0xff]   ;;  %v8455_v62 = vld [vmem:[%s11392_s1 + $0x1348] ss:$16 sps:$4 sm:$0xff]  }
 0x22f   :  { %5362 = vmatpush1.bf16.msra.mxu0 %v8359_v63  ;;  %5921 = vmatpush1.bf16.msra.mxu1 %v8362_v0  ;;  %v8460_v63 = vld [vmem:[%s11392_s1 + $0x1364] ss:$16 sps:$4 sm:$0xff]   ;;  %v8463_v0 = vld [vmem:[%s11392_s1 + $0x136c] ss:$16 sps:$4 sm:$0xff]  }
 0x230   :  { %5363 = vmatprep.subr.bf16.mxu0 %v8367_v1  ;;  %5922 = vmatprep.subr.bf16.mxu1 %v8370_v2  ;;  %v8458_v1 = vld [vmem:[%s11392_s1 + $0x1360] ss:$16 sps:$4 sm:$0xff]   ;;  %v8461_v2 = vld [vmem:[%s11392_s1 + $0x1368] ss:$16 sps:$4 sm:$0xff]  }
 0x233   :  { %5364 = vmatpush1.bf16.msra.mxu0 %v8365_v3  ;;  %5923 = vmatpush1.bf16.msra.mxu1 %v8368_v4  ;;  %v8466_v3 = vld [vmem:[%s11392_s1 + $0x1384] ss:$16 sps:$4 sm:$0xff]   ;;  %v8469_v4 = vld [vmem:[%s11392_s1 + $0x138c] ss:$16 sps:$4 sm:$0xff]  }
 0x234   :  { %5365 = vmatprep.subr.bf16.mxu0 %v8373_v5  ;;  %5924 = vmatprep.subr.bf16.mxu1 %v8376_v6  ;;  %v8464_v5 = vld [vmem:[%s11392_s1 + $0x1380] ss:$16 sps:$4 sm:$0xff]   ;;  %v8467_v6 = vld [vmem:[%s11392_s1 + $0x1388] ss:$16 sps:$4 sm:$0xff]  }
 0x237   :  { %5366 = vmatpush1.bf16.msra.mxu0 %v8371_v7  ;;  %5925 = vmatpush1.bf16.msra.mxu1 %v8374_v8  ;;  %v8472_v7 = vld [vmem:[%s11392_s1 + $0x13a4] ss:$16 sps:$4 sm:$0xff]   ;;  %v8475_v8 = vld [vmem:[%s11392_s1 + $0x13ac] ss:$16 sps:$4 sm:$0xff]  }
 0x238   :  { %5367 = vmatprep.subr.bf16.mxu0 %v8379_v9  ;;  %5926 = vmatprep.subr.bf16.mxu1 %v8382_v10  ;;  %v8470_v9 = vld [vmem:[%s11392_s1 + $0x13a0] ss:$16 sps:$4 sm:$0xff]   ;;  %v8473_v10 = vld [vmem:[%s11392_s1 + $0x13a8] ss:$16 sps:$4 sm:$0xff]  }
 0x23b   :  { %5368 = vmatpush1.bf16.msra.mxu0 %v8377_v11  ;;  %5927 = vmatpush1.bf16.msra.mxu1 %v8380_v12  ;;  %v8478_v11 = vld [vmem:[%s11392_s1 + $0x13c4] ss:$16 sps:$4 sm:$0xff]   ;;  %v8481_v12 = vld [vmem:[%s11392_s1 + $0x13cc] ss:$16 sps:$4 sm:$0xff]  }
 0x23c   :  { %5369 = vmatprep.subr.bf16.mxu0 %v8385_v13  ;;  %5928 = vmatprep.subr.bf16.mxu1 %v8388_v14  ;;  %v8476_v13 = vld [vmem:[%s11392_s1 + $0x13c0] ss:$16 sps:$4 sm:$0xff]   ;;  %v8479_v14 = vld [vmem:[%s11392_s1 + $0x13c8] ss:$16 sps:$4 sm:$0xff]  }
 0x23f   :  { %5370 = vmatpush1.bf16.msra.mxu0 %v8383_v15  ;;  %5929 = vmatpush1.bf16.msra.mxu1 %v8386_v16  ;;  %v8484_v15 = vld [vmem:[%s11392_s1 + $0x13e4] ss:$16 sps:$4 sm:$0xff]   ;;  %v8487_v16 = vld [vmem:[%s11392_s1 + $0x13ec] ss:$16 sps:$4 sm:$0xff]  }
 0x240   :  { %5382 = vmatprep.subr.bf16.mxu0 %v8394_v17  ;;  %5941 = vmatprep.subr.bf16.mxu1 %v8397_v18  ;;  %v8482_v17 = vld [vmem:[%s11392_s1 + $0x13e0] ss:$16 sps:$4 sm:$0xff]   ;;  %v8485_v18 = vld [vmem:[%s11392_s1 + $0x13e8] ss:$16 sps:$4 sm:$0xff]  }
 0x242   :  { %5372 = vmatmul.mubr.bf16.vlgmr.msra.gmra.mrb[0].mxu0 %v8389_v19  ;;  %5931 = vmatmul.mubr.bf16.vlgmr.msra.gmra.mrb[0].mxu1 %v8389_v19  ;;  %v8493_v19 = vld [vmem:[%s11392_s1 + $0x1404] ss:$16 sps:$4 sm:$0xff]  }
 0x243   :  { %5383 = vmatpush1.bf16.msra.mxu0 %v8392_v20  ;;  %5942 = vmatpush1.bf16.msra.mxu1 %v8395_v21  ;;  %v8496_v20 = vld [vmem:[%s11392_s1 + $0x140c] ss:$16 sps:$4 sm:$0xff]  }
 0x244   :  { %5384 = vmatprep.subr.bf16.mxu0 %v8400_v22  ;;  %5943 = vmatprep.subr.bf16.mxu1 %v8403_v23  ;;  %v8488_v21 = vld [vmem:[%s11393_s0 + $0x48] ss:$100 sps:$4 sm:$0xff]   ;;  %v8491_v22 = vld [vmem:[%s11392_s1 + $0x1400] ss:$16 sps:$4 sm:$0xff]  }
 0x245   :  { %5414 = vmatprep.mubr.bf16.mxu0 %v8490_v24  ;;  %5973 = vmatprep.mubr.bf16.mxu1 %v8490_v24  ;;  %v8494_v23 = vld [vmem:[%s11392_s1 + $0x1408] ss:$16 sps:$4 sm:$0xff]   ;;  %v8499_v24 = vld [vmem:[%s11392_s1 + $0x1424] ss:$16 sps:$4 sm:$0xff]  }
 0x247   :  { %5385 = vmatpush1.bf16.msra.mxu0 %v8398_v25  ;;  %5944 = vmatpush1.bf16.msra.mxu1 %v8401_v26  ;;  %v8502_v25 = vld [vmem:[%s11392_s1 + $0x142c] ss:$16 sps:$4 sm:$0xff]   ;;  %v8589_v26 = vld [vmem:[%s11393_s0 + $0x54] ss:$100 sps:$4 sm:$0xff]  }
 0x248   :  { %5386 = vmatprep.subr.bf16.mxu0 %v8406_v27  ;;  %5945 = vmatprep.subr.bf16.mxu1 %v8409_v28  ;;  %v8497_v27 = vld [vmem:[%s11392_s1 + $0x1420] ss:$16 sps:$4 sm:$0xff]   ;;  %v8500_v28 = vld [vmem:[%s11392_s1 + $0x1428] ss:$16 sps:$4 sm:$0xff]  }
 0x24b   :  { %5387 = vmatpush1.bf16.msra.mxu0 %v8404_v29  ;;  %5946 = vmatpush1.bf16.msra.mxu1 %v8407_v30  ;;  %v8505_v29 = vld [vmem:[%s11392_s1 + $0x1444] ss:$16 sps:$4 sm:$0xff]   ;;  %v8508_v30 = vld [vmem:[%s11392_s1 + $0x144c] ss:$16 sps:$4 sm:$0xff]  }
 0x24c   :  { %5388 = vmatprep.subr.bf16.mxu0 %v8412_v31  ;;  %5947 = vmatprep.subr.bf16.mxu1 %v8415_v32  ;;  %v8503_v31 = vld [vmem:[%s11392_s1 + $0x1440] ss:$16 sps:$4 sm:$0xff]   ;;  %v8506_v32 = vld [vmem:[%s11392_s1 + $0x1448] ss:$16 sps:$4 sm:$0xff]  }
 0x24f   :  { %5389 = vmatpush1.bf16.msra.mxu0 %v8410_v33  ;;  %5948 = vmatpush1.bf16.msra.mxu1 %v8413_v34  ;;  %v8511_v33 = vld [vmem:[%s11392_s1 + $0x1464] ss:$16 sps:$4 sm:$0xff]   ;;  %v8514_v34 = vld [vmem:[%s11392_s1 + $0x146c] ss:$16 sps:$4 sm:$0xff]  }
 0x250   :  { %5390 = vmatprep.subr.bf16.mxu0 %v8418_v35  ;;  %5949 = vmatprep.subr.bf16.mxu1 %v8421_v36  ;;  %v8509_v35 = vld [vmem:[%s11392_s1 + $0x1460] ss:$16 sps:$4 sm:$0xff]   ;;  %v8512_v36 = vld [vmem:[%s11392_s1 + $0x1468] ss:$16 sps:$4 sm:$0xff]  }
 0x253   :  { %5391 = vmatpush1.bf16.msra.mxu0 %v8416_v37  ;;  %5950 = vmatpush1.bf16.msra.mxu1 %v8419_v38  ;;  %v8517_v37 = vld [vmem:[%s11392_s1 + $0x1484] ss:$16 sps:$4 sm:$0xff]   ;;  %v8520_v38 = vld [vmem:[%s11392_s1 + $0x148c] ss:$16 sps:$4 sm:$0xff]  }
 0x254   :  { %5392 = vmatprep.subr.bf16.mxu0 %v8424_v39  ;;  %5951 = vmatprep.subr.bf16.mxu1 %v8427_v40  ;;  %v8515_v39 = vld [vmem:[%s11392_s1 + $0x1480] ss:$16 sps:$4 sm:$0xff]   ;;  %v8518_v40 = vld [vmem:[%s11392_s1 + $0x1488] ss:$16 sps:$4 sm:$0xff]  }
 0x257   :  { %5393 = vmatpush1.bf16.msra.mxu0 %v8422_v41  ;;  %5952 = vmatpush1.bf16.msra.mxu1 %v8425_v42  ;;  %v8523_v41 = vld [vmem:[%s11392_s1 + $0x14a4] ss:$16 sps:$4 sm:$0xff]   ;;  %v8526_v42 = vld [vmem:[%s11392_s1 + $0x14ac] ss:$16 sps:$4 sm:$0xff]  }
 0x258   :  { %5394 = vmatprep.subr.bf16.mxu0 %v8430_v43  ;;  %5953 = vmatprep.subr.bf16.mxu1 %v8433_v44  ;;  %v8521_v43 = vld [vmem:[%s11392_s1 + $0x14a0] ss:$16 sps:$4 sm:$0xff]   ;;  %v8524_v44 = vld [vmem:[%s11392_s1 + $0x14a8] ss:$16 sps:$4 sm:$0xff]  }
 0x25b   :  { %5395 = vmatpush1.bf16.msra.mxu0 %v8428_v45  ;;  %5954 = vmatpush1.bf16.msra.mxu1 %v8431_v46  ;;  %v8529_v45 = vld [vmem:[%s11392_s1 + $0x14c4] ss:$16 sps:$4 sm:$0xff]   ;;  %v8532_v46 = vld [vmem:[%s11392_s1 + $0x14cc] ss:$16 sps:$4 sm:$0xff]  }
 0x25c   :  { %5396 = vmatprep.subr.bf16.mxu0 %v8436_v47  ;;  %5955 = vmatprep.subr.bf16.mxu1 %v8439_v48  ;;  %v8527_v47 = vld [vmem:[%s11392_s1 + $0x14c0] ss:$16 sps:$4 sm:$0xff]   ;;  %v8530_v48 = vld [vmem:[%s11392_s1 + $0x14c8] ss:$16 sps:$4 sm:$0xff]  }
 0x25f   :  { %5397 = vmatpush1.bf16.msra.mxu0 %v8434_v49  ;;  %5956 = vmatpush1.bf16.msra.mxu1 %v8437_v50  ;;  %v8535_v49 = vld [vmem:[%s11392_s1 + $0x14e4] ss:$16 sps:$4 sm:$0xff]   ;;  %v8538_v50 = vld [vmem:[%s11392_s1 + $0x14ec] ss:$16 sps:$4 sm:$0xff]  }
 0x260   :  { %5398 = vmatprep.subr.bf16.mxu0 %v8442_v51  ;;  %5957 = vmatprep.subr.bf16.mxu1 %v8445_v52  ;;  %v8533_v51 = vld [vmem:[%s11392_s1 + $0x14e0] ss:$16 sps:$4 sm:$0xff]   ;;  %v8536_v52 = vld [vmem:[%s11392_s1 + $0x14e8] ss:$16 sps:$4 sm:$0xff]  }
 0x263   :  { %5399 = vmatpush1.bf16.msra.mxu0 %v8440_v53  ;;  %5958 = vmatpush1.bf16.msra.mxu1 %v8443_v54  ;;  %v8541_v53 = vld [vmem:[%s11392_s1 + $0x1504] ss:$16 sps:$4 sm:$0xff]   ;;  %v8544_v54 = vld [vmem:[%s11392_s1 + $0x150c] ss:$16 sps:$4 sm:$0xff]  }
 0x264   :  { %5400 = vmatprep.subr.bf16.mxu0 %v8448_v55  ;;  %5959 = vmatprep.subr.bf16.mxu1 %v8451_v56  ;;  %v8539_v55 = vld [vmem:[%s11392_s1 + $0x1500] ss:$16 sps:$4 sm:$0xff]   ;;  %v8542_v56 = vld [vmem:[%s11392_s1 + $0x1508] ss:$16 sps:$4 sm:$0xff]  }
 0x267   :  { %5401 = vmatpush1.bf16.msra.mxu0 %v8446_v57  ;;  %5960 = vmatpush1.bf16.msra.mxu1 %v8449_v58  ;;  %v8547_v57 = vld [vmem:[%s11392_s1 + $0x1524] ss:$16 sps:$4 sm:$0xff]   ;;  %v8550_v58 = vld [vmem:[%s11392_s1 + $0x152c] ss:$16 sps:$4 sm:$0xff]  }
 0x268   :  { %5402 = vmatprep.subr.bf16.mxu0 %v8454_v59  ;;  %5961 = vmatprep.subr.bf16.mxu1 %v8457_v60  ;;  %v8545_v59 = vld [vmem:[%s11392_s1 + $0x1520] ss:$16 sps:$4 sm:$0xff]   ;;  %v8548_v60 = vld [vmem:[%s11392_s1 + $0x1528] ss:$16 sps:$4 sm:$0xff]  }
 0x26b   :  { %5403 = vmatpush1.bf16.msra.mxu0 %v8452_v61  ;;  %5962 = vmatpush1.bf16.msra.mxu1 %v8455_v62  ;;  %v8553_v61 = vld [vmem:[%s11392_s1 + $0x1544] ss:$16 sps:$4 sm:$0xff]   ;;  %v8556_v62 = vld [vmem:[%s11392_s1 + $0x154c] ss:$16 sps:$4 sm:$0xff]  }
 0x26c   :  { %5404 = vmatprep.subr.bf16.mxu0 %v8460_v63  ;;  %5963 = vmatprep.subr.bf16.mxu1 %v8463_v0  ;;  %v8551_v63 = vld [vmem:[%s11392_s1 + $0x1540] ss:$16 sps:$4 sm:$0xff]   ;;  %v8554_v0 = vld [vmem:[%s11392_s1 + $0x1548] ss:$16 sps:$4 sm:$0xff]  }
 0x26f   :  { %5405 = vmatpush1.bf16.msra.mxu0 %v8458_v1  ;;  %5964 = vmatpush1.bf16.msra.mxu1 %v8461_v2  ;;  %v8559_v1 = vld [vmem:[%s11392_s1 + $0x1564] ss:$16 sps:$4 sm:$0xff]   ;;  %v8562_v2 = vld [vmem:[%s11392_s1 + $0x156c] ss:$16 sps:$4 sm:$0xff]  }
 0x270   :  { %5406 = vmatprep.subr.bf16.mxu0 %v8466_v3  ;;  %5965 = vmatprep.subr.bf16.mxu1 %v8469_v4  ;;  %v8557_v3 = vld [vmem:[%s11392_s1 + $0x1560] ss:$16 sps:$4 sm:$0xff]   ;;  %v8560_v4 = vld [vmem:[%s11392_s1 + $0x1568] ss:$16 sps:$4 sm:$0xff]  }
 0x273   :  { %5407 = vmatpush1.bf16.msra.mxu0 %v8464_v5  ;;  %5966 = vmatpush1.bf16.msra.mxu1 %v8467_v6  ;;  %v8565_v5 = vld [vmem:[%s11392_s1 + $0x1584] ss:$16 sps:$4 sm:$0xff]   ;;  %v8568_v6 = vld [vmem:[%s11392_s1 + $0x158c] ss:$16 sps:$4 sm:$0xff]  }
 0x274   :  { %5408 = vmatprep.subr.bf16.mxu0 %v8472_v7  ;;  %5967 = vmatprep.subr.bf16.mxu1 %v8475_v8  ;;  %v8563_v7 = vld [vmem:[%s11392_s1 + $0x1580] ss:$16 sps:$4 sm:$0xff]   ;;  %v8566_v8 = vld [vmem:[%s11392_s1 + $0x1588] ss:$16 sps:$4 sm:$0xff]  }
 0x277   :  { %5409 = vmatpush1.bf16.msra.mxu0 %v8470_v9  ;;  %5968 = vmatpush1.bf16.msra.mxu1 %v8473_v10  ;;  %v8571_v9 = vld [vmem:[%s11392_s1 + $0x15a4] ss:$16 sps:$4 sm:$0xff]   ;;  %v8574_v10 = vld [vmem:[%s11392_s1 + $0x15ac] ss:$16 sps:$4 sm:$0xff]  }
 0x278   :  { %5410 = vmatprep.subr.bf16.mxu0 %v8478_v11  ;;  %5969 = vmatprep.subr.bf16.mxu1 %v8481_v12  ;;  %v8569_v11 = vld [vmem:[%s11392_s1 + $0x15a0] ss:$16 sps:$4 sm:$0xff]   ;;  %v8572_v12 = vld [vmem:[%s11392_s1 + $0x15a8] ss:$16 sps:$4 sm:$0xff]  }
 0x27b   :  { %5411 = vmatpush1.bf16.msra.mxu0 %v8476_v13  ;;  %5970 = vmatpush1.bf16.msra.mxu1 %v8479_v14  ;;  %v8577_v13 = vld [vmem:[%s11392_s1 + $0x15c4] ss:$16 sps:$4 sm:$0xff]   ;;  %v8580_v14 = vld [vmem:[%s11392_s1 + $0x15cc] ss:$16 sps:$4 sm:$0xff]  }
 0x27c   :  { %5412 = vmatprep.subr.bf16.mxu0 %v8484_v15  ;;  %5971 = vmatprep.subr.bf16.mxu1 %v8487_v16  ;;  %v8575_v15 = vld [vmem:[%s11392_s1 + $0x15c0] ss:$16 sps:$4 sm:$0xff]   ;;  %v8578_v16 = vld [vmem:[%s11392_s1 + $0x15c8] ss:$16 sps:$4 sm:$0xff]  }
 0x27f   :  { %5413 = vmatpush1.bf16.msra.mxu0 %v8482_v17  ;;  %5972 = vmatpush1.bf16.msra.mxu1 %v8485_v18  ;;  %v8583_v17 = vld [vmem:[%s11392_s1 + $0x15e4] ss:$16 sps:$4 sm:$0xff]   ;;  %v8586_v18 = vld [vmem:[%s11392_s1 + $0x15ec] ss:$16 sps:$4 sm:$0xff]  }
 0x280   :  { %5425 = vmatprep.subr.bf16.mxu0 %v8493_v19  ;;  %5984 = vmatprep.subr.bf16.mxu1 %v8496_v20  ;;  %v8581_v19 = vld [vmem:[%s11392_s1 + $0x15e0] ss:$16 sps:$4 sm:$0xff]   ;;  %v8584_v20 = vld [vmem:[%s11392_s1 + $0x15e8] ss:$16 sps:$4 sm:$0xff]  }
 0x282   :  { %5415 = vmatmul.mubr.bf16.vlgmr.msra.gmra.mrb[0].mxu0 %v8488_v21  ;;  %5974 = vmatmul.mubr.bf16.vlgmr.msra.gmra.mrb[0].mxu1 %v8488_v21  ;;  %v8592_v21 = vld [vmem:[%s11392_s1 + $0x1604] ss:$16 sps:$4 sm:$0xff]  }
 0x283   :  { %5426 = vmatpush1.bf16.msra.mxu0 %v8491_v22  ;;  %5985 = vmatpush1.bf16.msra.mxu1 %v8494_v23  ;;  %v8595_v22 = vld [vmem:[%s11392_s1 + $0x160c] ss:$16 sps:$4 sm:$0xff]   ;;  %v8587_v23 = vld [vmem:[%s11393_s0 + $0x50] ss:$100 sps:$4 sm:$0xff]  }
 0x284   :  { %5427 = vmatprep.subr.bf16.mxu0 %v8499_v24  ;;  %5986 = vmatprep.subr.bf16.mxu1 %v8502_v25  ;;  %v8590_v24 = vld [vmem:[%s11392_s1 + $0x1600] ss:$16 sps:$4 sm:$0xff]   ;;  %v8593_v25 = vld [vmem:[%s11392_s1 + $0x1608] ss:$16 sps:$4 sm:$0xff]  }
 0x285   :  { %5457 = vmatprep.mubr.bf16.mxu0 %v8589_v26  ;;  %6016 = vmatprep.mubr.bf16.mxu1 %v8589_v26  ;;  %v8598_v26 = vld [vmem:[%s11392_s1 + $0x1624] ss:$16 sps:$4 sm:$0xff]  }
 0x287   :  { %5428 = vmatpush1.bf16.msra.mxu0 %v8497_v27  ;;  %5987 = vmatpush1.bf16.msra.mxu1 %v8500_v28  ;;  %v8601_v27 = vld [vmem:[%s11392_s1 + $0x162c] ss:$16 sps:$4 sm:$0xff]  }
 0x288   :  { %5429 = vmatprep.subr.bf16.mxu0 %v8505_v29  ;;  %5988 = vmatprep.subr.bf16.mxu1 %v8508_v30  ;;  %v8688_v28 = vld [vmem:[%s11393_s0 + $0x5c] ss:$100 sps:$4 sm:$0xff]   ;;  %v8599_v30 = vld [vmem:[%s11392_s1 + $0x1628] ss:$16 sps:$4 sm:$0xff]  }
 0x289   :  { %v8596_v29 = vld [vmem:[%s11392_s1 + $0x1620] ss:$16 sps:$4 sm:$0xff]  }
 0x28b   :  { %5430 = vmatpush1.bf16.msra.mxu0 %v8503_v31  ;;  %5989 = vmatpush1.bf16.msra.mxu1 %v8506_v32  ;;  %v8604_v31 = vld [vmem:[%s11392_s1 + $0x1644] ss:$16 sps:$4 sm:$0xff]   ;;  %v8607_v32 = vld [vmem:[%s11392_s1 + $0x164c] ss:$16 sps:$4 sm:$0xff]  }
 0x28c   :  { %5431 = vmatprep.subr.bf16.mxu0 %v8511_v33  ;;  %5990 = vmatprep.subr.bf16.mxu1 %v8514_v34  ;;  %v8602_v33 = vld [vmem:[%s11392_s1 + $0x1640] ss:$16 sps:$4 sm:$0xff]   ;;  %v8605_v34 = vld [vmem:[%s11392_s1 + $0x1648] ss:$16 sps:$4 sm:$0xff]  }
 0x28f   :  { %5432 = vmatpush1.bf16.msra.mxu0 %v8509_v35  ;;  %5991 = vmatpush1.bf16.msra.mxu1 %v8512_v36  ;;  %v8610_v35 = vld [vmem:[%s11392_s1 + $0x1664] ss:$16 sps:$4 sm:$0xff]   ;;  %v8613_v36 = vld [vmem:[%s11392_s1 + $0x166c] ss:$16 sps:$4 sm:$0xff]  }
 0x290   :  { %5433 = vmatprep.subr.bf16.mxu0 %v8517_v37  ;;  %5992 = vmatprep.subr.bf16.mxu1 %v8520_v38  ;;  %v8608_v37 = vld [vmem:[%s11392_s1 + $0x1660] ss:$16 sps:$4 sm:$0xff]   ;;  %v8611_v38 = vld [vmem:[%s11392_s1 + $0x1668] ss:$16 sps:$4 sm:$0xff]  }
 0x293   :  { %5434 = vmatpush1.bf16.msra.mxu0 %v8515_v39  ;;  %5993 = vmatpush1.bf16.msra.mxu1 %v8518_v40  ;;  %v8616_v39 = vld [vmem:[%s11392_s1 + $0x1684] ss:$16 sps:$4 sm:$0xff]   ;;  %v8619_v40 = vld [vmem:[%s11392_s1 + $0x168c] ss:$16 sps:$4 sm:$0xff]  }
 0x294   :  { %5435 = vmatprep.subr.bf16.mxu0 %v8523_v41  ;;  %5994 = vmatprep.subr.bf16.mxu1 %v8526_v42  ;;  %v8614_v41 = vld [vmem:[%s11392_s1 + $0x1680] ss:$16 sps:$4 sm:$0xff]   ;;  %v8617_v42 = vld [vmem:[%s11392_s1 + $0x1688] ss:$16 sps:$4 sm:$0xff]  }
 0x297   :  { %5436 = vmatpush1.bf16.msra.mxu0 %v8521_v43  ;;  %5995 = vmatpush1.bf16.msra.mxu1 %v8524_v44  ;;  %v8622_v43 = vld [vmem:[%s11392_s1 + $0x16a4] ss:$16 sps:$4 sm:$0xff]   ;;  %v8625_v44 = vld [vmem:[%s11392_s1 + $0x16ac] ss:$16 sps:$4 sm:$0xff]  }
 0x298   :  { %5437 = vmatprep.subr.bf16.mxu0 %v8529_v45  ;;  %5996 = vmatprep.subr.bf16.mxu1 %v8532_v46  ;;  %v8620_v45 = vld [vmem:[%s11392_s1 + $0x16a0] ss:$16 sps:$4 sm:$0xff]   ;;  %v8623_v46 = vld [vmem:[%s11392_s1 + $0x16a8] ss:$16 sps:$4 sm:$0xff]  }
 0x29b   :  { %5438 = vmatpush1.bf16.msra.mxu0 %v8527_v47  ;;  %5997 = vmatpush1.bf16.msra.mxu1 %v8530_v48  ;;  %v8628_v47 = vld [vmem:[%s11392_s1 + $0x16c4] ss:$16 sps:$4 sm:$0xff]   ;;  %v8631_v48 = vld [vmem:[%s11392_s1 + $0x16cc] ss:$16 sps:$4 sm:$0xff]  }
 0x29c   :  { %5439 = vmatprep.subr.bf16.mxu0 %v8535_v49  ;;  %5998 = vmatprep.subr.bf16.mxu1 %v8538_v50  ;;  %v8626_v49 = vld [vmem:[%s11392_s1 + $0x16c0] ss:$16 sps:$4 sm:$0xff]   ;;  %v8629_v50 = vld [vmem:[%s11392_s1 + $0x16c8] ss:$16 sps:$4 sm:$0xff]  }
 0x29f   :  { %5440 = vmatpush1.bf16.msra.mxu0 %v8533_v51  ;;  %5999 = vmatpush1.bf16.msra.mxu1 %v8536_v52  ;;  %v8634_v51 = vld [vmem:[%s11392_s1 + $0x16e4] ss:$16 sps:$4 sm:$0xff]   ;;  %v8637_v52 = vld [vmem:[%s11392_s1 + $0x16ec] ss:$16 sps:$4 sm:$0xff]  }
 0x2a0   :  { %5441 = vmatprep.subr.bf16.mxu0 %v8541_v53  ;;  %6000 = vmatprep.subr.bf16.mxu1 %v8544_v54  ;;  %v8632_v53 = vld [vmem:[%s11392_s1 + $0x16e0] ss:$16 sps:$4 sm:$0xff]   ;;  %v8635_v54 = vld [vmem:[%s11392_s1 + $0x16e8] ss:$16 sps:$4 sm:$0xff]  }
 0x2a3   :  { %5442 = vmatpush1.bf16.msra.mxu0 %v8539_v55  ;;  %6001 = vmatpush1.bf16.msra.mxu1 %v8542_v56  ;;  %v8640_v55 = vld [vmem:[%s11392_s1 + $0x1704] ss:$16 sps:$4 sm:$0xff]   ;;  %v8643_v56 = vld [vmem:[%s11392_s1 + $0x170c] ss:$16 sps:$4 sm:$0xff]  }
 0x2a4   :  { %5443 = vmatprep.subr.bf16.mxu0 %v8547_v57  ;;  %6002 = vmatprep.subr.bf16.mxu1 %v8550_v58  ;;  %v8638_v57 = vld [vmem:[%s11392_s1 + $0x1700] ss:$16 sps:$4 sm:$0xff]   ;;  %v8641_v58 = vld [vmem:[%s11392_s1 + $0x1708] ss:$16 sps:$4 sm:$0xff]  }
 0x2a7   :  { %5444 = vmatpush1.bf16.msra.mxu0 %v8545_v59  ;;  %6003 = vmatpush1.bf16.msra.mxu1 %v8548_v60  ;;  %v8646_v59 = vld [vmem:[%s11392_s1 + $0x1724] ss:$16 sps:$4 sm:$0xff]   ;;  %v8649_v60 = vld [vmem:[%s11392_s1 + $0x172c] ss:$16 sps:$4 sm:$0xff]  }
 0x2a8   :  { %5445 = vmatprep.subr.bf16.mxu0 %v8553_v61  ;;  %6004 = vmatprep.subr.bf16.mxu1 %v8556_v62  ;;  %v8644_v61 = vld [vmem:[%s11392_s1 + $0x1720] ss:$16 sps:$4 sm:$0xff]   ;;  %v8647_v62 = vld [vmem:[%s11392_s1 + $0x1728] ss:$16 sps:$4 sm:$0xff]  }
 0x2ab   :  { %5446 = vmatpush1.bf16.msra.mxu0 %v8551_v63  ;;  %6005 = vmatpush1.bf16.msra.mxu1 %v8554_v0  ;;  %v8652_v63 = vld [vmem:[%s11392_s1 + $0x1744] ss:$16 sps:$4 sm:$0xff]   ;;  %v8655_v0 = vld [vmem:[%s11392_s1 + $0x174c] ss:$16 sps:$4 sm:$0xff]  }
 0x2ac   :  { %5447 = vmatprep.subr.bf16.mxu0 %v8559_v1  ;;  %6006 = vmatprep.subr.bf16.mxu1 %v8562_v2  ;;  %v8650_v1 = vld [vmem:[%s11392_s1 + $0x1740] ss:$16 sps:$4 sm:$0xff]   ;;  %v8653_v2 = vld [vmem:[%s11392_s1 + $0x1748] ss:$16 sps:$4 sm:$0xff]  }
 0x2af   :  { %5448 = vmatpush1.bf16.msra.mxu0 %v8557_v3  ;;  %6007 = vmatpush1.bf16.msra.mxu1 %v8560_v4  ;;  %v8658_v3 = vld [vmem:[%s11392_s1 + $0x1764] ss:$16 sps:$4 sm:$0xff]   ;;  %v8661_v4 = vld [vmem:[%s11392_s1 + $0x176c] ss:$16 sps:$4 sm:$0xff]  }
 0x2b0   :  { %5449 = vmatprep.subr.bf16.mxu0 %v8565_v5  ;;  %6008 = vmatprep.subr.bf16.mxu1 %v8568_v6  ;;  %v8656_v5 = vld [vmem:[%s11392_s1 + $0x1760] ss:$16 sps:$4 sm:$0xff]   ;;  %v8659_v6 = vld [vmem:[%s11392_s1 + $0x1768] ss:$16 sps:$4 sm:$0xff]  }
 0x2b3   :  { %5450 = vmatpush1.bf16.msra.mxu0 %v8563_v7  ;;  %6009 = vmatpush1.bf16.msra.mxu1 %v8566_v8  ;;  %v8664_v7 = vld [vmem:[%s11392_s1 + $0x1784] ss:$16 sps:$4 sm:$0xff]   ;;  %v8667_v8 = vld [vmem:[%s11392_s1 + $0x178c] ss:$16 sps:$4 sm:$0xff]  }
 0x2b4   :  { %5451 = vmatprep.subr.bf16.mxu0 %v8571_v9  ;;  %6010 = vmatprep.subr.bf16.mxu1 %v8574_v10  ;;  %v8662_v9 = vld [vmem:[%s11392_s1 + $0x1780] ss:$16 sps:$4 sm:$0xff]   ;;  %v8665_v10 = vld [vmem:[%s11392_s1 + $0x1788] ss:$16 sps:$4 sm:$0xff]  }
 0x2b7   :  { %5452 = vmatpush1.bf16.msra.mxu0 %v8569_v11  ;;  %6011 = vmatpush1.bf16.msra.mxu1 %v8572_v12  ;;  %v8670_v11 = vld [vmem:[%s11392_s1 + $0x17a4] ss:$16 sps:$4 sm:$0xff]   ;;  %v8673_v12 = vld [vmem:[%s11392_s1 + $0x17ac] ss:$16 sps:$4 sm:$0xff]  }
 0x2b8   :  { %5453 = vmatprep.subr.bf16.mxu0 %v8577_v13  ;;  %6012 = vmatprep.subr.bf16.mxu1 %v8580_v14  ;;  %v8668_v13 = vld [vmem:[%s11392_s1 + $0x17a0] ss:$16 sps:$4 sm:$0xff]   ;;  %v8671_v14 = vld [vmem:[%s11392_s1 + $0x17a8] ss:$16 sps:$4 sm:$0xff]  }
 0x2bb   :  { %5454 = vmatpush1.bf16.msra.mxu0 %v8575_v15  ;;  %6013 = vmatpush1.bf16.msra.mxu1 %v8578_v16  ;;  %v8676_v15 = vld [vmem:[%s11392_s1 + $0x17c4] ss:$16 sps:$4 sm:$0xff]   ;;  %v8679_v16 = vld [vmem:[%s11392_s1 + $0x17cc] ss:$16 sps:$4 sm:$0xff]  }
 0x2bc   :  { %5455 = vmatprep.subr.bf16.mxu0 %v8583_v17  ;;  %6014 = vmatprep.subr.bf16.mxu1 %v8586_v18  ;;  %v8674_v17 = vld [vmem:[%s11392_s1 + $0x17c0] ss:$16 sps:$4 sm:$0xff]   ;;  %v8677_v18 = vld [vmem:[%s11392_s1 + $0x17c8] ss:$16 sps:$4 sm:$0xff]  }
 0x2bf   :  { %5456 = vmatpush1.bf16.msra.mxu0 %v8581_v19  ;;  %6015 = vmatpush1.bf16.msra.mxu1 %v8584_v20  ;;  %v8682_v19 = vld [vmem:[%s11392_s1 + $0x17e4] ss:$16 sps:$4 sm:$0xff]   ;;  %v8685_v20 = vld [vmem:[%s11392_s1 + $0x17ec] ss:$16 sps:$4 sm:$0xff]  }
 0x2c0   :  { %5468 = vmatprep.subr.bf16.mxu0 %v8592_v21  ;;  %6027 = vmatprep.subr.bf16.mxu1 %v8595_v22  ;;  %v8680_v21 = vld [vmem:[%s11392_s1 + $0x17e0] ss:$16 sps:$4 sm:$0xff]   ;;  %v8683_v22 = vld [vmem:[%s11392_s1 + $0x17e8] ss:$16 sps:$4 sm:$0xff]  }
 0x2c2   :  { %5458 = vmatmul.mubr.bf16.vlgmr.msra.gmra.mrb[0].mxu0 %v8587_v23  ;;  %6017 = vmatmul.mubr.bf16.vlgmr.msra.gmra.mrb[0].mxu1 %v8587_v23  ;;  %v8691_v23 = vld [vmem:[%s11392_s1 + $0x1804] ss:$16 sps:$4 sm:$0xff]  }
 0x2c3   :  { %5469 = vmatpush1.bf16.msra.mxu0 %v8590_v24  ;;  %6028 = vmatpush1.bf16.msra.mxu1 %v8593_v25  ;;  %v8694_v24 = vld [vmem:[%s11392_s1 + $0x180c] ss:$16 sps:$4 sm:$0xff]  }
 0x2c4   :  { %5470 = vmatprep.subr.bf16.mxu0 %v8598_v26  ;;  %6029 = vmatprep.subr.bf16.mxu1 %v8601_v27  ;;  %v8686_v25 = vld [vmem:[%s11393_s0 + $0x58] ss:$100 sps:$4 sm:$0xff]   ;;  %v8689_v26 = vld [vmem:[%s11392_s1 + $0x1800] ss:$16 sps:$4 sm:$0xff]  }
 0x2c5   :  { %5500 = vmatprep.mubr.bf16.mxu0 %v8688_v28  ;;  %6059 = vmatprep.mubr.bf16.mxu1 %v8688_v28  ;;  %v8692_v27 = vld [vmem:[%s11392_s1 + $0x1808] ss:$16 sps:$4 sm:$0xff]   ;;  %v8697_v28 = vld [vmem:[%s11392_s1 + $0x1824] ss:$16 sps:$4 sm:$0xff]  }
 0x2c7   :  { %5471 = vmatpush1.bf16.msra.mxu0 %v8596_v29  ;;  %6030 = vmatpush1.bf16.msra.mxu1 %v8599_v30  ;;  %v8700_v29 = vld [vmem:[%s11392_s1 + $0x182c] ss:$16 sps:$4 sm:$0xff]   ;;  %v8695_v30 = vld [vmem:[%s11392_s1 + $0x1820] ss:$16 sps:$4 sm:$0xff]  }
 0x2c8   :  { %5472 = vmatprep.subr.bf16.mxu0 %v8604_v31  ;;  %6031 = vmatprep.subr.bf16.mxu1 %v8607_v32  ;;  %v8698_v31 = vld [vmem:[%s11392_s1 + $0x1828] ss:$16 sps:$4 sm:$0xff]   ;;  %v8703_v32 = vld [vmem:[%s11392_s1 + $0x1844] ss:$16 sps:$4 sm:$0xff]  }
 0x2cb   :  { %5473 = vmatpush1.bf16.msra.mxu0 %v8602_v33  ;;  %6032 = vmatpush1.bf16.msra.mxu1 %v8605_v34  ;;  %v8706_v33 = vld [vmem:[%s11392_s1 + $0x184c] ss:$16 sps:$4 sm:$0xff]   ;;  %v8778_v34 = vmov 0  }
 0x2cc   :  { %5474 = vmatprep.subr.bf16.mxu0 %v8610_v35  ;;  %6033 = vmatprep.subr.bf16.mxu1 %v8613_v36  ;;  %v8701_v35 = vld [vmem:[%s11392_s1 + $0x1840] ss:$16 sps:$4 sm:$0xff]   ;;  %v8704_v36 = vld [vmem:[%s11392_s1 + $0x1848] ss:$16 sps:$4 sm:$0xff]  }
 0x2cf   :  { %5475 = vmatpush1.bf16.msra.mxu0 %v8608_v37  ;;  %6034 = vmatpush1.bf16.msra.mxu1 %v8611_v38  ;;  %v8709_v37 = vld [vmem:[%s11392_s1 + $0x1864] ss:$16 sps:$4 sm:$0xff]   ;;  %v8712_v38 = vld [vmem:[%s11392_s1 + $0x186c] ss:$16 sps:$4 sm:$0xff]  }
 0x2d0   :  { %5476 = vmatprep.subr.bf16.mxu0 %v8616_v39  ;;  %6035 = vmatprep.subr.bf16.mxu1 %v8619_v40  ;;  %v8707_v39 = vld [vmem:[%s11392_s1 + $0x1860] ss:$16 sps:$4 sm:$0xff]   ;;  %v8710_v40 = vld [vmem:[%s11392_s1 + $0x1868] ss:$16 sps:$4 sm:$0xff]  }
 0x2d3   :  { %5477 = vmatpush1.bf16.msra.mxu0 %v8614_v41  ;;  %6036 = vmatpush1.bf16.msra.mxu1 %v8617_v42  ;;  %v8715_v41 = vld [vmem:[%s11392_s1 + $0x1884] ss:$16 sps:$4 sm:$0xff]   ;;  %v8718_v42 = vld [vmem:[%s11392_s1 + $0x188c] ss:$16 sps:$4 sm:$0xff]  }
 0x2d4   :  { %5478 = vmatprep.subr.bf16.mxu0 %v8622_v43  ;;  %6037 = vmatprep.subr.bf16.mxu1 %v8625_v44  ;;  %v8713_v43 = vld [vmem:[%s11392_s1 + $0x1880] ss:$16 sps:$4 sm:$0xff]   ;;  %v8716_v44 = vld [vmem:[%s11392_s1 + $0x1888] ss:$16 sps:$4 sm:$0xff]  }
 0x2d7   :  { %5479 = vmatpush1.bf16.msra.mxu0 %v8620_v45  ;;  %6038 = vmatpush1.bf16.msra.mxu1 %v8623_v46  ;;  %v8721_v45 = vld [vmem:[%s11392_s1 + $0x18a4] ss:$16 sps:$4 sm:$0xff]   ;;  %v8724_v46 = vld [vmem:[%s11392_s1 + $0x18ac] ss:$16 sps:$4 sm:$0xff]  }
 0x2d8   :  { %5480 = vmatprep.subr.bf16.mxu0 %v8628_v47  ;;  %6039 = vmatprep.subr.bf16.mxu1 %v8631_v48  ;;  %v8719_v47 = vld [vmem:[%s11392_s1 + $0x18a0] ss:$16 sps:$4 sm:$0xff]   ;;  %v8722_v48 = vld [vmem:[%s11392_s1 + $0x18a8] ss:$16 sps:$4 sm:$0xff]  }
 0x2db   :  { %5481 = vmatpush1.bf16.msra.mxu0 %v8626_v49  ;;  %6040 = vmatpush1.bf16.msra.mxu1 %v8629_v50  ;;  %v8727_v49 = vld [vmem:[%s11392_s1 + $0x18c4] ss:$16 sps:$4 sm:$0xff]   ;;  %v8730_v50 = vld [vmem:[%s11392_s1 + $0x18cc] ss:$16 sps:$4 sm:$0xff]  }
 0x2dc   :  { %5482 = vmatprep.subr.bf16.mxu0 %v8634_v51  ;;  %6041 = vmatprep.subr.bf16.mxu1 %v8637_v52  ;;  %v8725_v51 = vld [vmem:[%s11392_s1 + $0x18c0] ss:$16 sps:$4 sm:$0xff]   ;;  %v8728_v52 = vld [vmem:[%s11392_s1 + $0x18c8] ss:$16 sps:$4 sm:$0xff]  }
 0x2df   :  { %5483 = vmatpush1.bf16.msra.mxu0 %v8632_v53  ;;  %6042 = vmatpush1.bf16.msra.mxu1 %v8635_v54  ;;  %v8733_v53 = vld [vmem:[%s11392_s1 + $0x18e4] ss:$16 sps:$4 sm:$0xff]   ;;  %v8736_v54 = vld [vmem:[%s11392_s1 + $0x18ec] ss:$16 sps:$4 sm:$0xff]  }
 0x2e0   :  { %5484 = vmatprep.subr.bf16.mxu0 %v8640_v55  ;;  %6043 = vmatprep.subr.bf16.mxu1 %v8643_v56  ;;  %v8731_v55 = vld [vmem:[%s11392_s1 + $0x18e0] ss:$16 sps:$4 sm:$0xff]   ;;  %v8734_v56 = vld [vmem:[%s11392_s1 + $0x18e8] ss:$16 sps:$4 sm:$0xff]  }
 0x2e3   :  { %5485 = vmatpush1.bf16.msra.mxu0 %v8638_v57  ;;  %6044 = vmatpush1.bf16.msra.mxu1 %v8641_v58  ;;  %v8738_v57 = vld [vmem:[%s11394_s3 + $0x40] sm:$0xff]  }
 0x2e4   :  { %5486 = vmatprep.subr.bf16.mxu0 %v8646_v59  ;;  %6045 = vmatprep.subr.bf16.mxu1 %v8649_v60  ;;  %v8739_v58 = vld [vmem:[%s11394_s3 + $0xc0] sm:$0xff]  }
 0x2e5   :  { %v8737_v59 = vld [vmem:[%s11393_s0 + $0x60] ss:$100 sps:$4 sm:$0xff]  }
 0x2e6   :  { %v8740_v60 = vld [vmem:[%s11394_s3] sm:$0xff]  }
 0x2e7   :  { %5487 = vmatpush1.bf16.msra.mxu0 %v8644_v61  ;;  %6046 = vmatpush1.bf16.msra.mxu1 %v8647_v62  ;;  %v8741_v61 = vld [vmem:[%s11394_s3 + $0x80] sm:$0xff]   ;;  %v8742_v62 = vld [vmem:[%s11394_s3 + $0x48] sm:$0xff]  }
 0x2e8   :  { %5488 = vmatprep.subr.bf16.mxu0 %v8652_v63  ;;  %6047 = vmatprep.subr.bf16.mxu1 %v8655_v0  ;;  %v8743_v63 = vld [vmem:[%s11394_s3 + $0xc8] sm:$0xff]  }
 0x2e9   :  { %v8744_v0 = vld [vmem:[%s11394_s3 + $0x8] sm:$0xff]  }
 0x2eb   :  { %5489 = vmatpush1.bf16.msra.mxu0 %v8650_v1  ;;  %6048 = vmatpush1.bf16.msra.mxu1 %v8653_v2  ;;  %v8745_v1 = vld [vmem:[%s11394_s3 + $0x88] sm:$0xff]   ;;  %v8746_v2 = vld [vmem:[%s11394_s3 + $0x50] sm:$0xff]  }
 0x2ec   :  { %5490 = vmatprep.subr.bf16.mxu0 %v8658_v3  ;;  %6049 = vmatprep.subr.bf16.mxu1 %v8661_v4  ;;  %v8747_v3 = vld [vmem:[%s11394_s3 + $0xd0] sm:$0xff]  }
 0x2ed   :  { %v8748_v4 = vld [vmem:[%s11394_s3 + $0x10] sm:$0xff]  }
 0x2ef   :  { %5491 = vmatpush1.bf16.msra.mxu0 %v8656_v5  ;;  %6050 = vmatpush1.bf16.msra.mxu1 %v8659_v6  ;;  %v8749_v5 = vld [vmem:[%s11394_s3 + $0x90] sm:$0xff]   ;;  %v8750_v6 = vld [vmem:[%s11394_s3 + $0x58] sm:$0xff]  }
 0x2f0   :  { %5492 = vmatprep.subr.bf16.mxu0 %v8664_v7  ;;  %6051 = vmatprep.subr.bf16.mxu1 %v8667_v8  ;;  %v8751_v7 = vld [vmem:[%s11394_s3 + $0xd8] sm:$0xff]  }
 0x2f1   :  { %v8752_v8 = vld [vmem:[%s11394_s3 + $0x18] sm:$0xff]  }
 0x2f3   :  { %5493 = vmatpush1.bf16.msra.mxu0 %v8662_v9  ;;  %6052 = vmatpush1.bf16.msra.mxu1 %v8665_v10  ;;  %v8753_v9 = vld [vmem:[%s11394_s3 + $0x98] sm:$0xff]   ;;  %v8754_v10 = vld [vmem:[%s11394_s3 + $0x60] sm:$0xff]  }
 0x2f4   :  { %5494 = vmatprep.subr.bf16.mxu0 %v8670_v11  ;;  %6053 = vmatprep.subr.bf16.mxu1 %v8673_v12  ;;  %v8755_v11 = vld [vmem:[%s11394_s3 + $0xe0] sm:$0xff]  }
 0x2f5   :  { %v8756_v12 = vld [vmem:[%s11394_s3 + $0x20] sm:$0xff]  }
 0x2f7   :  { %5495 = vmatpush1.bf16.msra.mxu0 %v8668_v13  ;;  %6054 = vmatpush1.bf16.msra.mxu1 %v8671_v14  ;;  %v8757_v13 = vld [vmem:[%s11394_s3 + $0xa0] sm:$0xff]   ;;  %v8758_v14 = vld [vmem:[%s11394_s3 + $0x68] sm:$0xff]  }
 0x2f8   :  { %5496 = vmatprep.subr.bf16.mxu0 %v8676_v15  ;;  %6055 = vmatprep.subr.bf16.mxu1 %v8679_v16  ;;  %v8759_v15 = vld [vmem:[%s11394_s3 + $0xe8] sm:$0xff]  }
 0x2f9   :  { %v8760_v16 = vld [vmem:[%s11394_s3 + $0x28] sm:$0xff]  }
 0x2fb   :  { %5497 = vmatpush1.bf16.msra.mxu0 %v8674_v17  ;;  %6056 = vmatpush1.bf16.msra.mxu1 %v8677_v18  ;;  %v8761_v17 = vld [vmem:[%s11394_s3 + $0xa8] sm:$0xff]   ;;  %v8762_v18 = vld [vmem:[%s11394_s3 + $0x70] sm:$0xff]  }
 0x2fc   :  { %5498 = vmatprep.subr.bf16.mxu0 %v8682_v19  ;;  %6057 = vmatprep.subr.bf16.mxu1 %v8685_v20  ;;  %v8763_v19 = vld [vmem:[%s11394_s3 + $0xf0] sm:$0xff]  }
 0x2fd   :  { %v8764_v20 = vld [vmem:[%s11394_s3 + $0x30] sm:$0xff]  }
 0x2ff   :  { %5499 = vmatpush1.bf16.msra.mxu0 %v8680_v21  ;;  %6058 = vmatpush1.bf16.msra.mxu1 %v8683_v22  ;;  %v8765_v21 = vld [vmem:[%s11394_s3 + $0xb0] sm:$0xff]   ;;  %v8766_v22 = vld [vmem:[%s11394_s3 + $0x78] sm:$0xff]  }
 0x300   :  { %5511 = vmatprep.subr.bf16.mxu0 %v8691_v23  ;;  %6070 = vmatprep.subr.bf16.mxu1 %v8694_v24  ;;  %v8767_v23 = vld [vmem:[%s11394_s3 + $0xf8] sm:$0xff]  }
 0x301   :  { %v8768_v24 = vld [vmem:[%s11394_s3 + $0x38] sm:$0xff]  }
 0x302   :  { %5501 = vmatmul.mubr.bf16.vlgmr.msra.gmra.mrb[0].mxu0 %v8686_v25  ;;  %6060 = vmatmul.mubr.bf16.vlgmr.msra.gmra.mrb[0].mxu1 %v8686_v25  ;;  %v8769_v25 = vld [vmem:[%s11394_s3 + $0xb8] sm:$0xff]  }
 0x303   :  { %5512 = vmatpush1.bf16.msra.mxu0 %v8689_v26  ;;  %6071 = vmatpush1.bf16.msra.mxu1 %v8692_v27  ;;  %v849_v26 = vlaneseq }
 0x304   :  { %5513 = vmatprep.subr.bf16.mxu0 %v8697_v28  ;;  %6072 = vmatprep.subr.bf16.mxu1 %v8700_v29 }
 0x305   :  { %5543 = vmatprep.mubr.bf16.mxu0 %v8778_v34  ;;  %6102 = vmatprep.mubr.bf16.mxu1 %v8778_v34  ;;  %v850_v27 = vshrl.u32 %v849_v26, 7 }
 0x307   :  { %5514 = vmatpush1.bf16.msra.mxu0 %v8695_v30  ;;  %6073 = vmatpush1.bf16.msra.mxu1 %v8698_v31  ;;  %v851_v28 = vsub.s32 0, %v850_v27  ;;  %v859_v29 = vsub.s32 2, %v850_v27  ;;  %v847_v30 = vld [vmem:[%s11395_s2] sm:$0xf]  ;;  %v855_v31 = vsub.s32 1, %v850_v27 }
 0x308   :  { %5515 = vmatprep.subr.bf16.mxu0 %v8703_v32  ;;  %6074 = vmatprep.subr.bf16.mxu1 %v8706_v33  ;;  %v863_v32 = vsub.s32 3, %v850_v27 }
 0x309   :  { %v852_v33 = vrot.slane %v847_v30, %v851_v28  ;;  %v860_v34 = vrot.slane %v847_v30, %v859_v29 }
 0x30b   :  { %5516 = vmatpush1.bf16.msra.mxu0 %v8701_v35  ;;  %6075 = vmatpush1.bf16.msra.mxu1 %v8704_v36  ;;  %v856_v35 = vrot.slane %v847_v30, %v855_v31  ;;  %v864_v36 = vrot.slane %v847_v30, %v863_v32 }
 0x30c   :  { %5517 = vmatprep.subr.bf16.mxu0 %v8709_v37  ;;  %6076 = vmatprep.subr.bf16.mxu1 %v8712_v38 }
 0x30f   :  { %5518 = vmatpush1.bf16.msra.mxu0 %v8707_v39  ;;  %6077 = vmatpush1.bf16.msra.mxu1 %v8710_v40 }
 0x310   :  { %5519 = vmatprep.subr.bf16.mxu0 %v8715_v41  ;;  %6078 = vmatprep.subr.bf16.mxu1 %v8718_v42 }
 0x313   :  { %5520 = vmatpush1.bf16.msra.mxu0 %v8713_v43  ;;  %6079 = vmatpush1.bf16.msra.mxu1 %v8716_v44 }
 0x314   :  { %5521 = vmatprep.subr.bf16.mxu0 %v8721_v45  ;;  %6080 = vmatprep.subr.bf16.mxu1 %v8724_v46 }
 0x317   :  { %5522 = vmatpush1.bf16.msra.mxu0 %v8719_v47  ;;  %6081 = vmatpush1.bf16.msra.mxu1 %v8722_v48 }
 0x318   :  { %5523 = vmatprep.subr.bf16.mxu0 %v8727_v49  ;;  %6082 = vmatprep.subr.bf16.mxu1 %v8730_v50 }
 0x31b   :  { %5524 = vmatpush1.bf16.msra.mxu0 %v8725_v51  ;;  %6083 = vmatpush1.bf16.msra.mxu1 %v8728_v52 }
 0x31c   :  { %5525 = vmatprep.subr.bf16.mxu0 %v8733_v53  ;;  %6084 = vmatprep.subr.bf16.mxu1 %v8736_v54 }
 0x31f   :  { %5526 = vmatpush1.bf16.msra.mxu0 %v8731_v55  ;;  %6085 = vmatpush1.bf16.msra.mxu1 %v8734_v56 }
 0x320   :  { %7352 = vmatprep.subr.bf16.mxu0 %v8738_v57  ;;  %7374 = vmatprep.subr.bf16.mxu1 %v8739_v58 }
 0x322   :  { %5544 = vmatmul.mubr.bf16.vlgmr.msra.gmra.mrb[0].mxu0 %v8737_v59  ;;  %6103 = vmatmul.mubr.bf16.vlgmr.msra.gmra.mrb[0].mxu1 %v8737_v59 }
 0x323   :  { %7353 = vmatpush3.bf16.msra.mxu0 %v8740_v60  ;;  %7375 = vmatpush3.bf16.msra.mxu1 %v8741_v61 }
 0x324   :  { %7354 = vmatprep.subr.bf16.mxu0 %v8742_v62  ;;  %7376 = vmatprep.subr.bf16.mxu1 %v8743_v63 }
 0x327   :  { %7355 = vmatpush3.bf16.msra.mxu0 %v8744_v0  ;;  %7377 = vmatpush3.bf16.msra.mxu1 %v8745_v1 }
 0x328   :  { %7356 = vmatprep.subr.bf16.mxu0 %v8746_v2  ;;  %7378 = vmatprep.subr.bf16.mxu1 %v8747_v3  ;;  %v7319_v3 = vld [vmem:[%s11396_s4] ss:$0 sm:$0xff] }
 0x32b   :  { %7357 = vmatpush3.bf16.msra.mxu0 %v8748_v4  ;;  %7379 = vmatpush3.bf16.msra.mxu1 %v8749_v5 }
 0x32c   :  { %7358 = vmatprep.subr.bf16.mxu0 %v8750_v6  ;;  %7380 = vmatprep.subr.bf16.mxu1 %v8751_v7 }
 0x32f   :  { %7359 = vmatpush3.bf16.msra.mxu0 %v8752_v8  ;;  %7381 = vmatpush3.bf16.msra.mxu1 %v8753_v9 }
 0x330   :  { %7360 = vmatprep.subr.bf16.mxu0 %v8754_v10  ;;  %7382 = vmatprep.subr.bf16.mxu1 %v8755_v11 }
 0x333   :  { %7361 = vmatpush3.bf16.msra.mxu0 %v8756_v12  ;;  %7383 = vmatpush3.bf16.msra.mxu1 %v8757_v13 }
 0x334   :  { %7362 = vmatprep.subr.bf16.mxu0 %v8758_v14  ;;  %7384 = vmatprep.subr.bf16.mxu1 %v8759_v15 }
 0x337   :  { %7363 = vmatpush3.bf16.msra.mxu0 %v8760_v16  ;;  %7385 = vmatpush3.bf16.msra.mxu1 %v8761_v17 }
 0x338   :  { %7364 = vmatprep.subr.bf16.mxu0 %v8762_v18  ;;  %7386 = vmatprep.subr.bf16.mxu1 %v8763_v19 }
 0x33b   :  { %7365 = vmatpush3.bf16.msra.mxu0 %v8764_v20  ;;  %7387 = vmatpush3.bf16.msra.mxu1 %v8765_v21 }
 0x33c   :  { %7366 = vmatprep.subr.bf16.mxu0 %v8766_v22  ;;  %7388 = vmatprep.subr.bf16.mxu1 %v8767_v23 }
 0x33f   :  { %7367 = vmatpush3.bf16.msra.mxu0 %v8768_v24  ;;  %7389 = vmatpush3.bf16.msra.mxu1 %v8769_v25 }
 0x3f5   :  { %v5545_v37 = vpop.f32.mrb[0].mxu0  ;;  %v6104_v38 = vpop.f32.mrb[0].mxu1 }
 0x3f6   :  { %v7396_v39 = vadd.f32 %v5545_v37, %v852_v33  ;;  %v7400_v40 = vadd.f32 %v6104_v38, %v860_v34  ;;  %v5547_v41 = vpop.f32.mrb[1].mxu0  ;;  %v6106_v42 = vpop.f32.mrb[1].mxu1 }
 0x3f7   :  { %v7397_v43 = vadd.f32 %v5547_v41, %v856_v35  ;;  %v7401_v44 = vadd.f32 %v6106_v42, %v864_v36  ;;  %v5549_v45 = vpop.f32.mrb[2].mxu0  ;;  %v6108_v46 = vpop.f32.mrb[2].mxu1 }
 0x3f8   :  { %v7398_v47 = vadd.f32 %v5549_v45, %v852_v33  ;;  %v7402_v48 = vadd.f32 %v6108_v46, %v860_v34  ;;  %v5551_v49 = vpop.f32.mrb[3].mxu0  ;;  %v6110_v50 = vpop.f32.mrb[3].mxu1  ;;  %v6113_v53 = vmax.f32 %v7396_v39, 0.0  ;;  %v6115_v54 = vmax.f32 %v7400_v40, 0.0 }
 0x3f9   :  { %v7399_v51 = vadd.f32 %v5551_v49, %v856_v35  ;;  %v7403_v52 = vadd.f32 %v6110_v50, %v864_v36  ;;  %v6114_v57 = vmax.f32 %v7397_v43, 0.0  ;;  %v6116_v58 = vmax.f32 %v7401_v44, 0.0 }
 0x3fa   :  { %v6117_v55 = vmax.f32 %v7398_v47, 0.0  ;;  %v6119_v56 = vmax.f32 %v7402_v48, 0.0 }
 0x3fb   :  { %v6118_v59 = vmax.f32 %v7399_v51, 0.0  ;;  %v6120_v60 = vmax.f32 %v7403_v52, 0.0 }
 0x3fc   :  { %v6121_v61 = vpack.c.bf16 %v6117_v55, %v6113_v53  ;;  %v6123_v62 = vpack.c.bf16 %v6119_v56, %v6115_v54 }
 0x3fd   :  { %v6122_v63 = vpack.c.bf16 %v6118_v59, %v6114_v57  ;;  %v6124_v0 = vpack.c.bf16 %v6120_v60, %v6116_v58 }
 0x3ff   :  { %6420 = vmatprep.mubr.bf16.mxu0 %v6122_v63  ;;  %6461 = vmatprep.mubr.bf16.mxu1 %v6124_v0 }
 0x400   :  { %6421 = vmatmul.mubr.bf16.vlgmr.msra.gmra.mrb[4].mxu0 %v6121_v61  ;;  %6462 = vmatmul.mubr.bf16.vlgmr.msra.gmra.mrb[4].mxu1 %v6123_v62 }
 0x4d3   :  { %v7368_v1 = vpop.f32.mrb[4].mxu0  ;;  %v7390_v2 = vpop.f32.mrb[4].mxu1 }
 0x4d4   :  { %v7369_v4 = vpop.f32.mrb[5].mxu0  ;;  %v7391_v5 = vpop.f32.mrb[5].mxu1 }
 0x4d5   :  { %v7370_v6 = vadd.f32 %v7369_v4, %v7368_v1  ;;  %v7392_v7 = vadd.f32 %v7391_v5, %v7390_v2  ;;  %v7371_v8 = vpop.f32.mrb[6].mxu0  ;;  %v7393_v9 = vpop.f32.mrb[6].mxu1 }
 0x4d6   :  { %v7372_v10 = vpop.f32.mrb[7].mxu0  ;;  %v7394_v11 = vpop.f32.mrb[7].mxu1 }
 0x4d7   :  { %v6423_v12 = vadd.f32 %v7370_v6, %v7319_v3  ;;  %v7373_v13 = vadd.f32 %v7372_v10, %v7371_v8  ;;  %v7395_v14 = vadd.f32 %v7394_v11, %v7393_v9 }
 0x4d9   :  { %v6426_v15 = vadd.f32 %v7373_v13, %v7319_v3  ;;  %v6464_v16 = vadd.f32 %v7392_v7, %v6423_v12 }
 0x4db   :  { %6470 = vmax.xlane.f32.xlu0 %v6464_v16  ;;  %v6467_v17 = vadd.f32 %v7395_v14, %v6426_v15 }
 0x4df   :  { %6472 = vmax.xlane.f32.xlu0 %v6467_v17 }
 0x568   :  { %v6471_v18 = vpop.xlane.xlu0 %6470 }
 0x569   :  { %v6474_v19 = vsub.f32 %v6464_v16, %v6471_v18 }
 0x56b   :  { %v6476_v20 = vmul.f32 1.442695, %v6474_v19 }
 0x56c   :  { %v6473_v21 = vpop.xlane.xlu0 %6472 }
 0x56d   :  { %8770 = vpow2.f32 %v6476_v20  ;;  %v6475_v22 = vsub.f32 %v6467_v17, %v6473_v21 }
 0x56f   :  { %v6478_v23 = vmul.f32 1.442695, %v6475_v22 }
 0x571   :  { %8772 = vpow2.f32 %v6478_v23 }
 0x577   :  { %v8771_v24 = vpop.eup %8770 }
 0x578   :  { %6480 = vadd.xlane.f32.xlu1 %v8771_v24 }
 0x57b   :  { %v8773_v25 = vpop.eup %8772 }
 0x57c   :  { %6482 = vadd.xlane.f32.xlu1 %v8773_v25 }
 0x605   :  { %v6481_v26 = vpop.xlane.xlu1 %6480 }
 0x606   :  { %8774 = vrcp.f32 %v6481_v26 }
 0x609   :  { %v6483_v27 = vpop.xlane.xlu1 %6482 }
 0x60a   :  { %8776 = vrcp.f32 %v6483_v27 }
 0x610   :  { %v8775_v28 = vpop.eup %8774 }
 0x611   :  { %v6486_v29 = vmul.f32 %v8775_v28, %v8771_v24 }
 0x613   :  { %6488 = vst [vmem:[%s11397_s5] sm:$0xff] %v6486_v29 }
 0x614   :  { %v8777_v30 = vpop.eup %8776 }
 0x615   :  { %v6487_v31 = vmul.f32 %v8777_v30, %v8773_v25 }
 0x617   :  { %6489 = vst [vmem:[%s11397_s5 + $0x8] sm:$0xff] %v6487_v31 }

</bundles_post_ra>
